<compile_context>
chip_gen: v5e
topology: v5e:2x2
jax: 0.10.0
libtpu: 0.0.40
codegen_flags: <defaults>
</compile_context>

<pallas_src>
import jax
import jax.numpy as jnp
from jax import lax
from jax.experimental import pallas as pl
from jax.experimental.pallas import tpu as pltpu


# ----------------------------------------------------------------------------- kernel
def s4block_kernel(
    x_ref, xrows_ref, cond_ref, s0r_ref, s0i_ref,      # data
    wblk_ref, blin_ref,                                 # per-timestep channel Linear (lane-blocked)
    wy_ref, dflat_ref,                                  # fused [Toeplitz | state-injection] + f32 D skip
    wns_ref, alr_ref, ali_ref,                          # closed-form next state
    sh_ref, sht_ref,                                    # channel <-> lane selector matrices
    wfilm_ref, bfilm_ref,                               # FiLM
    rw_ref,                                             # depthwise 1x1 residual conv weight (tiled)
    out_ref, nsr_ref, nsi_ref,
):
    f32 = jnp.float32
    bf16 = jnp.bfloat16

    x = x_ref[...]                  # (B, L*H)  lane-dense, flat index = t*H + h
    s0r = s0r_ref[...]              # (B, H*N)  flat index = h*N + n
    s0i = s0i_ref[...]

    B = x.shape[0]
    LH = x.shape[1]
    H = sh_ref.shape[1]
    HN = s0r.shape[1]
    L = LH // H
    lane = wblk_ref.shape[0]
    nchunk = LH // lane
    inv_n = 1.0 / float(B * L)

    # ---- 1) channel Linear + activation1 on full (nchunk*B, lane) vregs (f32 for accuracy) ----
    u_rows = jnp.dot(xrows_ref[...], wblk_ref[...], preferred_element_type=f32) + blin_ref[...]
    u_rows = jax.nn.gelu(u_rows, approximate=True)
    # back to (B, L*H): row c*B+b of u_rows holds lanes [c*lane, (c+1)*lane) of batch b
    # (static sublane slices + 128-aligned lane concatenation; no relayout-heavy reshape)
    u = jnp.concatenate([u_rows[c * B:(c + 1) * B, :] for c in range(nchunk)], axis=1)

    # ---- 2) S4D closed form (no serial recurrence) -----------------------------------------
    # one fused matmul: causal Toeplitz conv + initial-state injection (bf16 weights, f32 acc)
    lhs = jnp.concatenate([u, s0r, s0i], axis=1).astype(bf16)        # (B, LH + 2*HN)
    y = jnp.dot(lhs, wy_ref[...], preferred_element_type=f32)        # (B, LH)
    y = y + dflat_ref[...] * u                                       # D*u skip kept in f32

    # closed-form next state  s_L = dA^L s0 + sum_j dA^(L-1-j) dB u_j  ([real|imag] fused)
    ns = jnp.dot(u.astype(bf16), wns_ref[...], preferred_element_type=f32)   # (B, 2*HN)
    alr = alr_ref[...]
    ali = ali_ref[...]
    nsr_ref[...] = s0r * alr - s0i * ali + ns[:, :HN]
    nsi_ref[...] = s0r * ali + s0i * alr + ns[:, HN:]

    # ---- 3) BatchNorm1d(affine=False): training-mode stats over (B, L) per channel ---------
    ysum = jnp.sum(y, axis=0, keepdims=True)                         # VPU batch reduce first
    y2sum = jnp.sum(y * y, axis=0, keepdims=True)
    mean_h = jnp.dot(ysum, sh_ref[...], preferred_element_type=f32) * inv_n      # (1, H)
    msq_h = jnp.dot(y2sum, sh_ref[...], preferred_element_type=f32) * inv_n
    var_h = msq_h - mean_h * mean_h
    mean_f = jnp.dot(mean_h, sht_ref[...], preferred_element_type=f32)           # (1, LH)
    inv_f = jnp.dot(lax.rsqrt(var_h + 1e-5), sht_ref[...], preferred_element_type=f32)
    yn = (y - mean_f) * inv_f

    # ---- 4) FiLM ----------------------------------------------------------------------------
    gb = jnp.dot(cond_ref[...], wfilm_ref[...], preferred_element_type=f32) + bfilm_ref[...]  # (B, 2H)
    gamma_f = jnp.dot(gb[:, :H], sht_ref[...], preferred_element_type=f32)        # (B, LH)
    beta_f = jnp.dot(gb[:, H:], sht_ref[...], preferred_element_type=f32)
    o = gamma_f * yn + beta_f

    # ---- 5) activation2 + depthwise 1x1 residual conv (per-channel scale of x) --------------
    o = jax.nn.gelu(o, approximate=True)
    out_ref[...] = o + rw_ref[...] * x


# ----------------------------------------------------------------------------- one-time operand builder
def build_s4block_operands(params, L, lane=128):
    """One-time parameter glue. Call ONCE (outside the per-step jit) and reuse the result.

    Builds the fused, lane-dense operand matrices consumed by the kernel; the large
    MXU-only matrices are cast to bf16 (activations stay f32, dots accumulate in f32).
    """
    f32, bf16 = jnp.float32, jnp.bfloat16
    H, N = params["dA_r"].shape
    if (L * H) % lane != 0 or lane % H != 0:
        lane = H   # TODO(synk): masked-lane fallback when H does not divide 128
    LH, HN = L * H, H * N

    dAr, dAi = params["dA_r"], params["dA_i"]
    dBr, dBi = params["dB_r"], params["dB_i"]
    Cr, Ci = params["C_r"], params["C_i"]

    # analytic power table dA^t = |dA|^t * exp(i * t * angle(dA)),  t = 0..L  (no serial chain)
    logmag = 0.5 * jnp.log(dAr * dAr + dAi * dAi)                    # (H, N)
    theta = jnp.arctan2(dAi, dAr)
    t = jnp.arange(L + 1, dtype=f32)[:, None, None]
    mag = jnp.exp(t * logmag[None])
    Pr = mag * jnp.cos(t * theta[None])                              # (L+1, H, N)
    Pi = mag * jnp.sin(t * theta[None])

    eyeH = jnp.eye(H, dtype=f32)

    # causal Toeplitz kernel K[tau, h] = 2*Re(sum_n C dB dA^tau)   (D skip stays separate / f32)
    CBr = Cr * dBr - Ci * dBi
    CBi = Cr * dBi + Ci * dBr
    K = 2.0 * (jnp.einsum('hn,thn->th', CBr, Pr[:L]) - jnp.einsum('hn,thn->th', CBi, Pi[:L]))
    idx = jnp.arange(L)
    tau = idx[None, :] - idx[:, None]                                # [j, t] = t - j
    Ktj = jnp.where((tau >= 0)[:, :, None], K[jnp.clip(tau, 0)], 0.0)            # (j, t, H)
    Mconv = jnp.transpose(Ktj[:, :, None, :] * eyeH[None, None, :, :],
                          (0, 2, 1, 3)).reshape(LH, LH)              # [(j,hi), (t,ho)]

    # initial-state injection  y_t += 2*Re(C dA^(t+1) s0)
    CPr = Cr[None] * Pr[1:L + 1] - Ci[None] * Pi[1:L + 1]
    CPi = Cr[None] * Pi[1:L + 1] + Ci[None] * Pr[1:L + 1]
    Ginj_r = jnp.einsum('thn,gh->gnth', 2.0 * CPr, eyeH).reshape(HN, LH)
    Ginj_i = jnp.einsum('thn,gh->gnth', -2.0 * CPi, eyeH).reshape(HN, LH)

    # fused y weights:  y = [u | s0r | s0i] @ W_y
    W_y = jnp.concatenate([Mconv, Ginj_r, Ginj_i], axis=0).astype(bf16)           # (LH+2HN, LH)

    # closed-form next state  s_L = dA^L s0 + sum_j dA^(L-1-j) dB u_j
    PRf = jnp.flip(Pr[:L], axis=0)                                   # dA^(L-1-j)
    PIf = jnp.flip(Pi[:L], axis=0)
    PBr = PRf * dBr[None] - PIf * dBi[None]
    PBi = PRf * dBi[None] + PIf * dBr[None]
    Wns_r = jnp.einsum('jhn,gh->jghn', PBr, eyeH).reshape(LH, HN)
    Wns_i = jnp.einsum('jhn,gh->jghn', PBi, eyeH).reshape(LH, HN)
    W_ns = jnp.concatenate([Wns_r, Wns_i], axis=1).astype(bf16)                   # (LH, 2HN)

    return dict(
        # per-timestep channel Linear, lane-blocked: (lane, lane) instead of (L*H, L*H)
        w_blk=jnp.kron(jnp.eye(lane // H, dtype=f32), params["w_lin"].T),
        b_blk=jnp.tile(params["b_lin"], lane // H).reshape(1, lane),
        w_y=W_y,
        d_flat=jnp.tile(params["D"], L).reshape(1, LH),
        w_ns=W_ns,
        al_r=Pr[L].reshape(1, HN),
        al_i=Pi[L].reshape(1, HN),
        sel_h=jnp.tile(eyeH, (L, 1)),                                # (LH, H)
        sel_ht=jnp.tile(eyeH, (1, L)),                               # (H, LH)
        w_film=params["w_film"],
        b_film=params["b_film"].reshape(1, -1),
        rw_flat=jnp.tile(params["rw"], L).reshape(1, LH),
    )


# ----------------------------------------------------------------------------- wrapper
def s4block_forward(x, cond, state_r, state_i, ops):
    """x: (B, H, L); cond: (B, C); state_*: (B, H, N). Returns ((B,H,L), (next_r, next_i))."""
    B, H, L = x.shape
    N = state_r.shape[2]
    LH, HN = L * H, H * N
    lane = ops["w_blk"].shape[0]
    nchunk = LH // lane

    # lane-dense activation layout (wrapper-side layout plumbing only)
    x_flat = jnp.transpose(x, (0, 2, 1)).reshape(B, LH)              # [b, t*H + h]
    x_rows = x_flat.reshape(B, nchunk, lane).transpose(1, 0, 2).reshape(nchunk * B, lane)
    s0r = state_r.reshape(B, HN)                                     # [b, h*N + n]
    s0i = state_i.reshape(B, HN)

    inputs = (
        x_flat, x_rows, cond, s0r, s0i,
        ops["w_blk"], ops["b_blk"],
        ops["w_y"], ops["d_flat"],
        ops["w_ns"], ops["al_r"], ops["al_i"],
        ops["sel_h"], ops["sel_ht"],
        ops["w_film"], ops["b_film"],
        ops["rw_flat"],
    )

    # advisory cost hint: tiny-FLOP, DMA-bound kernel
    flops = 2 * (nchunk * B * lane * lane
                 + B * (LH + 2 * HN) * LH
                 + B * LH * 2 * HN
                 + 4 * LH * H
                 + 2 * B * H * LH
                 + B * cond.shape[1] * 2 * H)
    bytes_accessed = sum(int(a.size) * a.dtype.itemsize for a in inputs) + 4 * (B * LH + 2 * B * HN)
    cost = pl.CostEstimate(flops=flops, transcendentals=2 * B * LH,
                           bytes_accessed=bytes_accessed)

    vmem = pl.BlockSpec(memory_space=pltpu.MemorySpace.VMEM)
    out_flat, nsr, nsi = pl.pallas_call(
        s4block_kernel,
        out_shape=(
            jax.ShapeDtypeStruct((B, LH), jnp.float32),
            jax.ShapeDtypeStruct((B, HN), jnp.float32),
            jax.ShapeDtypeStruct((B, HN), jnp.float32),
        ),
        in_specs=[vmem] * len(inputs),
        out_specs=(vmem, vmem, vmem),
        input_output_aliases={3: 1, 4: 2},   # s0r -> next_r, s0i -> next_i
        cost_estimate=cost,
    )(*inputs)

    out = jnp.transpose(out_flat.reshape(B, L, H), (0, 2, 1))        # (B, H, L)
    return out, (nsr.reshape(B, H, N), nsi.reshape(B, H, N))


# ----------------------------------------------------------------------------- reference (self-check only)
def _reference_forward(x, cond, state_r, state_i, params):
    """Plain-JAX reference with the naive per-step recurrence (used only to verify the kernel)."""
    B, H, L = x.shape
    u = jnp.einsum('gh,bhl->bgl', params["w_lin"], x) + params["b_lin"][None, :, None]
    u = jax.nn.gelu(u, approximate=True)                             # (B, H, L)

    dAr, dAi = params["dA_r"], params["dA_i"]
    dBr, dBi = params["dB_r"], params["dB_i"]
    Cr, Ci = params["C_r"], params["C_i"]

    def step(carry, u_t):                                            # u_t: (B, H)
        sr, si = carry                                               # (B, H, N)
        sr_n = dAr[None] * sr - dAi[None] * si + dBr[None] * u_t[:, :, None]
        si_n = dAr[None] * si + dAi[None] * sr + dBi[None] * u_t[:, :, None]
        y_t = 2.0 * jnp.sum(Cr[None] * sr_n - Ci[None] * si_n, axis=-1) + params["D"][None] * u_t
        return (sr_n, si_n), y_t

    (sr_f, si_f), ys = lax.scan(step, (state_r, state_i), jnp.transpose(u, (2, 0, 1)))
    y = jnp.transpose(ys, (1, 2, 0))                                 # (B, H, L)

    mean = jnp.mean(y, axis=(0, 2), keepdims=True)
    var = jnp.mean((y - mean) ** 2, axis=(0, 2), keepdims=True)
    yn = (y - mean) * lax.rsqrt(var + 1e-5)

    gb = cond @ params["w_film"] + params["b_film"][None, :]
    gamma = gb[:, :H][:, :, None]
    beta = gb[:, H:][:, :, None]
    o = jax.nn.gelu(gamma * yn + beta, approximate=True)
    o = o + params["rw"][None, :, None] * x
    return o, (sr_f, si_f)


# ----------------------------------------------------------------------------- params
def make_params(key, H, N, cond_dim):
    ks = jax.random.split(key, 8)
    # nn.Linear(H, H)
    bound = 1.0 / jnp.sqrt(H)
    w_lin = jax.random.uniform(ks[0], (H, H), minval=-bound, maxval=bound, dtype=jnp.float32)
    b_lin = jax.random.uniform(ks[1], (H,), minval=-bound, maxval=bound, dtype=jnp.float32)

    # S4D-Lin initialization, ZOH discretization (parameter glue)
    A_re = -0.5 * jnp.ones((H, N), jnp.float32)
    A_im = jnp.pi * jnp.broadcast_to(jnp.arange(N, dtype=jnp.float32)[None, :], (H, N))
    log_dt = jnp.linspace(jnp.log(1e-3), jnp.log(1e-1), H, dtype=jnp.float32)[:, None]
    dt = jnp.exp(log_dt)
    dtA_re = dt * A_re
    dtA_im = dt * A_im
    mag = jnp.exp(dtA_re)
    dA_r = mag * jnp.cos(dtA_im)
    dA_i = mag * jnp.sin(dtA_im)
    denom = A_re * A_re + A_im * A_im
    dB_r = ((dA_r - 1.0) * A_re + dA_i * A_im) / denom
    dB_i = (dA_i * A_re - (dA_r - 1.0) * A_im) / denom
    C_r = jax.random.normal(ks[2], (H, N), jnp.float32) * jnp.sqrt(0.5)
    C_i = jax.random.normal(ks[3], (H, N), jnp.float32) * jnp.sqrt(0.5)
    D = jax.random.normal(ks[4], (H,), jnp.float32)

    # FiLM: Linear(cond_dim -> 2H)
    bf = 1.0 / jnp.sqrt(cond_dim)
    w_film = jax.random.uniform(ks[5], (cond_dim, 2 * H), minval=-bf, maxval=bf, dtype=jnp.float32)
    b_film = jax.random.uniform(ks[6], (2 * H,), minval=-bf, maxval=bf, dtype=jnp.float32)

    # residual depthwise Conv1d(H, H, k=1, groups=H, bias=False): weight (H,1,1) -> (H,)
    rw = jax.random.uniform(ks[7], (H,), minval=-1.0, maxval=1.0, dtype=jnp.float32)

    return dict(
        w_lin=w_lin, b_lin=b_lin,
        dA_r=dA_r, dA_i=dA_i, dB_r=dB_r, dB_i=dB_i,
        C_r=C_r, C_i=C_i, D=D,
        w_film=w_film, b_film=b_film, rw=rw,
    )


if __name__ == "__main__":
    B, H, L = 2, 16, 32          # batch, inner_audio_channel, sequence length
    N, COND = 16, 8              # s4_hidden_size, conditional_information_dimension

    key = jax.random.PRNGKey(0)
    k_par, k_x, k_c, k_sr, k_si = jax.random.split(key, 5)

    params = make_params(k_par, H, N, COND)
    x = jax.random.normal(k_x, (B, H, L), jnp.float32)
    cond = jax.random.normal(k_c, (B, COND), jnp.float32)
    state_r = 0.1 * jax.random.normal(k_sr, (B, H, N), jnp.float32)  # small nonzero initial state
    state_i = 0.1 * jax.random.normal(k_si, (B, H, N), jnp.float32)

    # one-time parameter glue (cached outside the per-call jit)
    ops = build_s4block_operands(params, L)
    jax.block_until_ready(ops)

    fwd = jax.jit(s4block_forward)
    out, (next_r, next_i) = fwd(x, cond, state_r, state_i, ops)
    jax.block_until_ready((out, next_r, next_i))

    assert out.shape == (B, H, L)
    assert next_r.shape == (B, H, N) and next_i.shape == (B, H, N)
    assert bool(jnp.all(jnp.isfinite(out)))

    # numerical self-check against the naive-recurrence f32 reference
    # (kernel uses bf16 for the large parameter-only matmuls -> modest tolerance)
    ref_out, (ref_r, ref_i) = jax.jit(_reference_forward)(x, cond, state_r, state_i, params)
    err_out = float(jnp.max(jnp.abs(out - ref_out)))
    err_state = max(float(jnp.max(jnp.abs(next_r - ref_r))),
                    float(jnp.max(jnp.abs(next_i - ref_i))))
    assert err_out < 7.5e-2 and err_state < 5e-2, (err_out, err_state)

    print("KERNEL_OK")
</pallas_src>

<mosaic_0001>
module attributes {stable_mosaic.version = 11 : i64} {
  func.func @s4block_kernel(%arg0: memref<2x512xf32, #tpu.memory_space<vmem>>, %arg1: memref<8x128xf32, #tpu.memory_space<vmem>>, %arg2: memref<2x8xf32, #tpu.memory_space<vmem>>, %arg3: memref<2x256xf32, #tpu.memory_space<vmem>>, %arg4: memref<2x256xf32, #tpu.memory_space<vmem>>, %arg5: memref<128x128xf32, #tpu.memory_space<vmem>>, %arg6: memref<1x128xf32, #tpu.memory_space<vmem>>, %arg7: memref<1024x512xbf16, #tpu.memory_space<vmem>>, %arg8: memref<1x512xf32, #tpu.memory_space<vmem>>, %arg9: memref<512x512xbf16, #tpu.memory_space<vmem>>, %arg10: memref<1x256xf32, #tpu.memory_space<vmem>>, %arg11: memref<1x256xf32, #tpu.memory_space<vmem>>, %arg12: memref<512x16xf32, #tpu.memory_space<vmem>>, %arg13: memref<16x512xf32, #tpu.memory_space<vmem>>, %arg14: memref<8x32xf32, #tpu.memory_space<vmem>>, %arg15: memref<1x32xf32, #tpu.memory_space<vmem>>, %arg16: memref<1x512xf32, #tpu.memory_space<vmem>>, %arg17: memref<2x512xf32, #tpu.memory_space<vmem>>, %arg18: memref<2x256xf32, #tpu.memory_space<vmem>>, %arg19: memref<2x256xf32, #tpu.memory_space<vmem>>) attributes {dimension_semantics = [], scalar_prefetch = 0 : i64, scratch_operands = 0 : i64, tpu.core_type = #tpu.core_type<tc>} {
    %c0 = arith.constant 0 : index
    %c0_0 = arith.constant 0 : index
    %0 = vector.load %arg0[%c0, %c0_0] : memref<2x512xf32, #tpu.memory_space<vmem>>, vector<2x512xf32>
    %c0_1 = arith.constant 0 : index
    %c0_2 = arith.constant 0 : index
    %1 = vector.load %arg3[%c0_1, %c0_2] : memref<2x256xf32, #tpu.memory_space<vmem>>, vector<2x256xf32>
    %c0_3 = arith.constant 0 : index
    %c0_4 = arith.constant 0 : index
    %2 = vector.load %arg4[%c0_3, %c0_4] : memref<2x256xf32, #tpu.memory_space<vmem>>, vector<2x256xf32>
    %c0_5 = arith.constant 0 : index
    %c0_6 = arith.constant 0 : index
    %3 = vector.load %arg1[%c0_5, %c0_6] : memref<8x128xf32, #tpu.memory_space<vmem>>, vector<8x128xf32>
    %c0_7 = arith.constant 0 : index
    %c0_8 = arith.constant 0 : index
    %4 = vector.load %arg5[%c0_7, %c0_8] : memref<128x128xf32, #tpu.memory_space<vmem>>, vector<128x128xf32>
    %cst = arith.constant dense<0.000000e+00> : vector<8x128xf32>
    %5 = tpu.matmul %3, %4, %cst {dimension_numbers = #tpu.dot_dimension_numbers<[1], [0], [0], [1], [0, 0, 1, 1], [], []>} : vector<8x128xf32>, vector<128x128xf32>, vector<8x128xf32> -> vector<8x128xf32>
    %c0_9 = arith.constant 0 : index
    %c0_10 = arith.constant 0 : index
    %6 = vector.load %arg6[%c0_9, %c0_10] : memref<1x128xf32, #tpu.memory_space<vmem>>, vector<1x128xf32>
    %7 = vector.broadcast %6 : vector<1x128xf32> to vector<8x128xf32>
    %8 = arith.addf %5, %7 : vector<8x128xf32>
    %9 = arith.mulf %8, %8 : vector<8x128xf32>
    %10 = arith.mulf %8, %9 : vector<8x128xf32>
    %cst_11 = arith.constant 4.471500e-02 : f32
    %11 = vector.broadcast %cst_11 : f32 to vector<8x128xf32>
    %12 = arith.mulf %11, %10 : vector<8x128xf32>
    %13 = arith.addf %8, %12 : vector<8x128xf32>
    %cst_12 = arith.constant 0.797884583 : f32
    %14 = vector.broadcast %cst_12 : f32 to vector<8x128xf32>
    %15 = arith.mulf %14, %13 : vector<8x128xf32>
    %16 = math.tanh %15 : vector<8x128xf32>
    %cst_13 = arith.constant 1.000000e+00 : f32
    %17 = vector.broadcast %cst_13 : f32 to vector<8x128xf32>
    %18 = arith.addf %17, %16 : vector<8x128xf32>
    %cst_14 = arith.constant 5.000000e-01 : f32
    %19 = vector.broadcast %cst_14 : f32 to vector<8x128xf32>
    %20 = arith.mulf %19, %18 : vector<8x128xf32>
    %21 = arith.mulf %8, %20 : vector<8x128xf32>
    %22 = vector.extract_strided_slice %21 {offsets = [0, 0], sizes = [2, 128], strides = [1, 1]} : vector<8x128xf32> to vector<2x128xf32>
    %23 = vector.extract_strided_slice %21 {offsets = [2, 0], sizes = [2, 128], strides = [1, 1]} : vector<8x128xf32> to vector<2x128xf32>
    %24 = vector.extract_strided_slice %21 {offsets = [4, 0], sizes = [2, 128], strides = [1, 1]} : vector<8x128xf32> to vector<2x128xf32>
    %25 = vector.extract_strided_slice %21 {offsets = [6, 0], sizes = [2, 128], strides = [1, 1]} : vector<8x128xf32> to vector<2x128xf32>
    %26 = tpu.concatenate %22, %23, %24, %25 in 1 : vector<2x128xf32>, vector<2x128xf32>, vector<2x128xf32>, vector<2x128xf32> -> vector<2x512xf32>
    %27 = tpu.concatenate %26, %1, %2 in 1 : vector<2x512xf32>, vector<2x256xf32>, vector<2x256xf32> -> vector<2x1024xf32>
    %28 = arith.truncf %27 : vector<2x1024xf32> to vector<2x1024xbf16>
    %c0_15 = arith.constant 0 : index
    %c0_16 = arith.constant 0 : index
    %29 = vector.load %arg7[%c0_15, %c0_16] : memref<1024x512xbf16, #tpu.memory_space<vmem>>, vector<1024x512xbf16>
    %cst_17 = arith.constant dense<0.000000e+00> : vector<2x512xf32>
    %30 = tpu.matmul %28, %29, %cst_17 {dimension_numbers = #tpu.dot_dimension_numbers<[1], [0], [0], [1], [0, 0, 1, 1], [], []>} : vector<2x1024xbf16>, vector<1024x512xbf16>, vector<2x512xf32> -> vector<2x512xf32>
    %c0_18 = arith.constant 0 : index
    %c0_19 = arith.constant 0 : index
    %31 = vector.load %arg8[%c0_18, %c0_19] : memref<1x512xf32, #tpu.memory_space<vmem>>, vector<1x512xf32>
    %32 = vector.broadcast %31 : vector<1x512xf32> to vector<2x512xf32>
    %33 = arith.mulf %32, %26 : vector<2x512xf32>
    %34 = arith.addf %30, %33 : vector<2x512xf32>
    %35 = arith.truncf %26 : vector<2x512xf32> to vector<2x512xbf16>
    %c0_20 = arith.constant 0 : index
    %c0_21 = arith.constant 0 : index
    %36 = vector.load %arg9[%c0_20, %c0_21] : memref<512x512xbf16, #tpu.memory_space<vmem>>, vector<512x512xbf16>
    %cst_22 = arith.constant dense<0.000000e+00> : vector<2x512xf32>
    %37 = tpu.matmul %35, %36, %cst_22 {dimension_numbers = #tpu.dot_dimension_numbers<[1], [0], [0], [1], [0, 0, 1, 1], [], []>} : vector<2x512xbf16>, vector<512x512xbf16>, vector<2x512xf32> -> vector<2x512xf32>
    %c0_23 = arith.constant 0 : index
    %c0_24 = arith.constant 0 : index
    %38 = vector.load %arg10[%c0_23, %c0_24] : memref<1x256xf32, #tpu.memory_space<vmem>>, vector<1x256xf32>
    %c0_25 = arith.constant 0 : index
    %c0_26 = arith.constant 0 : index
    %39 = vector.load %arg11[%c0_25, %c0_26] : memref<1x256xf32, #tpu.memory_space<vmem>>, vector<1x256xf32>
    %40 = vector.broadcast %38 : vector<1x256xf32> to vector<2x256xf32>
    %41 = arith.mulf %1, %40 : vector<2x256xf32>
    %42 = vector.broadcast %39 : vector<1x256xf32> to vector<2x256xf32>
    %43 = arith.mulf %2, %42 : vector<2x256xf32>
    %44 = arith.subf %41, %43 : vector<2x256xf32>
    %45 = vector.extract_strided_slice %37 {offsets = [0, 0], sizes = [2, 256], strides = [1, 1]} : vector<2x512xf32> to vector<2x256xf32>
    %46 = arith.addf %44, %45 : vector<2x256xf32>
    %c0_27 = arith.constant 0 : index
    %c0_28 = arith.constant 0 : index
    %47 = vector.load %arg18[%c0_27, %c0_28] : memref<2x256xf32, #tpu.memory_space<vmem>>, vector<2x256xf32>
    tpu.vector_store %arg18[%c0_27, %c0_28], %46 {strides = array<i32>} : memref<2x256xf32, #tpu.memory_space<vmem>>, vector<2x256xf32>,
    %48 = vector.broadcast %39 : vector<1x256xf32> to vector<2x256xf32>
    %49 = arith.mulf %1, %48 : vector<2x256xf32>
    %50 = vector.broadcast %38 : vector<1x256xf32> to vector<2x256xf32>
    %51 = arith.mulf %2, %50 : vector<2x256xf32>
    %52 = arith.addf %49, %51 : vector<2x256xf32>
    %53 = vector.extract_strided_slice %37 {offsets = [0, 256], sizes = [2, 256], strides = [1, 1]} : vector<2x512xf32> to vector<2x256xf32>
    %54 = arith.addf %52, %53 : vector<2x256xf32>
    %c0_29 = arith.constant 0 : index
    %c0_30 = arith.constant 0 : index
    %55 = vector.load %arg19[%c0_29, %c0_30] : memref<2x256xf32, #tpu.memory_space<vmem>>, vector<2x256xf32>
    tpu.vector_store %arg19[%c0_29, %c0_30], %54 {strides = array<i32>} : memref<2x256xf32, #tpu.memory_space<vmem>>, vector<2x256xf32>,
    %cst_31 = arith.constant dense<0.000000e+00> : vector<512xf32>
    %56 = vector.multi_reduction <add>, %34, %cst_31 [0] : vector<2x512xf32> to vector<512xf32>
    %57 = vector.shape_cast %56 : vector<512xf32> to vector<1x512xf32>
    %58 = arith.mulf %34, %34 : vector<2x512xf32>
    %cst_32 = arith.constant dense<0.000000e+00> : vector<512xf32>
    %59 = vector.multi_reduction <add>, %58, %cst_32 [0] : vector<2x512xf32> to vector<512xf32>
    %60 = vector.shape_cast %59 : vector<512xf32> to vector<1x512xf32>
    %c0_33 = arith.constant 0 : index
    %c0_34 = arith.constant 0 : index
    %61 = vector.load %arg12[%c0_33, %c0_34] : memref<512x16xf32, #tpu.memory_space<vmem>>, vector<512x16xf32>
    %cst_35 = arith.constant dense<0.000000e+00> : vector<1x16xf32>
    %62 = tpu.matmul %57, %61, %cst_35 {dimension_numbers = #tpu.dot_dimension_numbers<[1], [0], [0], [1], [0, 0, 1, 1], [], []>} : vector<1x512xf32>, vector<512x16xf32>, vector<1x16xf32> -> vector<1x16xf32>
    %cst_36 = arith.constant 1.562500e-02 : f32
    %63 = vector.broadcast %cst_36 : f32 to vector<1x16xf32>
    %64 = arith.mulf %62, %63 : vector<1x16xf32>
    %c0_37 = arith.constant 0 : index
    %c0_38 = arith.constant 0 : index
    %65 = vector.load %arg12[%c0_37, %c0_38] : memref<512x16xf32, #tpu.memory_space<vmem>>, vector<512x16xf32>
    %cst_39 = arith.constant dense<0.000000e+00> : vector<1x16xf32>
    %66 = tpu.matmul %60, %65, %cst_39 {dimension_numbers = #tpu.dot_dimension_numbers<[1], [0], [0], [1], [0, 0, 1, 1], [], []>} : vector<1x512xf32>, vector<512x16xf32>, vector<1x16xf32> -> vector<1x16xf32>
    %cst_40 = arith.constant 1.562500e-02 : f32
    %67 = vector.broadcast %cst_40 : f32 to vector<1x16xf32>
    %68 = arith.mulf %66, %67 : vector<1x16xf32>
    %69 = arith.mulf %64, %64 : vector<1x16xf32>
    %70 = arith.subf %68, %69 : vector<1x16xf32>
    %c0_41 = arith.constant 0 : index
    %c0_42 = arith.constant 0 : index
    %71 = vector.load %arg13[%c0_41, %c0_42] : memref<16x512xf32, #tpu.memory_space<vmem>>, vector<16x512xf32>
    %cst_43 = arith.constant dense<0.000000e+00> : vector<1x512xf32>
    %72 = tpu.matmul %64, %71, %cst_43 {dimension_numbers = #tpu.dot_dimension_numbers<[1], [0], [0], [1], [0, 0, 1, 1], [], []>} : vector<1x16xf32>, vector<16x512xf32>, vector<1x512xf32> -> vector<1x512xf32>
    %cst_44 = arith.constant 9.99999974E-6 : f32
    %73 = vector.broadcast %cst_44 : f32 to vector<1x16xf32>
    %74 = arith.addf %70, %73 : vector<1x16xf32>
    %75 = math.rsqrt %74 : vector<1x16xf32>
    %c0_45 = arith.constant 0 : index
    %c0_46 = arith.constant 0 : index
    %76 = vector.load %arg13[%c0_45, %c0_46] : memref<16x512xf32, #tpu.memory_space<vmem>>, vector<16x512xf32>
    %cst_47 = arith.constant dense<0.000000e+00> : vector<1x512xf32>
    %77 = tpu.matmul %75, %76, %cst_47 {dimension_numbers = #tpu.dot_dimension_numbers<[1], [0], [0], [1], [0, 0, 1, 1], [], []>} : vector<1x16xf32>, vector<16x512xf32>, vector<1x512xf32> -> vector<1x512xf32>
    %78 = vector.broadcast %72 : vector<1x512xf32> to vector<2x512xf32>
    %79 = arith.subf %34, %78 : vector<2x512xf32>
    %80 = vector.broadcast %77 : vector<1x512xf32> to vector<2x512xf32>
    %81 = arith.mulf %79, %80 : vector<2x512xf32>
    %c0_48 = arith.constant 0 : index
    %c0_49 = arith.constant 0 : index
    %82 = vector.load %arg2[%c0_48, %c0_49] : memref<2x8xf32, #tpu.memory_space<vmem>>, vector<2x8xf32>
    %c0_50 = arith.constant 0 : index
    %c0_51 = arith.constant 0 : index
    %83 = vector.load %arg14[%c0_50, %c0_51] : memref<8x32xf32, #tpu.memory_space<vmem>>, vector<8x32xf32>
    %cst_52 = arith.constant dense<0.000000e+00> : vector<2x32xf32>
    %84 = tpu.matmul %82, %83, %cst_52 {dimension_numbers = #tpu.dot_dimension_numbers<[1], [0], [0], [1], [0, 0, 1, 1], [], []>} : vector<2x8xf32>, vector<8x32xf32>, vector<2x32xf32> -> vector<2x32xf32>
    %c0_53 = arith.constant 0 : index
    %c0_54 = arith.constant 0 : index
    %85 = vector.load %arg15[%c0_53, %c0_54] : memref<1x32xf32, #tpu.memory_space<vmem>>, vector<1x32xf32>
    %86 = vector.broadcast %85 : vector<1x32xf32> to vector<2x32xf32>
    %87 = arith.addf %84, %86 : vector<2x32xf32>
    %88 = vector.extract_strided_slice %87 {offsets = [0, 0], sizes = [2, 16], strides = [1, 1]} : vector<2x32xf32> to vector<2x16xf32>
    %c0_55 = arith.constant 0 : index
    %c0_56 = arith.constant 0 : index
    %89 = vector.load %arg13[%c0_55, %c0_56] : memref<16x512xf32, #tpu.memory_space<vmem>>, vector<16x512xf32>
    %cst_57 = arith.constant dense<0.000000e+00> : vector<2x512xf32>
    %90 = tpu.matmul %88, %89, %cst_57 {dimension_numbers = #tpu.dot_dimension_numbers<[1], [0], [0], [1], [0, 0, 1, 1], [], []>} : vector<2x16xf32>, vector<16x512xf32>, vector<2x512xf32> -> vector<2x512xf32>
    %91 = vector.extract_strided_slice %87 {offsets = [0, 16], sizes = [2, 16], strides = [1, 1]} : vector<2x32xf32> to vector<2x16xf32>
    %c0_58 = arith.constant 0 : index
    %c0_59 = arith.constant 0 : index
    %92 = vector.load %arg13[%c0_58, %c0_59] : memref<16x512xf32, #tpu.memory_space<vmem>>, vector<16x512xf32>
    %cst_60 = arith.constant dense<0.000000e+00> : vector<2x512xf32>
    %93 = tpu.matmul %91, %92, %cst_60 {dimension_numbers = #tpu.dot_dimension_numbers<[1], [0], [0], [1], [0, 0, 1, 1], [], []>} : vector<2x16xf32>, vector<16x512xf32>, vector<2x512xf32> -> vector<2x512xf32>
    %94 = arith.mulf %90, %81 : vector<2x512xf32>
    %95 = arith.addf %94, %93 : vector<2x512xf32>
    %96 = arith.mulf %95, %95 : vector<2x512xf32>
    %97 = arith.mulf %95, %96 : vector<2x512xf32>
    %cst_61 = arith.constant 4.471500e-02 : f32
    %98 = vector.broadcast %cst_61 : f32 to vector<2x512xf32>
    %99 = arith.mulf %98, %97 : vector<2x512xf32>
    %100 = arith.addf %95, %99 : vector<2x512xf32>
    %cst_62 = arith.constant 0.797884583 : f32
    %101 = vector.broadcast %cst_62 : f32 to vector<2x512xf32>
    %102 = arith.mulf %101, %100 : vector<2x512xf32>
    %103 = math.tanh %102 : vector<2x512xf32>
    %cst_63 = arith.constant 1.000000e+00 : f32
    %104 = vector.broadcast %cst_63 : f32 to vector<2x512xf32>
    %105 = arith.addf %104, %103 : vector<2x512xf32>
    %cst_64 = arith.constant 5.000000e-01 : f32
    %106 = vector.broadcast %cst_64 : f32 to vector<2x512xf32>
    %107 = arith.mulf %106, %105 : vector<2x512xf32>
    %108 = arith.mulf %95, %107 : vector<2x512xf32>
    %c0_65 = arith.constant 0 : index
    %c0_66 = arith.constant 0 : index
    %109 = vector.load %arg16[%c0_65, %c0_66] : memref<1x512xf32, #tpu.memory_space<vmem>>, vector<1x512xf32>
    %110 = vector.broadcast %109 : vector<1x512xf32> to vector<2x512xf32>
    %111 = arith.mulf %110, %0 : vector<2x512xf32>
    %112 = arith.addf %108, %111 : vector<2x512xf32>
    %c0_67 = arith.constant 0 : index
    %c0_68 = arith.constant 0 : index
    %113 = vector.load %arg17[%c0_67, %c0_68] : memref<2x512xf32, #tpu.memory_space<vmem>>, vector<2x512xf32>
    tpu.vector_store %arg17[%c0_67, %c0_68], %112 {strides = array<i32>} : memref<2x512xf32, #tpu.memory_space<vmem>>, vector<2x512xf32>,
    return
  }
}

</mosaic_0001>

<bundles_post_ra>
// kernel: s4block_forward.1
= control target key start
LH: loop header
LB: loop body
LE: loop exit
PB: predicated region body
PF: predicated region fallthrough
CT: control target
= control target key end

     0   :  { %s6887_s0 = inlined_call_operand.vmem [shape: f32[2,512], index: 0, kind: input, shape index: {}]   ;;  %s6888_s1 = inlined_call_operand.vmem [shape: f32[8,128], index: 1, kind: input, shape index: {}]   ;;  %s6889_s2 = inlined_call_operand.vmem [shape: f32[2,8], index: 2, kind: input, shape index: {}]   ;;  %s6890_s3 = inlined_call_operand.vmem [shape: f32[2,256], index: 3, kind: input, shape index: {}, may-alias: {3,18}]   ;;  %s6891_s4 = inlined_call_operand.vmem [shape: f32[2,256], index: 4, kind: input, shape index: {}, may-alias: {4,19}]   ;;  %s6892_s5 = inlined_call_operand.vmem [shape: f32[128,128], index: 5, kind: input, shape index: {}]   ;;  %s6893_s6 = inlined_call_operand.vmem [shape: f32[1,128], index: 6, kind: input, shape index: {}]   ;;  %s6894_s7 = inlined_call_operand.hbm [shape: bf16[1024,512], index: 7, kind: input, shape index: {}]   ;;  %s6895_s8 = inlined_call_operand.vmem [shape: f32[1,512], index: 8, kind: input, shape index: {}]   ;;  %s6896_s9 = inlined_call_operand.hbm [shape: bf16[512,512], index: 9, kind: input, shape index: {}]   ;;  %s6897_s10 = inlined_call_operand.vmem [shape: f32[1,256], index: 10, kind: input, shape index: {}]   ;;  %s6898_s11 = inlined_call_operand.vmem [shape: f32[1,256], index: 11, kind: input, shape index: {}]   ;;  %s6899_s12 = inlined_call_operand.vmem [shape: f32[512,16], index: 12, kind: input, shape index: {}]   ;;  %s6900_s13 = inlined_call_operand.vmem [shape: f32[16,512], index: 13, kind: input, shape index: {}]   ;;  %s6901_s14 = inlined_call_operand.vmem [shape: f32[8,32], index: 14, kind: input, shape index: {}]   ;;  %s6902_s15 = inlined_call_operand.vmem [shape: f32[1,32], index: 15, kind: input, shape index: {}]   ;;  %s6903_s16 = inlined_call_operand.vmem [shape: f32[1,512], index: 16, kind: input, shape index: {}]   ;;  %s6904_s17 = inlined_call_operand.vmem [shape: f32[2,512], index: 17, kind: output, shape index: {0}]   ;;  %s6905_s18 = inlined_call_operand.vmem [shape: f32[2,256], index: 18, kind: output, shape index: {1}, may-alias: {3,18}]   ;;  %s6906_s19 = inlined_call_operand.vmem [shape: f32[2,256], index: 19, kind: output, shape index: {2}, may-alias: {4,19}]  }
   0x1   :  { %6925 = sst [smem:[#allocation24_spill]] %s6887_s0 }
   0x2   :  { %6926 = sst [smem:[#allocation25_spill]] %s6888_s1 }
   0x3   :  { %6927 = sst [smem:[#allocation26_spill]] %s6889_s2 }
   0x4   :  { %6928 = sst [smem:[#allocation27_spill]] %s6890_s3 }
   0x5   :  { %25 = vsyncpa [#allocation3], 0  ;;  %s45_s20 = sshll.u32 %s6894_s7, 4  ;;  %s46_s20 = int_to_ptr.hbm [resolvable:$true] %s45_s20 }
   0x6   :  { %26 = vsyncpa [#allocation5], 0  ;;  %s5944_s21 = smov [#allocation2]   ;;  %s60_s23 = sshll.u32 %s6896_s9, 4  ;;  %s61_s23 = int_to_ptr.hbm [resolvable:$true] %s60_s23 }
   0x7   :  { %s47_s1 = sshll.u32 %s5944_s21, 4  ;;  %s5945_s24 = smov 256   ;;  %s48_s1 = int_to_ptr.vmem [resolvable:$true] %s47_s1 }
   0x8   :  { %s5946_s25 = smov 16   ;;  %s5947_s3 = smov [#allocation4]  }
   0x9   :  { %53 = dma.hbm_to_vmem [thread:$0]  %s46_s20, 32768, %s48_s1, [#allocation3], %s5945_s24, %s5945_s24, %s5946_s25  }
   0xa   :  { %s62_s26 = sshll.u32 %s5947_s3, 4  ;;  %s63_s26 = int_to_ptr.vmem [resolvable:$true] %s62_s26 }
   0xb   :  { %68 = dma.hbm_to_vmem [thread:$0]  %s61_s23, 16384, %s63_s26, [#allocation5], %s5945_s24, %s5945_s24, %s5946_s25  }
   0xc   :  { %5940 = dma.done.wait [#allocation3], 32768  }
   0xd   :  { %5941 = vsyncadd [#allocation3], 4294934528 }
   0xe   :  { %5942 = dma.done.wait [#allocation5], 16384  }
   0xf   :  { %5943 = vsyncadd [#allocation5], 4294950912  ;;  %v110_v0 = vld [vmem:[%s6892_s5 + $0x78] sm:$0xff]  ;;  %v109_v1 = vld [vmem:[%s6892_s5 + $0x70] sm:$0xff]  ;;  %s6929_s7 = sld [smem:[#allocation25_spill]]  ;;  %vm3119_vm0 = vcmask 1041408  }
  0x10   :  { %115 = vmatpush.msra.mxu0 %v110_v0  ;;  %v108_v2 = vld [vmem:[%s6892_s5 + $0x68] sm:$0xff]  ;;  %v107_v3 = vld [vmem:[%s6892_s5 + $0x60] sm:$0xff]  ;;  %v106_v4 = vld [vmem:[%s6892_s5 + $0x58] sm:$0xff]  ;;  %s6930_s9 = sld [smem:[#allocation27_spill]]  ;;  %vm3444_vm1 = vcmask 130048   ;;  %vm3644_vm5 = vcmask 64512  }
  0x11   :  { %v4049_v5 = vld [vmem:[#allocation2 + $0xe0] sm:$0xf]  ;;  %v5518_v6 = vld [vmem:[#allocation2 + $0xec] sm:$0xf0]  ;;  %v105_v13 = vld [vmem:[%s6892_s5 + $0x50] sm:$0xff]  ;;  %s6933_s21 = sld [smem:[#allocation24_spill]] }
  0x12   :  { %116 = vmatpush.msra.mxu0 %v109_v1  ;;  %v4177_v7 = vld [vmem:[#allocation2 + $0x1e0] sm:$0xf]  ;;  %v5550_v8 = vld [vmem:[#allocation2 + $0x1ec] sm:$0xf0]  ;;  %v4050_v9 = vor.u32 %v5518_v6, %v4049_v5  ;;  %v103_v22 = vld [vmem:[%s6892_s5 + $0x40] sm:$0xff]  ;;  %s5948_s3 = smov 112  }
  0x13   :  { %v4178_v10 = vor.u32 %v5550_v8, %v4177_v7  ;;  %v4305_v11 = vld [vmem:[#allocation2 + $0x2e0] sm:$0xf]  ;;  %v5582_v12 = vld [vmem:[#allocation2 + $0x2ec] sm:$0xf0]  ;;  %v101_v42 = vld [vmem:[%s6892_s5 + $0x30] sm:$0xff]  ;;  %vm3915_vm6 = vcmask 1045508  }
  0x14   :  { %117 = vmatpush.msra.mxu0 %v108_v2  ;;  %v4306_v14 = vor.u32 %v5582_v12, %v4305_v11  ;;  %v4033_v15 = vld [vmem:[#allocation2 + $0xc0] sm:$0xf]  ;;  %v5514_v16 = vld [vmem:[#allocation2 + $0xcc] sm:$0xf0]  ;;  %1721 = vmatpush.bf16.msra.mxu1 %v4050_v9  ;;  %v99_v53 = vld [vmem:[%s6892_s5 + $0x20] sm:$0xff]  ;;  %vm3917_vm7 = vcmask 1043456  }
  0x15   :  { %v4034_v17 = vor.u32 %v5514_v16, %v4033_v15  ;;  %v4161_v18 = vld [vmem:[#allocation2 + $0x1c0] sm:$0xf]  ;;  %v5546_v19 = vld [vmem:[#allocation2 + $0x1cc] sm:$0xf0]  ;;  %1734 = vmatpush.bf16.msra.mxu2 %v4178_v10  ;;  %v97_v0 = vld [vmem:[%s6892_s5 + $0x10] sm:$0xff] }
  0x16   :  { %118 = vmatpush.msra.mxu0 %v107_v3  ;;  %v4289_v20 = vld [vmem:[#allocation2 + $0x2c0] sm:$0xf]  ;;  %1747 = vmatpush.bf16.msra.mxu3 %v4306_v14  ;;  %v4162_v23 = vor.u32 %v5546_v19, %v4161_v18  ;;  %v5578_v24 = vld [vmem:[#allocation2 + $0x2cc] sm:$0xf0]  ;;  %v94_v14 = vld [vmem:[%s6929_s7] sm:$0xff] }
  0x17   :  { %v104_v21 = vld [vmem:[%s6892_s5 + $0x48] sm:$0xff]  ;;  %v4290_v25 = vor.u32 %v5578_v24, %v4289_v20  ;;  %v5510_v27 = vld [vmem:[#allocation2 + $0xac] sm:$0xf0] }
  0x18   :  { %119 = vmatpush.msra.mxu0 %v106_v4  ;;  %v4017_v26 = vld [vmem:[#allocation2 + $0xa0] sm:$0xf]  ;;  %v5542_v29 = vld [vmem:[#allocation2 + $0x1ac] sm:$0xf0]  ;;  %1722 = vmatpush.bf16.msra.mxu1 %v4034_v17 }
  0x19   :  { %v4145_v28 = vld [vmem:[#allocation2 + $0x1a0] sm:$0xf]  ;;  %v5574_v31 = vld [vmem:[#allocation2 + $0x2ac] sm:$0xf0]  ;;  %v4018_v33 = vor.u32 %v5510_v27, %v4017_v26  ;;  %1735 = vmatpush.bf16.msra.mxu2 %v4162_v23 }
  0x1a   :  { %120 = vmatpush.msra.mxu0 %v105_v13  ;;  %v4273_v30 = vld [vmem:[#allocation2 + $0x2a0] sm:$0xf]  ;;  %v102_v32 = vld [vmem:[%s6892_s5 + $0x38] sm:$0xff]  ;;  %1748 = vmatpush.bf16.msra.mxu3 %v4290_v25  ;;  %v4146_v34 = vor.u32 %v5542_v29, %v4145_v28  ;;  %v95_v13 = vld [vmem:[%s6892_s5] sm:$0xff] }
  0x1b   :  { %v4274_v35 = vor.u32 %v5574_v31, %v4273_v30  ;;  %v4001_v36 = vld [vmem:[#allocation2 + $0x80] sm:$0xf]  ;;  %v5506_v37 = vld [vmem:[#allocation2 + $0x8c] sm:$0xf0] }
  0x1c   :  { %121 = vmatpush.msra.mxu0 %v104_v21  ;;  %v4129_v38 = vld [vmem:[#allocation2 + $0x180] sm:$0xf]  ;;  %v5538_v39 = vld [vmem:[#allocation2 + $0x18c] sm:$0xf0]  ;;  %1723 = vmatpush.bf16.msra.mxu1 %v4018_v33  ;;  %v4002_v44 = vor.u32 %v5506_v37, %v4001_v36 }
  0x1d   :  { %v4257_v40 = vld [vmem:[#allocation2 + $0x280] sm:$0xf]  ;;  %v5570_v41 = vld [vmem:[#allocation2 + $0x28c] sm:$0xf0]  ;;  %1736 = vmatpush.bf16.msra.mxu2 %v4146_v34  ;;  %v4130_v45 = vor.u32 %v5538_v39, %v4129_v38 }
  0x1e   :  { %122 = vmatpush.msra.mxu0 %v103_v22  ;;  %v100_v43 = vld [vmem:[%s6892_s5 + $0x28] sm:$0xff]  ;;  %1749 = vmatpush.bf16.msra.mxu3 %v4274_v35  ;;  %v4258_v46 = vor.u32 %v5570_v41, %v4257_v40  ;;  %v5502_v48 = vld [vmem:[#allocation2 + $0x6c] sm:$0xf0] }
  0x1f   :  { %v3985_v47 = vld [vmem:[#allocation2 + $0x60] sm:$0xf]  ;;  %v5534_v50 = vld [vmem:[#allocation2 + $0x16c] sm:$0xf0] }
  0x20   :  { %123 = vmatpush.msra.mxu0 %v102_v32  ;;  %v4113_v49 = vld [vmem:[#allocation2 + $0x160] sm:$0xf]  ;;  %v5566_v52 = vld [vmem:[#allocation2 + $0x26c] sm:$0xf0]  ;;  %1724 = vmatpush.bf16.msra.mxu1 %v4002_v44  ;;  %v3986_v55 = vor.u32 %v5502_v48, %v3985_v47 }
  0x21   :  { %v4241_v51 = vld [vmem:[#allocation2 + $0x260] sm:$0xf]  ;;  %v98_v54 = vld [vmem:[%s6892_s5 + $0x18] sm:$0xff]  ;;  %1737 = vmatpush.bf16.msra.mxu2 %v4130_v45  ;;  %v4114_v56 = vor.u32 %v5534_v50, %v4113_v49 }
  0x22   :  { %124 = vmatpush.msra.mxu0 %v101_v42  ;;  %1750 = vmatpush.bf16.msra.mxu3 %v4258_v46  ;;  %v4242_v57 = vor.u32 %v5566_v52, %v4241_v51  ;;  %v3969_v58 = vld [vmem:[#allocation2 + $0x40] sm:$0xf]  ;;  %v5498_v59 = vld [vmem:[#allocation2 + $0x4c] sm:$0xf0] }
  0x23   :  { %v4097_v60 = vld [vmem:[#allocation2 + $0x140] sm:$0xf]  ;;  %v5530_v61 = vld [vmem:[#allocation2 + $0x14c] sm:$0xf0]  ;;  %v3970_v4 = vor.u32 %v5498_v59, %v3969_v58 }
  0x24   :  { %125 = vmatpush.msra.mxu0 %v100_v43  ;;  %v4225_v62 = vld [vmem:[#allocation2 + $0x240] sm:$0xf]  ;;  %v5562_v63 = vld [vmem:[#allocation2 + $0x24c] sm:$0xf0]  ;;  %1725 = vmatpush.bf16.msra.mxu1 %v3986_v55  ;;  %v4098_v5 = vor.u32 %v5530_v61, %v4097_v60 }
  0x25   :  { %v96_v1 = vld [vmem:[%s6892_s5 + $0x8] sm:$0xff]  ;;  %v5614_v3 = vld [vmem:[#allocation2 + $0x3ec] sm:$0xf0]  ;;  %1738 = vmatpush.bf16.msra.mxu2 %v4114_v56  ;;  %v4226_v6 = vor.u32 %v5562_v63, %v4225_v62 }
  0x26   :  { %126 = vmatpush.msra.mxu0 %v99_v53  ;;  %v4433_v2 = vld [vmem:[#allocation2 + $0x3e0] sm:$0xf]  ;;  %1751 = vmatpush.bf16.msra.mxu3 %v4242_v57  ;;  %v5494_v8 = vld [vmem:[#allocation2 + $0x2c] sm:$0xf0] }
  0x27   :  { %v3953_v7 = vld [vmem:[#allocation2 + $0x20] sm:$0xf]  ;;  %v5526_v10 = vld [vmem:[#allocation2 + $0x12c] sm:$0xf0]  ;;  %v4434_v15 = vor.u32 %v5614_v3, %v4433_v2 }
  0x28   :  { %127 = vmatpush.msra.mxu0 %v98_v54  ;;  %v4081_v9 = vld [vmem:[#allocation2 + $0x120] sm:$0xf]  ;;  %v5558_v12 = vld [vmem:[#allocation2 + $0x22c] sm:$0xf0]  ;;  %1726 = vmatpush.bf16.msra.mxu1 %v3970_v4  ;;  %v3954_v17 = vor.u32 %v5494_v8, %v3953_v7 }
  0x29   :  { %v4209_v11 = vld [vmem:[#allocation2 + $0x220] sm:$0xf]  ;;  %v5610_v18 = vld [vmem:[#allocation2 + $0x3cc] sm:$0xf0]  ;;  %1739 = vmatpush.bf16.msra.mxu2 %v4098_v5  ;;  %v4082_v19 = vor.u32 %v5526_v10, %v4081_v9 }
  0x2a   :  { %128 = vmatpush.msra.mxu0 %v97_v0  ;;  %v4417_v16 = vld [vmem:[#allocation2 + $0x3c0] sm:$0xf]  ;;  %1752 = vmatpush.bf16.msra.mxu3 %v4226_v6  ;;  %v4210_v20 = vor.u32 %v5558_v12, %v4209_v11  ;;  %v5490_v22 = vld [vmem:[#allocation2 + $0xc] sm:$0xf0] }
  0x2b   :  { %v3937_v21 = vld [vmem:[#allocation2] sm:$0xf]  ;;  %v5646_v24 = vld [vmem:[#allocation2 + $0x4ec] sm:$0xf0]  ;;  %v4418_v25 = vor.u32 %v5610_v18, %v4417_v16 }
  0x2c   :  { %129 = vmatpush.msra.mxu0 %v96_v1  ;;  %v4561_v23 = vld [vmem:[#allocation2 + $0x4e0] sm:$0xf]  ;;  %1727 = vmatpush.bf16.msra.mxu1 %v3954_v17  ;;  %v3938_v26 = vor.u32 %v5490_v22, %v3937_v21  ;;  %v5606_v28 = vld [vmem:[#allocation2 + $0x3ac] sm:$0xf0] }
  0x2d   :  { %v4401_v27 = vld [vmem:[#allocation2 + $0x3a0] sm:$0xf]  ;;  %1740 = vmatpush.bf16.msra.mxu2 %v4082_v19  ;;  %v4562_v29 = vor.u32 %v5646_v24, %v4561_v23  ;;  %v5602_v32 = vld [vmem:[#allocation2 + $0x38c] sm:$0xf0] }
  0x2e   :  { %130 = vmatpush.msra.mxu0 %v95_v13  ;;  %1753 = vmatpush.bf16.msra.mxu3 %v4210_v20  ;;  %v4402_v30 = vor.u32 %v5606_v28, %v4401_v27  ;;  %v4385_v31 = vld [vmem:[#allocation2 + $0x380] sm:$0xf]  ;;  %v5598_v35 = vld [vmem:[#allocation2 + $0x36c] sm:$0xf0] }
  0x2f   :  { %131 = vmatmul.f32.vlgmr.msra.gmra.mxu0 %v94_v14  ;;  %v4386_v33 = vor.u32 %v5602_v32, %v4385_v31  ;;  %v4369_v34 = vld [vmem:[#allocation2 + $0x360] sm:$0xf]  ;;  %v5594_v38 = vld [vmem:[#allocation2 + $0x34c] sm:$0xf0] }
  0x30   :  { %1760 = vmatpush.bf16.msrb.mxu0 %v4434_v15  ;;  %1728 = vmatpush.bf16.msra.mxu1 %v3938_v26  ;;  %v4370_v36 = vor.u32 %v5598_v35, %v4369_v34  ;;  %v4353_v37 = vld [vmem:[#allocation2 + $0x340] sm:$0xf]  ;;  %v5590_v41 = vld [vmem:[#allocation2 + $0x32c] sm:$0xf0] }
  0x31   :  { %v4354_v39 = vor.u32 %v5594_v38, %v4353_v37  ;;  %v4337_v40 = vld [vmem:[#allocation2 + $0x320] sm:$0xf]  ;;  %v5522_v44 = vld [vmem:[#allocation2 + $0x10c] sm:$0xf0] }
  0x32   :  { %v4338_v42 = vor.u32 %v5590_v41, %v4337_v40  ;;  %v4065_v43 = vld [vmem:[#allocation2 + $0x100] sm:$0xf]  ;;  %v5554_v47 = vld [vmem:[#allocation2 + $0x20c] sm:$0xf0] }
  0x33   :  { %v4193_v45 = vld [vmem:[#allocation2 + $0x200] sm:$0xf]  ;;  %v4066_v46 = vor.u32 %v5522_v44, %v4065_v43  ;;  %v5586_v49 = vld [vmem:[#allocation2 + $0x30c] sm:$0xf0] }
  0x34   :  { %1761 = vmatpush.bf16.msrb.mxu0 %v4418_v25  ;;  %1773 = vmatpush.bf16.msrb.mxu1 %v4562_v29  ;;  %v4321_v48 = vld [vmem:[#allocation2 + $0x300] sm:$0xf]  ;;  %v4194_v50 = vor.u32 %v5554_v47, %v4193_v45  ;;  %v5678_v53 = vld [vmem:[#allocation2 + $0x5ec] sm:$0xf0] }
  0x35   :  { %v4322_v51 = vor.u32 %v5586_v49, %v4321_v48  ;;  %v4689_v52 = vld [vmem:[#allocation2 + $0x5e0] sm:$0xf]  ;;  %1741 = vmatpush.bf16.msra.mxu2 %v4066_v46  ;;  %v5710_v56 = vld [vmem:[#allocation2 + $0x6ec] sm:$0xf0] }
  0x36   :  { %v4817_v54 = vld [vmem:[#allocation2 + $0x6e0] sm:$0xf]  ;;  %v4690_v55 = vor.u32 %v5678_v53, %v4689_v52  ;;  %v5742_v58 = vld [vmem:[#allocation2 + $0x7ec] sm:$0xf0]  ;;  %1754 = vmatpush.bf16.msra.mxu3 %v4194_v50 }
  0x37   :  { %v4945_v57 = vld [vmem:[#allocation2 + $0x7e0] sm:$0xf]  ;;  %v4818_v59 = vor.u32 %v5710_v56, %v4817_v54  ;;  %v5642_v62 = vld [vmem:[#allocation2 + $0x4cc] sm:$0xf0] }
  0x38   :  { %1762 = vmatpush.bf16.msrb.mxu0 %v4402_v30  ;;  %v4946_v60 = vor.u32 %v5742_v58, %v4945_v57  ;;  %v4545_v61 = vld [vmem:[#allocation2 + $0x4c0] sm:$0xf]  ;;  %v5674_v1 = vld [vmem:[#allocation2 + $0x5cc] sm:$0xf0] }
  0x39   :  { %1786 = vmatpush.bf16.msrb.mxu2 %v4690_v55  ;;  %v4546_v63 = vor.u32 %v5642_v62, %v4545_v61  ;;  %v4673_v0 = vld [vmem:[#allocation2 + $0x5c0] sm:$0xf]  ;;  %v5706_v4 = vld [vmem:[#allocation2 + $0x6cc] sm:$0xf0] }
  0x3a   :  { %v4801_v2 = vld [vmem:[#allocation2 + $0x6c0] sm:$0xf]  ;;  %1799 = vmatpush.bf16.msrb.mxu3 %v4818_v59  ;;  %v4674_v3 = vor.u32 %v5674_v1, %v4673_v0  ;;  %v5738_v6 = vld [vmem:[#allocation2 + $0x7cc] sm:$0xf0] }
  0x3b   :  { %v4929_v5 = vld [vmem:[#allocation2 + $0x7c0] sm:$0xf]  ;;  %1774 = vmatpush.bf16.msrb.mxu1 %v4546_v63  ;;  %v4802_v7 = vor.u32 %v5706_v4, %v4801_v2  ;;  %v5638_v10 = vld [vmem:[#allocation2 + $0x4ac] sm:$0xf0] }
  0x3c   :  { %1763 = vmatpush.bf16.msrb.mxu0 %v4386_v33  ;;  %v4930_v8 = vor.u32 %v5738_v6, %v4929_v5  ;;  %v4529_v9 = vld [vmem:[#allocation2 + $0x4a0] sm:$0xf]  ;;  %v5670_v13 = vld [vmem:[#allocation2 + $0x5ac] sm:$0xf0] }
  0x3d   :  { %v4530_v11 = vor.u32 %v5638_v10, %v4529_v9  ;;  %1787 = vmatpush.bf16.msrb.mxu2 %v4674_v3  ;;  %v4657_v12 = vld [vmem:[#allocation2 + $0x5a0] sm:$0xf]  ;;  %v5702_v16 = vld [vmem:[#allocation2 + $0x6ac] sm:$0xf0] }
  0x3e   :  { %v4785_v14 = vld [vmem:[#allocation2 + $0x6a0] sm:$0xf]  ;;  %1800 = vmatpush.bf16.msrb.mxu3 %v4802_v7  ;;  %v4658_v15 = vor.u32 %v5670_v13, %v4657_v12  ;;  %v5734_v18 = vld [vmem:[#allocation2 + $0x7ac] sm:$0xf0] }
  0x3f   :  { %v4913_v17 = vld [vmem:[#allocation2 + $0x7a0] sm:$0xf]  ;;  %1775 = vmatpush.bf16.msrb.mxu1 %v4530_v11  ;;  %v4786_v19 = vor.u32 %v5702_v16, %v4785_v14  ;;  %v5634_v22 = vld [vmem:[#allocation2 + $0x48c] sm:$0xf0] }
  0x40   :  { %1764 = vmatpush.bf16.msrb.mxu0 %v4370_v36  ;;  %v4914_v20 = vor.u32 %v5734_v18, %v4913_v17  ;;  %v4513_v21 = vld [vmem:[#allocation2 + $0x480] sm:$0xf]  ;;  %v5666_v25 = vld [vmem:[#allocation2 + $0x58c] sm:$0xf0]  ;;  %v6112_v18 = vld [vmem:[%s6930_s9] sm:$0xf] }
  0x41   :  { %v4514_v23 = vor.u32 %v5634_v22, %v4513_v21  ;;  %1788 = vmatpush.bf16.msrb.mxu2 %v4658_v15  ;;  %v4641_v24 = vld [vmem:[#allocation2 + $0x580] sm:$0xf]  ;;  %v5698_v28 = vld [vmem:[#allocation2 + $0x68c] sm:$0xf0]  ;;  %v5877_v15 = vld [vmem:[%s6893_s6] ss:$0 sm:$0xff] }
  0x42   :  { %v4769_v26 = vld [vmem:[#allocation2 + $0x680] sm:$0xf]  ;;  %1801 = vmatpush.bf16.msrb.mxu3 %v4786_v19  ;;  %v4642_v27 = vor.u32 %v5666_v25, %v4641_v24  ;;  %v5730_v30 = vld [vmem:[#allocation2 + $0x78c] sm:$0xf0]  ;;  %6931 = vst [vmem:[#allocation8_spill] sm:$0xff] %v6112_v18 }
  0x43   :  { %v4897_v29 = vld [vmem:[#allocation2 + $0x780] sm:$0xf]  ;;  %1776 = vmatpush.bf16.msrb.mxu1 %v4514_v23  ;;  %v4770_v31 = vor.u32 %v5698_v28, %v4769_v26  ;;  %v5630_v34 = vld [vmem:[#allocation2 + $0x46c] sm:$0xf0]  ;;  %152 = vst [vmem:[#allocation1] ss:$4 sm:$0xff] %v6112_v18 }
  0x44   :  { %1765 = vmatpush.bf16.msrb.mxu0 %v4354_v39  ;;  %v4898_v32 = vor.u32 %v5730_v30, %v4897_v29  ;;  %v4497_v33 = vld [vmem:[#allocation2 + $0x460] sm:$0xf]  ;;  %v5662_v37 = vld [vmem:[#allocation2 + $0x56c] sm:$0xf0]  ;;  %v6120_v26 = vld [vmem:[%s6891_s4] sm:$0xf] }
  0x45   :  { %v4498_v35 = vor.u32 %v5630_v34, %v4497_v33  ;;  %1789 = vmatpush.bf16.msrb.mxu2 %v4642_v27  ;;  %v4625_v36 = vld [vmem:[#allocation2 + $0x560] sm:$0xf]  ;;  %v5694_v40 = vld [vmem:[#allocation2 + $0x66c] sm:$0xf0]  ;;  %6932 = vst [vmem:[#allocation9_spill] sm:$0xff] %v6120_v26  ;;  %v91_v30 = vld [vmem:[%s6933_s21] sm:$0xff] }
  0x46   :  { %v4753_v38 = vld [vmem:[#allocation2 + $0x660] sm:$0xf]  ;;  %1802 = vmatpush.bf16.msrb.mxu3 %v4770_v31  ;;  %v4626_v39 = vor.u32 %v5662_v37, %v4625_v36  ;;  %v5626_v46 = vld [vmem:[#allocation2 + $0x44c] sm:$0xf0]  ;;  %v4051_v36 = vld [vmem:[#allocation2 + $0xf0] sm:$0xf0] }
  0x47   :  { %v4881_v41 = vld [vmem:[#allocation2 + $0x760] sm:$0xf]  ;;  %1777 = vmatpush.bf16.msrb.mxu1 %v4498_v35  ;;  %v4754_v43 = vor.u32 %v5694_v40, %v4753_v38  ;;  %v5658_v49 = vld [vmem:[#allocation2 + $0x54c] sm:$0xf0]  ;;  %v5548_v37 = vld [vmem:[#allocation2 + $0x1e4] sm:$0xf] }
  0x48   :  { %1766 = vmatpush.bf16.msrb.mxu0 %v4338_v42  ;;  %v5726_v42 = vld [vmem:[#allocation2 + $0x76c] sm:$0xf0]  ;;  %v4481_v45 = vld [vmem:[#allocation2 + $0x440] sm:$0xf]  ;;  %v5580_v40 = vld [vmem:[#allocation2 + $0x2e4] sm:$0xf] }
  0x49   :  { %v4882_v44 = vor.u32 %v5726_v42, %v4881_v41  ;;  %v4482_v47 = vor.u32 %v5626_v46, %v4481_v45  ;;  %1790 = vmatpush.bf16.msrb.mxu2 %v4626_v39  ;;  %v4609_v48 = vld [vmem:[#allocation2 + $0x540] sm:$0xf]  ;;  %v5690_v52 = vld [vmem:[#allocation2 + $0x64c] sm:$0xf0]  ;;  %v4179_v39 = vld [vmem:[#allocation2 + $0x1f0] sm:$0xf0] }
  0x4a   :  { %v4737_v50 = vld [vmem:[#allocation2 + $0x640] sm:$0xf]  ;;  %1803 = vmatpush.bf16.msrb.mxu3 %v4754_v43  ;;  %v5722_v54 = vld [vmem:[#allocation2 + $0x74c] sm:$0xf0]  ;;  %v4307_v41 = vld [vmem:[#allocation2 + $0x2f0] sm:$0xf0] }
  0x4b   :  { %v4865_v53 = vld [vmem:[#allocation2 + $0x740] sm:$0xf]  ;;  %1778 = vmatpush.bf16.msrb.mxu1 %v4482_v47  ;;  %v4738_v55 = vor.u32 %v5690_v52, %v4737_v50  ;;  %v5622_v58 = vld [vmem:[#allocation2 + $0x42c] sm:$0xf0]  ;;  %v5612_v43 = vld [vmem:[#allocation2 + $0x3e4] sm:$0xf]  ;;  %v4310_v52 = vor.u32 %v5580_v40, %v4307_v41 }
  0x4c   :  { %1767 = vmatpush.bf16.msrb.mxu0 %v4322_v51  ;;  %v4610_v51 = vor.u32 %v5658_v49, %v4609_v48  ;;  %v4866_v56 = vor.u32 %v5722_v54, %v4865_v53  ;;  %v4465_v57 = vld [vmem:[#allocation2 + $0x420] sm:$0xf]  ;;  %v5654_v61 = vld [vmem:[#allocation2 + $0x52c] sm:$0xf0]  ;;  %v5512_v45 = vld [vmem:[#allocation2 + $0xc4] sm:$0xf] }
  0x4d   :  { %v4466_v59 = vor.u32 %v5622_v58, %v4465_v57  ;;  %v4721_v62 = vld [vmem:[#allocation2 + $0x620] sm:$0xf]  ;;  %v5686_v0 = vld [vmem:[#allocation2 + $0x62c] sm:$0xf0]  ;;  %v4035_v50 = vld [vmem:[#allocation2 + $0xd0] sm:$0xf0] }
  0x4e   :  { %1791 = vmatpush.bf16.msrb.mxu2 %v4610_v51  ;;  %1804 = vmatpush.bf16.msrb.mxu3 %v4738_v55  ;;  %v4849_v1 = vld [vmem:[#allocation2 + $0x720] sm:$0xf]  ;;  %v5718_v2 = vld [vmem:[#allocation2 + $0x72c] sm:$0xf0]  ;;  %v4722_v3 = vor.u32 %v5686_v0, %v4721_v62  ;;  %v4182_v51 = vor.u32 %v5548_v37, %v4179_v39  ;;  %v5544_v57 = vld [vmem:[#allocation2 + $0x1c4] sm:$0xf] }
  0x4f   :  { %1779 = vmatpush.bf16.msrb.mxu1 %v4466_v59  ;;  %v4850_v4 = vor.u32 %v5718_v2, %v4849_v1  ;;  %v4449_v5 = vld [vmem:[#allocation2 + $0x400] sm:$0xf]  ;;  %v5618_v6 = vld [vmem:[#allocation2 + $0x40c] sm:$0xf0]  ;;  %v4163_v58 = vld [vmem:[#allocation2 + $0x1d0] sm:$0xf0] }
  0x50   :  { %1812 = vmatpush.bf16.msra.mxu0 %v4946_v60  ;;  %v4593_v60 = vld [vmem:[#allocation2 + $0x520] sm:$0xf]  ;;  %v4450_v7 = vor.u32 %v5618_v6, %v4449_v5  ;;  %v5650_v9 = vld [vmem:[#allocation2 + $0x50c] sm:$0xf0]  ;;  %v5576_v59 = vld [vmem:[#allocation2 + $0x2c4] sm:$0xf]  ;;  %v4166_v2 = vor.u32 %v5544_v57, %v4163_v58 }
  0x51   :  { %v4594_v63 = vor.u32 %v5654_v61, %v4593_v60  ;;  %v4705_v10 = vld [vmem:[#allocation2 + $0x600] sm:$0xf]  ;;  %v5682_v12 = vld [vmem:[#allocation2 + $0x60c] sm:$0xf0]  ;;  %v4038_v60 = vor.u32 %v5512_v45, %v4035_v50  ;;  %v4291_v61 = vld [vmem:[#allocation2 + $0x2d0] sm:$0xf0] }
  0x52   :  { %1805 = vmatpush.bf16.msrb.mxu3 %v4722_v3  ;;  %v4833_v13 = vld [vmem:[#allocation2 + $0x700] sm:$0xf]  ;;  %v5714_v14 = vld [vmem:[#allocation2 + $0x70c] sm:$0xf0]  ;;  %v4706_v16 = vor.u32 %v5682_v12, %v4705_v10  ;;  %v5608_v62 = vld [vmem:[#allocation2 + $0x3c4] sm:$0xf]  ;;  %v4294_v3 = vor.u32 %v5576_v59, %v4291_v61 }
  0x53   :  { %1792 = vmatpush.bf16.msrb.mxu2 %v4594_v63  ;;  %1780 = vmatpush.bf16.msrb.mxu1 %v4450_v7  ;;  %v4834_v17 = vor.u32 %v5714_v14, %v4833_v13  ;;  %v6115_v25 = vld.sshfl [vmem:[#allocation1] sm:$0xff pattern:$0x73625140]  ;;  %v6122_v28 = vld.sshfl [vmem:[#allocation1 + $0x8] sm:$0xff pattern:$0x73625140] }
  0x54   :  { %1813 = vmatpush.bf16.msra.mxu0 %v4930_v8  ;;  %v4577_v8 = vld [vmem:[#allocation2 + $0x500] sm:$0xf]  ;;  %158 = vst [vmem:[#allocation1] ss:$4 sm:$0xff] %v6120_v26  ;;  %v4419_v63 = vld [vmem:[#allocation2 + $0x3d0] sm:$0xf0] }
  0x55   :  { %v4578_v11 = vor.u32 %v5650_v9, %v4577_v8  ;;  %v5508_v0 = vld [vmem:[#allocation2 + $0xa4] sm:$0xf]  ;;  %v4019_v1 = vld [vmem:[#allocation2 + $0xb0] sm:$0xf0]  ;;  %v6585_v26 = vld [vmem:[%s6899_s12 + $0x1a0] sm:$0xff] }
  0x56   :  { %1806 = vmatpush.bf16.msrb.mxu3 %v4706_v16  ;;  %v5540_v5 = vld [vmem:[#allocation2 + $0x1a4] sm:$0xf]  ;;  %v4147_v6 = vld [vmem:[#allocation2 + $0x1b0] sm:$0xf0]  ;;  %v4022_v8 = vor.u32 %v5508_v0, %v4019_v1  ;;  %6940 = vst [vmem:[#allocation16_spill] sm:$0xff] %v6585_v26 }
  0x57   :  { %1793 = vmatpush.bf16.msrb.mxu2 %v4578_v11  ;;  %v5572_v7 = vld [vmem:[#allocation2 + $0x2a4] sm:$0xf]  ;;  %v4275_v9 = vld [vmem:[#allocation2 + $0x2b0] sm:$0xf0]  ;;  %v4150_v14 = vor.u32 %v5540_v5, %v4147_v6 }
  0x58   :  { %1814 = vmatpush.bf16.msra.mxu0 %v4914_v20  ;;  %v5604_v10 = vld [vmem:[#allocation2 + $0x3a4] sm:$0xf]  ;;  %v4403_v11 = vld [vmem:[#allocation2 + $0x3b0] sm:$0xf0] }
  0x59   :  { %v5504_v12 = vld [vmem:[#allocation2 + $0x84] sm:$0xf]  ;;  %v4003_v13 = vld [vmem:[#allocation2 + $0x90] sm:$0xf0]  ;;  %v4406_v16 = vor.u32 %v5604_v10, %v4403_v11 }
  0x5a   :  { %v4115_v37 = vld [vmem:[#allocation2 + $0x170] sm:$0xf0]  ;;  %v5564_v39 = vld [vmem:[#allocation2 + $0x264] sm:$0xf] }
  0x5b   :  { %v6128_v33 = vld.sshfl [vmem:[#allocation1] sm:$0xff pattern:$0x73625140]  ;;  %v6130_v34 = vld.sshfl [vmem:[#allocation1 + $0x8] sm:$0xff pattern:$0x73625140] }
  0x5c   :  { %1815 = vmatpush.bf16.msra.mxu0 %v4898_v32  ;;  %v5516_v32 = vld [vmem:[#allocation2 + $0xe4] sm:$0xf]  ;;  %3890 = vst [vmem:[#allocation1] ss:$4 sm:$0xff] %v91_v30  ;;  %v3987_v30 = vld [vmem:[#allocation2 + $0x70] sm:$0xf0]  ;;  %v6173_v45 = vpack.c.bf16 %v6128_v33, %v6128_v33  ;;  %v6177_v50 = vpack.c.bf16 %v6130_v34, %v6130_v34 }
  0x5d   :  { %v4054_v42 = vor.u32 %v5516_v32, %v4051_v36  ;;  %v6165_v36 = vpack.c.bf16 %v6115_v25, %v6115_v25  ;;  %v4243_v40 = vld [vmem:[#allocation2 + $0x270] sm:$0xf0]  ;;  %v5496_v25 = vld [vmem:[#allocation2 + $0x44] sm:$0xf] }
  0x5e   :  { %v5528_v57 = vld [vmem:[#allocation2 + $0x144] sm:$0xf]  ;;  %v4099_v58 = vld [vmem:[#allocation2 + $0x150] sm:$0xf0] }
  0x5f   :  { %v5560_v59 = vld [vmem:[#allocation2 + $0x244] sm:$0xf]  ;;  %v4355_v34 = vld [vmem:[#allocation2 + $0x350] sm:$0xf0]  ;;  %v4102_v0 = vor.u32 %v5528_v57, %v4099_v58 }
  0x60   :  { %1816 = vmatpush.bf16.msra.mxu0 %v4882_v44  ;;  %v4435_v44 = vld [vmem:[#allocation2 + $0x3f0] sm:$0xf0]  ;;  %v5592_v61 = vld [vmem:[#allocation2 + $0x344] sm:$0xf] }
  0x61   :  { %v5556_v5 = vld [vmem:[#allocation2 + $0x224] sm:$0xf]  ;;  %v4211_v6 = vld [vmem:[#allocation2 + $0x230] sm:$0xf0] }
  0x62   :  { %v5488_v10 = vld [vmem:[#allocation2 + $0x4] sm:$0xf]  ;;  %v3939_v11 = vld [vmem:[#allocation2 + $0x10] sm:$0xf0] }
  0x63   :  { %v4675_v57 = vld [vmem:[#allocation2 + $0x5d0] sm:$0xf0] }
  0x64   :  { %1817 = vmatpush.bf16.msra.mxu0 %v4866_v56  ;;  %v4438_v56 = vor.u32 %v5612_v43, %v4435_v44  ;;  %v5596_v43 = vld [vmem:[#allocation2 + $0x364] sm:$0xf]  ;;  %v4371_v44 = vld [vmem:[#allocation2 + $0x370] sm:$0xf0] }
  0x65   :  { %v4803_v58 = vld [vmem:[#allocation2 + $0x6d0] sm:$0xf0] }
  0x68   :  { %1818 = vmatpush.bf16.msra.mxu0 %v4850_v4  ;;  %v4422_v4 = vor.u32 %v5608_v62, %v4419_v63  ;;  %v5492_v62 = vld [vmem:[#allocation2 + $0x24] sm:$0xf]  ;;  %v3955_v63 = vld [vmem:[#allocation2 + $0x30] sm:$0xf0] }
  0x6c   :  { %1819 = vmatpush.bf16.msra.mxu0 %v4834_v17  ;;  %v5536_v17 = vld [vmem:[#allocation2 + $0x184] sm:$0xf] }
  0xac   :  { %v132_v19 = vpop.f32.mrf.mxu0 }
  0xad   :  { %v133_v20 = vadd.f32 %v5877_v15, %v132_v19  ;;  %v4278_v15 = vor.u32 %v5572_v7, %v4275_v9  ;;  %v4131_v19 = vld [vmem:[#allocation2 + $0x190] sm:$0xf0]  ;;  %v3958_v7 = vor.u32 %v5492_v62, %v3955_v63 }
  0xae   :  { %v4339_v9 = vld [vmem:[#allocation2 + $0x330] sm:$0xf0] }
  0xaf   :  { %v135_v21 = vmul.f32 %v133_v20, %v133_v20  ;;  %v4531_v62 = vld [vmem:[#allocation2 + $0x4b0] sm:$0xf0] }
  0xb1   :  { %v136_v22 = vmul.f32 %v135_v21, %v133_v20  ;;  %v4006_v21 = vor.u32 %v5504_v12, %v4003_v13  ;;  %v5644_v12 = vld [vmem:[#allocation2 + $0x4e4] sm:$0xf]  ;;  %v4563_v13 = vld [vmem:[#allocation2 + $0x4f0] sm:$0xf0] }
  0xb3   :  { %v137_v23 = vmul.f32 0.044715, %v136_v22  ;;  %v4259_v22 = vld [vmem:[#allocation2 + $0x290] sm:$0xf0] }
  0xb5   :  { %v138_v24 = vadd.f32 %v137_v23, %v133_v20  ;;  %v5600_v23 = vld [vmem:[#allocation2 + $0x384] sm:$0xf] }
  0xb7   :  { %v139_v27 = vmul.f32 0.7978846, %v138_v24  ;;  %v4387_v24 = vld [vmem:[#allocation2 + $0x390] sm:$0xf0] }
  0xb8   :  { %v4390_v32 = vor.u32 %v5600_v23, %v4387_v24  ;;  %v4323_v23 = vld [vmem:[#allocation2 + $0x310] sm:$0xf0]  ;;  %v3942_v24 = vor.u32 %v5488_v10, %v3939_v11 }
  0xb9   :  { %5879 = vtanh.f32 %v139_v27  ;;  %v4134_v27 = vor.u32 %v5536_v17, %v4131_v19  ;;  %v4067_v17 = vld [vmem:[#allocation2 + $0x110] sm:$0xf0]  ;;  %v5552_v19 = vld [vmem:[#allocation2 + $0x204] sm:$0xf] }
  0xba   :  { %v4515_v10 = vld [vmem:[#allocation2 + $0x490] sm:$0xf0] }
  0xbf   :  { %v5880_v29 = vpop.eup %5879 }
  0xc0   :  { %v141_v31 = vadd.f32 1.0, %v5880_v29  ;;  %v5500_v29 = vld [vmem:[#allocation2 + $0x64] sm:$0xf] }
  0xc1   :  { %v3990_v41 = vor.u32 %v5500_v29, %v3987_v30  ;;  %v4691_v29 = vld [vmem:[#allocation2 + $0x5f0] sm:$0xf0]  ;;  %v5708_v30 = vld [vmem:[#allocation2 + $0x6e4] sm:$0xf] }
  0xc2   :  { %v142_v35 = vmul.f32 0.5, %v141_v31 }
  0xc4   :  { %v6132_v38 = vmul.f32 %v142_v35, %v133_v20  ;;  %v5568_v20 = vld [vmem:[#allocation2 + $0x284] sm:$0xf] }
  0xc5   :  { %v4262_v31 = vor.u32 %v5568_v20, %v4259_v22  ;;  %v5532_v35 = vld [vmem:[#allocation2 + $0x164] sm:$0xf] }
  0xc6   :  { %v6135_v46 = vrot.slane %v6132_v38, 2  ;;  %v6138_v47 = vrot.slane %v6132_v38, 4  ;;  %v6141_v48 = vrot.slane %v6132_v38, 6  ;;  %v6145_v49 = vpack.c.bf16 %v6132_v38, %v6132_v38  ;;  %v5584_v22 = vld [vmem:[#allocation2 + $0x304] sm:$0xf] }
  0xc8   :  { %v6149_v53 = vpack.c.bf16 %v6135_v46, %v6135_v46  ;;  %v6153_v54 = vpack.c.bf16 %v6138_v47, %v6138_v47  ;;  %v6157_v55 = vpack.c.bf16 %v6141_v48, %v6141_v48  ;;  %1729 = vmatmul.bf16.vlgmr.msra.gmra.mxu1 %v6145_v49 }
  0xc9   :  { %1825 = vmatpush.bf16.msra.mxu1 %v4054_v42  ;;  %v6169_v42 = vpack.c.bf16 %v6122_v28, %v6122_v28  ;;  %v4374_v28 = vor.u32 %v5596_v43, %v4371_v44  ;;  %v5640_v44 = vld [vmem:[#allocation2 + $0x4c4] sm:$0xf] }
  0xca   :  { %1742 = vmatmul.bf16.vlgmr.msra.gmra.mxu2 %v6149_v53  ;;  %1755 = vmatmul.bf16.vlgmr.msra.gmra.mxu3 %v6153_v54 }
  0xcb   :  { %1768 = vmatmul.bf16.vlgmr.msrb.gmra.mxu0 %v6157_v55  ;;  %1838 = vmatpush.bf16.msra.mxu2 %v4182_v51  ;;  %v3971_v51 = vld [vmem:[#allocation2 + $0x50] sm:$0xf0] }
  0xcc   :  { %1851 = vmatpush.bf16.msra.mxu3 %v4310_v52  ;;  %1864 = vmatpush.bf16.msrb.mxu0 %v4438_v56  ;;  %v4118_v52 = vor.u32 %v5532_v35, %v4115_v37  ;;  %v4246_v56 = vor.u32 %v5564_v39, %v4243_v40  ;;  %v3974_v33 = vor.u32 %v5496_v25, %v3971_v51  ;;  %v5740_v35 = vld [vmem:[#allocation2 + $0x7e4] sm:$0xf]  ;;  %v4947_v37 = vld [vmem:[#allocation2 + $0x7f0] sm:$0xf0] }
  0xcd   :  { %1826 = vmatpush.bf16.msra.mxu1 %v4038_v60  ;;  %v4227_v60 = vld [vmem:[#allocation2 + $0x250] sm:$0xf0] }
  0xce   :  { %v4230_v1 = vor.u32 %v5560_v59, %v4227_v60  ;;  %v4547_v25 = vld [vmem:[#allocation2 + $0x4d0] sm:$0xf0]  ;;  %v5736_v59 = vld [vmem:[#allocation2 + $0x7c4] sm:$0xf] }
  0xcf   :  { %1839 = vmatpush.bf16.msra.mxu2 %v4166_v2  ;;  %v5524_v2 = vld [vmem:[#allocation2 + $0x124] sm:$0xf]  ;;  %v4931_v60 = vld [vmem:[#allocation2 + $0x7d0] sm:$0xf0] }
  0xd0   :  { %1852 = vmatpush.bf16.msra.mxu3 %v4294_v3  ;;  %1865 = vmatpush.bf16.msrb.mxu0 %v4422_v4  ;;  %v4358_v3 = vor.u32 %v5592_v61, %v4355_v34  ;;  %v4083_v4 = vld [vmem:[#allocation2 + $0x130] sm:$0xf0]  ;;  %v5636_v34 = vld [vmem:[#allocation2 + $0x4a4] sm:$0xf] }
  0xd1   :  { %1827 = vmatpush.bf16.msra.mxu1 %v4022_v8  ;;  %v5588_v8 = vld [vmem:[#allocation2 + $0x324] sm:$0xf] }
  0xd2   :  { %v4342_v20 = vor.u32 %v5588_v8, %v4339_v9  ;;  %v5632_v9 = vld [vmem:[#allocation2 + $0x484] sm:$0xf] }
  0xd3   :  { %1840 = vmatpush.bf16.msra.mxu2 %v4150_v14  ;;  %v4086_v14 = vor.u32 %v5524_v2, %v4083_v4  ;;  %v4659_v2 = vld [vmem:[#allocation2 + $0x5b0] sm:$0xf0] }
  0xd4   :  { %1853 = vmatpush.bf16.msra.mxu3 %v4278_v15  ;;  %1866 = vmatpush.bf16.msrb.mxu0 %v4406_v16  ;;  %v4214_v15 = vor.u32 %v5556_v5, %v4211_v6  ;;  %v5520_v16 = vld [vmem:[#allocation2 + $0x104] sm:$0xf]  ;;  %v4787_v4 = vld [vmem:[#allocation2 + $0x6b0] sm:$0xf0] }
  0xd5   :  { %1828 = vmatpush.bf16.msra.mxu1 %v4006_v21  ;;  %v4195_v21 = vld [vmem:[#allocation2 + $0x210] sm:$0xf0]  ;;  %v4070_v39 = vor.u32 %v5520_v16, %v4067_v17  ;;  %v5732_v5 = vld [vmem:[#allocation2 + $0x7a4] sm:$0xf] }
  0xd6   :  { %v4198_v40 = vor.u32 %v5552_v19, %v4195_v21  ;;  %v4915_v6 = vld [vmem:[#allocation2 + $0x7b0] sm:$0xf0]  ;;  %v5728_v17 = vld [vmem:[#allocation2 + $0x784] sm:$0xf] }
  0xd7   :  { %1841 = vmatpush.bf16.msra.mxu2 %v4134_v27  ;;  %v5676_v27 = vld [vmem:[#allocation2 + $0x5e4] sm:$0xf]  ;;  %v4771_v16 = vld [vmem:[#allocation2 + $0x690] sm:$0xf0] }
  0xd8   :  { %1854 = vmatpush.bf16.msra.mxu3 %v4262_v31  ;;  %1867 = vmatpush.bf16.msrb.mxu0 %v4390_v32  ;;  %v4566_v31 = vor.u32 %v5644_v12, %v4563_v13  ;;  %v4819_v32 = vld [vmem:[#allocation2 + $0x6f0] sm:$0xf0]  ;;  %v4694_v43 = vor.u32 %v5676_v27, %v4691_v29  ;;  %v4918_v12 = vor.u32 %v5732_v5, %v4915_v6  ;;  %v5664_v13 = vld [vmem:[#allocation2 + $0x584] sm:$0xf] }
  0xd9   :  { %1781 = vmatmul.bf16.vlgmr.msrb.gmra.mxu1 %v6165_v36  ;;  %v4822_v51 = vor.u32 %v5708_v30, %v4819_v32  ;;  %v4899_v19 = vld [vmem:[#allocation2 + $0x790] sm:$0xf0]  ;;  %v5660_v29 = vld [vmem:[#allocation2 + $0x564] sm:$0xf] }
  0xda   :  { %1829 = vmatpush.bf16.msra.mxu1 %v3990_v41  ;;  %1794 = vmatmul.bf16.vlgmr.msrb.gmra.mxu2 %v6169_v42  ;;  %v4326_v41 = vor.u32 %v5584_v22, %v4323_v23  ;;  %v5628_v22 = vld [vmem:[#allocation2 + $0x464] sm:$0xf]  ;;  %v4499_v23 = vld [vmem:[#allocation2 + $0x470] sm:$0xf0]  ;;  %v4902_v27 = vor.u32 %v5728_v17, %v4899_v19 }
  0xdb   :  { %1807 = vmatmul.bf16.vlgmr.msrb.gmra.mxu3 %v6173_v45  ;;  %1820 = vmatmul.bf16.vlgmr.msra.gmra.mxu0 %v6177_v50  ;;  %v4627_v30 = vld [vmem:[#allocation2 + $0x570] sm:$0xf0]  ;;  %v5616_v6 = vld [vmem:[#allocation2 + $0x404] sm:$0xf] }
  0xdc   :  { %1842 = vmatpush.bf16.msra.mxu2 %v4118_v52  ;;  %1855 = vmatpush.bf16.msra.mxu3 %v4246_v56  ;;  %v4950_v52 = vor.u32 %v5740_v35, %v4947_v37  ;;  %v5672_v56 = vld [vmem:[#allocation2 + $0x5c4] sm:$0xf]  ;;  %v4755_v32 = vld [vmem:[#allocation2 + $0x670] sm:$0xf0] }
  0xdd   :  { %1868 = vmatpush.bf16.msrb.mxu0 %v4374_v28  ;;  %v5704_v28 = vld [vmem:[#allocation2 + $0x6c4] sm:$0xf]  ;;  %v4678_v61 = vor.u32 %v5672_v56, %v4675_v57  ;;  %v4883_v37 = vld [vmem:[#allocation2 + $0x770] sm:$0xf0] }
  0xde   :  { %1830 = vmatpush.bf16.msra.mxu1 %v3974_v33  ;;  %v4550_v33 = vor.u32 %v5640_v44, %v4547_v25  ;;  %v4806_v63 = vor.u32 %v5704_v28, %v4803_v58  ;;  %v5724_v35 = vld [vmem:[#allocation2 + $0x764] sm:$0xf]  ;;  %v4739_v57 = vld [vmem:[#allocation2 + $0x650] sm:$0xf0] }
  0xdf   :  { %v4886_v25 = vor.u32 %v5724_v35, %v4883_v37  ;;  %v5688_v56 = vld [vmem:[#allocation2 + $0x644] sm:$0xf]  ;;  %v4867_v58 = vld [vmem:[#allocation2 + $0x750] sm:$0xf0]  ;;  %v4041_v37 = vld [vmem:[#allocation2 + $0xc8] sm:$0xf] }
  0xe0   :  { %1843 = vmatpush.bf16.msra.mxu2 %v4102_v0  ;;  %1856 = vmatpush.bf16.msra.mxu3 %v4230_v1  ;;  %v4934_v0 = vor.u32 %v5736_v59, %v4931_v60  ;;  %v5668_v1 = vld [vmem:[#allocation2 + $0x5a4] sm:$0xf]  ;;  %v4835_v19 = vld [vmem:[#allocation2 + $0x710] sm:$0xf0] }
  0xe1   :  { %1869 = vmatpush.bf16.msrb.mxu0 %v4358_v3  ;;  %v5700_v3 = vld [vmem:[#allocation2 + $0x6a4] sm:$0xf]  ;;  %v4662_v8 = vor.u32 %v5668_v1, %v4659_v2  ;;  %v4723_v2 = vld [vmem:[#allocation2 + $0x630] sm:$0xf0] }
  0xe2   :  { %1831 = vmatpush.bf16.msra.mxu1 %v3958_v7  ;;  %v4534_v7 = vor.u32 %v5636_v34, %v4531_v62  ;;  %v4790_v11 = vor.u32 %v5700_v3, %v4787_v4  ;;  %v5720_v28 = vld [vmem:[#allocation2 + $0x744] sm:$0xf]  ;;  %v4742_v34 = vor.u32 %v5688_v56, %v4739_v57  ;;  %v4851_v4 = vld [vmem:[#allocation2 + $0x730] sm:$0xf0]  ;;  %v5579_v56 = vld [vmem:[#allocation2 + $0x2d4] sm:$0xf0] }
  0xe3   :  { %v4870_v62 = vor.u32 %v5720_v28, %v4867_v58  ;;  %v5684_v1 = vld [vmem:[#allocation2 + $0x624] sm:$0xf]  ;;  %v4425_v57 = vld [vmem:[#allocation2 + $0x3c8] sm:$0xf]  ;;  %v5611_v28 = vld [vmem:[#allocation2 + $0x3d4] sm:$0xf0] }
  0xe4   :  { %1844 = vmatpush.bf16.msra.mxu2 %v4086_v14  ;;  %1857 = vmatpush.bf16.msra.mxu3 %v4214_v15  ;;  %v4643_v14 = vld [vmem:[#allocation2 + $0x590] sm:$0xf0]  ;;  %v5696_v15 = vld [vmem:[#allocation2 + $0x684] sm:$0xf]  ;;  %v4025_v58 = vld [vmem:[#allocation2 + $0xa8] sm:$0xf] }
  0xe5   :  { %1870 = vmatpush.bf16.msrb.mxu0 %v4342_v20  ;;  %v4518_v20 = vor.u32 %v5632_v9, %v4515_v10  ;;  %v4646_v21 = vor.u32 %v5664_v13, %v4643_v14  ;;  %v5716_v3 = vld [vmem:[#allocation2 + $0x724] sm:$0xf]  ;;  %v4057_v9 = vld [vmem:[#allocation2 + $0xe8] sm:$0xf]  ;;  %v5519_v10 = vld [vmem:[#allocation2 + $0xf4] sm:$0xf0] }
  0xe6   :  { %1832 = vmatpush.bf16.msra.mxu1 %v3942_v24  ;;  %v4774_v24 = vor.u32 %v5696_v15, %v4771_v16  ;;  %v5648_v13 = vld [vmem:[#allocation2 + $0x504] sm:$0xf]  ;;  %v4579_v14 = vld [vmem:[#allocation2 + $0x510] sm:$0xf0] }
  0xe7   :  { %v5680_v15 = vld [vmem:[#allocation2 + $0x604] sm:$0xf]  ;;  %v4707_v16 = vld [vmem:[#allocation2 + $0x610] sm:$0xf0] }
  0xe8   :  { %1845 = vmatpush.bf16.msra.mxu2 %v4070_v39  ;;  %1858 = vmatpush.bf16.msra.mxu3 %v4198_v40  ;;  %v4502_v39 = vor.u32 %v5628_v22, %v4499_v23  ;;  %v4630_v40 = vor.u32 %v5660_v29, %v4627_v30  ;;  %v5712_v17 = vld [vmem:[#allocation2 + $0x704] sm:$0xf]  ;;  %v5551_v22 = vld [vmem:[#allocation2 + $0x1f4] sm:$0xf0]  ;;  %v4313_v23 = vld [vmem:[#allocation2 + $0x2e8] sm:$0xf] }
  0xe9   :  { %1871 = vmatpush.bf16.msrb.mxu0 %v4326_v41  ;;  %1833 = vmatmul.bf16.vlgmr.msra.gmra.mxu1 %v6145_v49  ;;  %v5624_v41 = vld [vmem:[#allocation2 + $0x444] sm:$0xf]  ;;  %v5583_v29 = vld [vmem:[#allocation2 + $0x2f4] sm:$0xf0]  ;;  %v4441_v30 = vld [vmem:[#allocation2 + $0x3e8] sm:$0xf]  ;;  %v4838_v35 = vor.u32 %v5712_v17, %v4835_v19 }
  0xea   :  { %1877 = vmatpush.bf16.msrb.mxu1 %v4566_v31  ;;  %v5692_v31 = vld [vmem:[#allocation2 + $0x664] sm:$0xf]  ;;  %v5503_v17 = vld [vmem:[#allocation2 + $0x74] sm:$0xf0] }
  0xeb   :  { %1846 = vmatmul.bf16.vlgmr.msra.gmra.mxu2 %v6149_v53  ;;  %1859 = vmatmul.bf16.vlgmr.msra.gmra.mxu3 %v6153_v54  ;;  %v4758_v44 = vor.u32 %v5692_v31, %v4755_v32  ;;  %v5615_v31 = vld [vmem:[#allocation2 + $0x3f4] sm:$0xf0]  ;;  %v4710_v32 = vor.u32 %v5680_v15, %v4707_v16  ;;  %v3993_v16 = vld [vmem:[#allocation2 + $0x68] sm:$0xf] }
  0xec   :  { %1890 = vmatpush.bf16.msrb.mxu2 %v4694_v43  ;;  %1903 = vmatpush.bf16.msrb.mxu3 %v4822_v51  ;;  %v4483_v43 = vld [vmem:[#allocation2 + $0x450] sm:$0xf0]  ;;  %v5656_v51 = vld [vmem:[#allocation2 + $0x544] sm:$0xf]  ;;  %v5603_v15 = vld [vmem:[#allocation2 + $0x394] sm:$0xf0] }
  0xed   :  { %1916 = vmatpush.bf16.msra.mxu0 %v4950_v52  ;;  %v4611_v52 = vld [vmem:[#allocation2 + $0x550] sm:$0xf0]  ;;  %v4486_v59 = vor.u32 %v5624_v41, %v4483_v43  ;;  %v4314_v41 = vor.u32 %v5583_v29, %v4313_v23  ;;  %v4442_v43 = vor.u32 %v5615_v31, %v4441_v30  ;;  %v5535_v23 = vld [vmem:[#allocation2 + $0x174] sm:$0xf0]  ;;  %v4377_v30 = vld [vmem:[#allocation2 + $0x368] sm:$0xf] }
  0xee   :  { %1878 = vmatpush.bf16.msrb.mxu1 %v4550_v33  ;;  %1872 = vmatmul.bf16.vlgmr.msrb.gmra.mxu0 %v6157_v55  ;;  %v4614_v60 = vor.u32 %v5656_v51, %v4611_v52  ;;  %v5620_v33 = vld [vmem:[#allocation2 + $0x424] sm:$0xf]  ;;  %v4297_v51 = vld [vmem:[#allocation2 + $0x2c8] sm:$0xf]  ;;  %v5567_v29 = vld [vmem:[#allocation2 + $0x274] sm:$0xf0] }
  0xef   :  { %v5599_v31 = vld [vmem:[#allocation2 + $0x374] sm:$0xf0] }
  0xf0   :  { %1891 = vmatpush.bf16.msrb.mxu2 %v4678_v61  ;;  %1904 = vmatpush.bf16.msrb.mxu3 %v4806_v63  ;;  %v4467_v61 = vld [vmem:[#allocation2 + $0x430] sm:$0xf0]  ;;  %v5652_v63 = vld [vmem:[#allocation2 + $0x524] sm:$0xf] }
  0xf1   :  { %1917 = vmatpush.bf16.msra.mxu0 %v4934_v0  ;;  %v4595_v0 = vld [vmem:[#allocation2 + $0x530] sm:$0xf0]  ;;  %v4470_v5 = vor.u32 %v5620_v33, %v4467_v61  ;;  %v4298_v33 = vor.u32 %v5579_v56, %v4297_v51  ;;  %v4426_v61 = vor.u32 %v5611_v28, %v4425_v57  ;;  %v5563_v51 = vld [vmem:[#allocation2 + $0x254] sm:$0xf0]  ;;  %v3961_v57 = vld [vmem:[#allocation2 + $0x28] sm:$0xf] }
  0xf2   :  { %1879 = vmatpush.bf16.msrb.mxu1 %v4534_v7  ;;  %v4598_v7 = vor.u32 %v5652_v63, %v4595_v0  ;;  %v4281_v63 = vld [vmem:[#allocation2 + $0x2a8] sm:$0xf]  ;;  %v5595_v56 = vld [vmem:[#allocation2 + $0x354] sm:$0xf0] }
  0xf3   :  { %v5495_v28 = vld [vmem:[#allocation2 + $0x34] sm:$0xf0] }
  0xf4   :  { %1892 = vmatpush.bf16.msrb.mxu2 %v4662_v8  ;;  %1905 = vmatpush.bf16.msrb.mxu3 %v4790_v11  ;;  %v4451_v8 = vld [vmem:[#allocation2 + $0x410] sm:$0xf0]  ;;  %v4726_v11 = vor.u32 %v5684_v1, %v4723_v2  ;;  %v5575_v1 = vld [vmem:[#allocation2 + $0x2b4] sm:$0xf0]  ;;  %v4409_v2 = vld [vmem:[#allocation2 + $0x3a8] sm:$0xf] }
  0xf5   :  { %1918 = vmatpush.bf16.msra.mxu0 %v4918_v12  ;;  %v4854_v12 = vor.u32 %v5716_v3, %v4851_v4  ;;  %v5607_v3 = vld [vmem:[#allocation2 + $0x3b4] sm:$0xf0]  ;;  %v4009_v4 = vld [vmem:[#allocation2 + $0x88] sm:$0xf] }
  0xf6   :  { %1880 = vmatpush.bf16.msrb.mxu1 %v4518_v20  ;;  %v4454_v20 = vor.u32 %v5616_v6, %v4451_v8  ;;  %v4410_v8 = vor.u32 %v5607_v3, %v4409_v2  ;;  %v3945_v2 = vld [vmem:[#allocation2 + $0x8] sm:$0xf]  ;;  %v5491_v3 = vld [vmem:[#allocation2 + $0x14] sm:$0xf0] }
  0xf8   :  { %1893 = vmatpush.bf16.msrb.mxu2 %v4646_v21  ;;  %1906 = vmatpush.bf16.msrb.mxu3 %v4774_v24  ;;  %v4185_v21 = vld [vmem:[#allocation2 + $0x1e8] sm:$0xf]  ;;  %v4058_v24 = vor.u32 %v5519_v10, %v4057_v9  ;;  %v5539_v10 = vld [vmem:[#allocation2 + $0x194] sm:$0xf0] }
  0xf9   :  { %1919 = vmatpush.bf16.msra.mxu0 %v4902_v27  ;;  %v4582_v27 = vor.u32 %v5648_v13, %v4579_v14  ;;  %v4137_v9 = vld [vmem:[#allocation2 + $0x188] sm:$0xf]  ;;  %v5571_v13 = vld [vmem:[#allocation2 + $0x294] sm:$0xf0] }
  0xfa   :  { %1881 = vmatpush.bf16.msrb.mxu1 %v4502_v39  ;;  %v5515_v39 = vld [vmem:[#allocation2 + $0xd4] sm:$0xf0]  ;;  %v4393_v14 = vld [vmem:[#allocation2 + $0x388] sm:$0xf]  ;;  %v4138_v19 = vor.u32 %v5539_v10, %v4137_v9 }
  0xfb   :  { %v4042_v52 = vor.u32 %v5515_v39, %v4041_v37  ;;  %v4073_v9 = vld [vmem:[#allocation2 + $0x108] sm:$0xf]  ;;  %v5523_v10 = vld [vmem:[#allocation2 + $0x114] sm:$0xf0] }
  0xfc   :  { %1894 = vmatpush.bf16.msrb.mxu2 %v4630_v40  ;;  %1907 = vmatpush.bf16.msrb.mxu3 %v4758_v44  ;;  %v4186_v40 = vor.u32 %v5551_v22, %v4185_v21  ;;  %v4169_v44 = vld [vmem:[#allocation2 + $0x1c8] sm:$0xf]  ;;  %v4394_v21 = vor.u32 %v5603_v15, %v4393_v14  ;;  %v5587_v15 = vld [vmem:[#allocation2 + $0x314] sm:$0xf0] }
  0xfd   :  { %1920 = vmatpush.bf16.msra.mxu0 %v4886_v25  ;;  %v5547_v25 = vld [vmem:[#allocation2 + $0x1d4] sm:$0xf0]  ;;  %v4121_v22 = vld [vmem:[#allocation2 + $0x168] sm:$0xf] }
  0xfe   :  { %1882 = vmatpush.bf16.msrb.mxu1 %v4486_v59  ;;  %v5511_v59 = vld [vmem:[#allocation2 + $0xb4] sm:$0xf0]  ;;  %v4122_v37 = vor.u32 %v5535_v23, %v4121_v22  ;;  %v4329_v14 = vld [vmem:[#allocation2 + $0x308] sm:$0xf] }
  0xff   :  { %v4026_v0 = vor.u32 %v5511_v59, %v4025_v58  ;;  %v5711_v22 = vld [vmem:[#allocation2 + $0x6f4] sm:$0xf0]  ;;  %v4953_v23 = vld [vmem:[#allocation2 + $0x7e8] sm:$0xf] }
 0x100   :  { %1895 = vmatpush.bf16.msrb.mxu2 %v4614_v60  ;;  %1908 = vmatpush.bf16.msrb.mxu3 %v4742_v34  ;;  %v4170_v60 = vor.u32 %v5547_v25, %v4169_v44  ;;  %v4153_v34 = vld [vmem:[#allocation2 + $0x1a8] sm:$0xf] }
 0x101   :  { %1921 = vmatpush.bf16.msra.mxu0 %v4870_v62  ;;  %v5543_v62 = vld [vmem:[#allocation2 + $0x1b4] sm:$0xf0]  ;;  %v4233_v44 = vld [vmem:[#allocation2 + $0x248] sm:$0xf] }
 0x102   :  { %1883 = vmatpush.bf16.msrb.mxu1 %v4470_v5  ;;  %v5507_v5 = vld [vmem:[#allocation2 + $0x94] sm:$0xf0]  ;;  %v4154_v6 = vor.u32 %v5543_v62, %v4153_v34  ;;  %v4234_v59 = vor.u32 %v5563_v51, %v4233_v44  ;;  %v4217_v34 = vld [vmem:[#allocation2 + $0x228] sm:$0xf]  ;;  %v3962_v62 = vor.u32 %v5495_v28, %v3961_v57 }
 0x103   :  { %v4937_v44 = vld [vmem:[#allocation2 + $0x7c8] sm:$0xf]  ;;  %v5639_v57 = vld [vmem:[#allocation2 + $0x4b4] sm:$0xf0] }
 0x104   :  { %1896 = vmatpush.bf16.msrb.mxu2 %v4598_v7  ;;  %1909 = vmatpush.bf16.msrb.mxu3 %v4726_v11  ;;  %v4282_v7 = vor.u32 %v5575_v1, %v4281_v63  ;;  %v4265_v11 = vld [vmem:[#allocation2 + $0x288] sm:$0xf]  ;;  %v5559_v63 = vld [vmem:[#allocation2 + $0x234] sm:$0xf0] }
 0x105   :  { %1922 = vmatpush.bf16.msra.mxu0 %v4854_v12  ;;  %v4010_v12 = vor.u32 %v5507_v5, %v4009_v4  ;;  %v5591_v1 = vld [vmem:[#allocation2 + $0x334] sm:$0xf0]  ;;  %v4569_v5 = vld [vmem:[#allocation2 + $0x4e8] sm:$0xf] }
 0x106   :  { %1884 = vmatpush.bf16.msrb.mxu1 %v4454_v20  ;;  %v4266_v20 = vor.u32 %v5571_v13, %v4265_v11  ;;  %v4201_v11 = vld [vmem:[#allocation2 + $0x208] sm:$0xf]  ;;  %v5555_v13 = vld [vmem:[#allocation2 + $0x214] sm:$0xf0] }
 0x108   :  { %1897 = vmatpush.bf16.msrb.mxu2 %v4582_v27  ;;  %1910 = vmatpush.bf16.msrb.mxu3 %v4710_v32  ;;  %v3994_v27 = vor.u32 %v5503_v17, %v3993_v16  ;;  %v3977_v32 = vld [vmem:[#allocation2 + $0x48] sm:$0xf] }
 0x109   :  { %1923 = vmatpush.bf16.msra.mxu0 %v4838_v35  ;;  %1885 = vmatmul.bf16.vlgmr.msrb.gmra.mxu1 %v6165_v36  ;;  %v5499_v35 = vld [vmem:[#allocation2 + $0x54] sm:$0xf0]  ;;  %v4697_v17 = vld [vmem:[#allocation2 + $0x5e8] sm:$0xf] }
 0x10a   :  { %1929 = vmatpush.bf16.msra.mxu1 %v4058_v24  ;;  %v4249_v24 = vld [vmem:[#allocation2 + $0x268] sm:$0xf]  ;;  %v3978_v25 = vor.u32 %v5499_v35, %v3977_v32  ;;  %v5643_v32 = vld [vmem:[#allocation2 + $0x4d4] sm:$0xf0] }
 0x10b   :  { %1898 = vmatmul.bf16.vlgmr.msrb.gmra.mxu2 %v6169_v42  ;;  %1911 = vmatmul.bf16.vlgmr.msrb.gmra.mxu3 %v6173_v45  ;;  %v4250_v39 = vor.u32 %v5567_v29, %v4249_v24  ;;  %v5743_v24 = vld [vmem:[#allocation2 + $0x7f4] sm:$0xf0]  ;;  %v4330_v29 = vor.u32 %v5587_v15, %v4329_v14 }
 0x10c   :  { %1942 = vmatpush.bf16.msra.mxu2 %v4186_v40  ;;  %1955 = vmatpush.bf16.msra.mxu3 %v4314_v41  ;;  %v4378_v40 = vor.u32 %v5599_v31, %v4377_v30  ;;  %v4105_v41 = vld [vmem:[#allocation2 + $0x148] sm:$0xf]  ;;  %v5631_v14 = vld [vmem:[#allocation2 + $0x474] sm:$0xf0] }
 0x10d   :  { %1968 = vmatpush.bf16.msrb.mxu0 %v4442_v43  ;;  %v5531_v43 = vld [vmem:[#allocation2 + $0x154] sm:$0xf0]  ;;  %v4553_v31 = vld [vmem:[#allocation2 + $0x4c8] sm:$0xf] }
 0x10e   :  { %1930 = vmatpush.bf16.msra.mxu1 %v4042_v52  ;;  %1924 = vmatmul.bf16.vlgmr.msra.gmra.mxu0 %v6177_v50  ;;  %v4361_v52 = vld [vmem:[#allocation2 + $0x348] sm:$0xf]  ;;  %v4106_v58 = vor.u32 %v5531_v43, %v4105_v41  ;;  %v5707_v43 = vld [vmem:[#allocation2 + $0x6d4] sm:$0xf0]  ;;  %v4554_v51 = vor.u32 %v5643_v32, %v4553_v31 }
 0x10f   :  { %v4809_v41 = vld [vmem:[#allocation2 + $0x6c8] sm:$0xf] }
 0x110   :  { %1943 = vmatpush.bf16.msra.mxu2 %v4170_v60  ;;  %1956 = vmatpush.bf16.msra.mxu3 %v4298_v33  ;;  %v4362_v60 = vor.u32 %v5595_v56, %v4361_v52  ;;  %v4089_v33 = vld [vmem:[#allocation2 + $0x128] sm:$0xf]  ;;  %v4810_v28 = vor.u32 %v5707_v43, %v4809_v41  ;;  %v5723_v43 = vld [vmem:[#allocation2 + $0x754] sm:$0xf0] }
 0x111   :  { %1969 = vmatpush.bf16.msrb.mxu0 %v4426_v61  ;;  %v5527_v61 = vld [vmem:[#allocation2 + $0x134] sm:$0xf0]  ;;  %v4537_v56 = vld [vmem:[#allocation2 + $0x4a8] sm:$0xf] }
 0x112   :  { %1931 = vmatpush.bf16.msra.mxu1 %v4026_v0  ;;  %v4345_v0 = vld [vmem:[#allocation2 + $0x328] sm:$0xf]  ;;  %v4090_v4 = vor.u32 %v5527_v61, %v4089_v33  ;;  %v5703_v61 = vld [vmem:[#allocation2 + $0x6b4] sm:$0xf0] }
 0x113   :  { %v4793_v33 = vld [vmem:[#allocation2 + $0x6a8] sm:$0xf] }
 0x114   :  { %1944 = vmatpush.bf16.msra.mxu2 %v4154_v6  ;;  %1957 = vmatpush.bf16.msra.mxu3 %v4282_v7  ;;  %v5647_v6 = vld [vmem:[#allocation2 + $0x4f4] sm:$0xf0]  ;;  %v4218_v7 = vor.u32 %v5559_v63, %v4217_v34  ;;  %v4921_v34 = vld [vmem:[#allocation2 + $0x7a8] sm:$0xf]  ;;  %v4538_v63 = vor.u32 %v5639_v57, %v4537_v56 }
 0x115   :  { %1970 = vmatpush.bf16.msrb.mxu0 %v4410_v8  ;;  %v4346_v8 = vor.u32 %v5591_v1, %v4345_v0  ;;  %v4570_v16 = vor.u32 %v5647_v6, %v4569_v5  ;;  %v4521_v1 = vld [vmem:[#allocation2 + $0x488] sm:$0xf]  ;;  %v5667_v6 = vld [vmem:[#allocation2 + $0x594] sm:$0xf0] }
 0x116   :  { %1932 = vmatpush.bf16.msra.mxu1 %v4010_v12  ;;  %v3946_v12 = vor.u32 %v5491_v3, %v3945_v2  ;;  %v5635_v2 = vld [vmem:[#allocation2 + $0x494] sm:$0xf0]  ;;  %v4794_v3 = vor.u32 %v5703_v61, %v4793_v33  ;;  %v4649_v5 = vld [vmem:[#allocation2 + $0x588] sm:$0xf] }
 0x117   :  { %v4873_v41 = vld [vmem:[#allocation2 + $0x748] sm:$0xf]  ;;  %v5719_v61 = vld [vmem:[#allocation2 + $0x734] sm:$0xf0] }
 0x118   :  { %1945 = vmatpush.bf16.msra.mxu2 %v4138_v19  ;;  %1958 = vmatpush.bf16.msra.mxu3 %v4266_v20  ;;  %v5679_v19 = vld [vmem:[#allocation2 + $0x5f4] sm:$0xf0]  ;;  %v4825_v20 = vld [vmem:[#allocation2 + $0x6e8] sm:$0xf]  ;;  %v4874_v57 = vor.u32 %v5723_v43, %v4873_v41  ;;  %v4427_v41 = vld [vmem:[#allocation2 + $0x3d8] sm:$0xf0] }
 0x119   :  { %1971 = vmatpush.bf16.msrb.mxu0 %v4394_v21  ;;  %v4074_v21 = vor.u32 %v5523_v10, %v4073_v9  ;;  %v4698_v30 = vor.u32 %v5679_v19, %v4697_v17  ;;  %v4826_v35 = vor.u32 %v5711_v22, %v4825_v20  ;;  %v4905_v9 = vld [vmem:[#allocation2 + $0x788] sm:$0xf]  ;;  %v5731_v10 = vld [vmem:[#allocation2 + $0x794] sm:$0xf0]  ;;  %v5509_v43 = vld [vmem:[#allocation2 + $0xac] sm:$0xf] }
 0x11a   :  { %1933 = vmatpush.bf16.msra.mxu1 %v3994_v27  ;;  %v4202_v27 = vor.u32 %v5555_v13, %v4201_v11  ;;  %v4522_v11 = vor.u32 %v5635_v2, %v4521_v1  ;;  %v4505_v13 = vld [vmem:[#allocation2 + $0x468] sm:$0xf]  ;;  %v5663_v19 = vld [vmem:[#allocation2 + $0x574] sm:$0xf0]  ;;  %v5517_v1 = vld [vmem:[#allocation2 + $0xec] sm:$0xf] }
 0x11b   :  { %v4633_v17 = vld [vmem:[#allocation2 + $0x568] sm:$0xf]  ;;  %v4059_v2 = vld [vmem:[#allocation2 + $0xf8] sm:$0xf0] }
 0x11c   :  { %1946 = vmatpush.bf16.msra.mxu2 %v4122_v37  ;;  %1959 = vmatpush.bf16.msra.mxu3 %v4250_v39  ;;  %v4954_v37 = vor.u32 %v5743_v24, %v4953_v23  ;;  %v4681_v39 = vld [vmem:[#allocation2 + $0x5c8] sm:$0xf]  ;;  %v5727_v23 = vld [vmem:[#allocation2 + $0x774] sm:$0xf0]  ;;  %v4506_v24 = vor.u32 %v5631_v14, %v4505_v13  ;;  %v4187_v13 = vld [vmem:[#allocation2 + $0x1f8] sm:$0xf0] }
 0x11d   :  { %1972 = vmatpush.bf16.msrb.mxu0 %v4378_v40  ;;  %v5675_v40 = vld [vmem:[#allocation2 + $0x5d4] sm:$0xf0]  ;;  %v4761_v20 = vld [vmem:[#allocation2 + $0x668] sm:$0xf]  ;;  %v5581_v14 = vld [vmem:[#allocation2 + $0x2ec] sm:$0xf] }
 0x11e   :  { %1934 = vmatpush.bf16.msra.mxu1 %v3978_v25  ;;  %v5739_v25 = vld [vmem:[#allocation2 + $0x7d4] sm:$0xf0]  ;;  %v4682_v52 = vor.u32 %v5675_v40, %v4681_v39  ;;  %v4889_v22 = vld [vmem:[#allocation2 + $0x768] sm:$0xf] }
 0x11f   :  { %v4890_v32 = vor.u32 %v5727_v23, %v4889_v22  ;;  %v4745_v39 = vld [vmem:[#allocation2 + $0x648] sm:$0xf]  ;;  %v5691_v40 = vld [vmem:[#allocation2 + $0x654] sm:$0xf0]  ;;  %v5513_v23 = vld [vmem:[#allocation2 + $0xcc] sm:$0xf] }
 0x120   :  { %1947 = vmatpush.bf16.msra.mxu2 %v4106_v58  ;;  %1960 = vmatpush.bf16.msra.mxu3 %v4234_v59  ;;  %v4938_v58 = vor.u32 %v5739_v25, %v4937_v44  ;;  %v4665_v59 = vld [vmem:[#allocation2 + $0x5a8] sm:$0xf]  ;;  %v4746_v56 = vor.u32 %v5691_v40, %v4745_v39  ;;  %v4299_v39 = vld [vmem:[#allocation2 + $0x2d8] sm:$0xf0]  ;;  %v5609_v40 = vld [vmem:[#allocation2 + $0x3cc] sm:$0xf] }
 0x121   :  { %1973 = vmatpush.bf16.msrb.mxu0 %v4362_v60  ;;  %v5671_v60 = vld [vmem:[#allocation2 + $0x5b4] sm:$0xf0]  ;;  %v4857_v33 = vld [vmem:[#allocation2 + $0x728] sm:$0xf] }
 0x122   :  { %1935 = vmatpush.bf16.msra.mxu1 %v3962_v62  ;;  %v5735_v62 = vld [vmem:[#allocation2 + $0x7b4] sm:$0xf0]  ;;  %v4666_v0 = vor.u32 %v5671_v60, %v4665_v59  ;;  %v4729_v59 = vld [vmem:[#allocation2 + $0x628] sm:$0xf] }
 0x123   :  { %v5687_v60 = vld [vmem:[#allocation2 + $0x634] sm:$0xf0] }
 0x124   :  { %1948 = vmatpush.bf16.msra.mxu2 %v4090_v4  ;;  %1961 = vmatpush.bf16.msra.mxu3 %v4218_v7  ;;  %v4922_v4 = vor.u32 %v5735_v62, %v4921_v34  ;;  %v4777_v7 = vld [vmem:[#allocation2 + $0x688] sm:$0xf] }
 0x125   :  { %1974 = vmatpush.bf16.msrb.mxu0 %v4346_v8  ;;  %v5699_v8 = vld [vmem:[#allocation2 + $0x694] sm:$0xf0]  ;;  %v4457_v62 = vld [vmem:[#allocation2 + $0x408] sm:$0xf] }
 0x126   :  { %1936 = vmatpush.bf16.msra.mxu1 %v3946_v12  ;;  %v4650_v12 = vor.u32 %v5667_v6, %v4649_v5  ;;  %v4778_v15 = vor.u32 %v5699_v8, %v4777_v7  ;;  %v4585_v5 = vld [vmem:[#allocation2 + $0x508] sm:$0xf]  ;;  %v5651_v6 = vld [vmem:[#allocation2 + $0x514] sm:$0xf0] }
 0x127   :  { %v4713_v7 = vld [vmem:[#allocation2 + $0x608] sm:$0xf]  ;;  %v5683_v8 = vld [vmem:[#allocation2 + $0x614] sm:$0xf0] }
 0x128   :  { %1949 = vmatpush.bf16.msra.mxu2 %v4074_v21  ;;  %1962 = vmatpush.bf16.msra.mxu3 %v4202_v27  ;;  %v5695_v21 = vld [vmem:[#allocation2 + $0x674] sm:$0xf0]  ;;  %v4634_v27 = vor.u32 %v5663_v19, %v4633_v17  ;;  %v4315_v17 = vld [vmem:[#allocation2 + $0x2f8] sm:$0xf0]  ;;  %v5613_v19 = vld [vmem:[#allocation2 + $0x3ec] sm:$0xf] }
 0x129   :  { %1975 = vmatpush.bf16.msrb.mxu0 %v4330_v29  ;;  %1937 = vmatmul.bf16.vlgmr.msra.gmra.mxu1 %v6145_v49  ;;  %v4489_v29 = vld [vmem:[#allocation2 + $0x448] sm:$0xf]  ;;  %v4762_v31 = vor.u32 %v5695_v21, %v4761_v20  ;;  %v4443_v20 = vld [vmem:[#allocation2 + $0x3f8] sm:$0xf0]  ;;  %v4714_v21 = vor.u32 %v5683_v8, %v4713_v7  ;;  %v5601_v8 = vld [vmem:[#allocation2 + $0x38c] sm:$0xf] }
 0x12a   :  { %1981 = vmatpush.bf16.msrb.mxu1 %v4570_v16  ;;  %v4906_v16 = vor.u32 %v5731_v10, %v4905_v9  ;;  %v4841_v9 = vld [vmem:[#allocation2 + $0x708] sm:$0xf]  ;;  %v5715_v10 = vld [vmem:[#allocation2 + $0x714] sm:$0xf0]  ;;  %v4267_v7 = vld [vmem:[#allocation2 + $0x298] sm:$0xf0] }
 0x12b   :  { %1950 = vmatmul.bf16.vlgmr.msra.gmra.mxu2 %v6149_v53  ;;  %1963 = vmatmul.bf16.vlgmr.msra.gmra.mxu3 %v6153_v54  ;;  %v4842_v22 = vor.u32 %v5715_v10, %v4841_v9  ;;  %v4395_v9 = vld [vmem:[#allocation2 + $0x398] sm:$0xf0]  ;;  %v5501_v10 = vld [vmem:[#allocation2 + $0x6c] sm:$0xf] }
 0x12c   :  { %1994 = vmatpush.bf16.msrb.mxu2 %v4698_v30  ;;  %2007 = vmatpush.bf16.msrb.mxu3 %v4826_v35  ;;  %v5627_v30 = vld [vmem:[#allocation2 + $0x454] sm:$0xf0]  ;;  %v4617_v35 = vld [vmem:[#allocation2 + $0x548] sm:$0xf] }
 0x12d   :  { %2020 = vmatpush.bf16.msra.mxu0 %v4954_v37  ;;  %v5659_v37 = vld [vmem:[#allocation2 + $0x554] sm:$0xf0]  ;;  %v4490_v44 = vor.u32 %v5627_v30, %v4489_v29  ;;  %v4318_v29 = vor.u32 %v5581_v14, %v4315_v17  ;;  %v4446_v30 = vor.u32 %v5613_v19, %v4443_v20  ;;  %v4398_v14 = vor.u32 %v5601_v8, %v4395_v9  ;;  %v5565_v17 = vld [vmem:[#allocation2 + $0x26c] sm:$0xf]  ;;  %v4571_v9 = vld [vmem:[#allocation2 + $0x4f8] sm:$0xf0] }
 0x12e   :  { %1976 = vmatmul.bf16.vlgmr.msrb.gmra.mxu0 %v6157_v55  ;;  %1982 = vmatpush.bf16.msrb.mxu1 %v4554_v51  ;;  %v4618_v25 = vor.u32 %v5659_v37, %v4617_v35  ;;  %v4473_v51 = vld [vmem:[#allocation2 + $0x428] sm:$0xf]  ;;  %v5577_v35 = vld [vmem:[#allocation2 + $0x2cc] sm:$0xf] }
 0x12f   :  { %v5645_v8 = vld [vmem:[#allocation2 + $0x4ec] sm:$0xf] }
 0x130   :  { %1995 = vmatpush.bf16.msrb.mxu2 %v4682_v52  ;;  %2008 = vmatpush.bf16.msrb.mxu3 %v4810_v28  ;;  %v5623_v52 = vld [vmem:[#allocation2 + $0x434] sm:$0xf0]  ;;  %v4601_v28 = vld [vmem:[#allocation2 + $0x528] sm:$0xf] }
 0x131   :  { %2021 = vmatpush.bf16.msra.mxu0 %v4938_v58  ;;  %v5655_v58 = vld [vmem:[#allocation2 + $0x534] sm:$0xf0]  ;;  %v4474_v34 = vor.u32 %v5623_v52, %v4473_v51  ;;  %v4302_v51 = vor.u32 %v5577_v35, %v4299_v39  ;;  %v4430_v52 = vor.u32 %v5609_v40, %v4427_v41  ;;  %v5529_v39 = vld [vmem:[#allocation2 + $0x14c] sm:$0xf]  ;;  %v4107_v40 = vld [vmem:[#allocation2 + $0x158] sm:$0xf0] }
 0x132   :  { %1983 = vmatpush.bf16.msrb.mxu1 %v4538_v63  ;;  %v4602_v63 = vor.u32 %v5655_v58, %v4601_v28  ;;  %v5573_v28 = vld [vmem:[#allocation2 + $0x2ac] sm:$0xf] }
 0x133   :  { %v5561_v41 = vld [vmem:[#allocation2 + $0x24c] sm:$0xf] }
 0x134   :  { %1996 = vmatpush.bf16.msrb.mxu2 %v4666_v0  ;;  %2009 = vmatpush.bf16.msrb.mxu3 %v4794_v3  ;;  %v5619_v0 = vld [vmem:[#allocation2 + $0x414] sm:$0xf0]  ;;  %v4730_v3 = vor.u32 %v5687_v60, %v4729_v59  ;;  %v4283_v60 = vld [vmem:[#allocation2 + $0x2b8] sm:$0xf0] }
 0x135   :  { %2022 = vmatpush.bf16.msra.mxu0 %v4922_v4  ;;  %v4858_v4 = vor.u32 %v5719_v61, %v4857_v33  ;;  %v5605_v33 = vld [vmem:[#allocation2 + $0x3ac] sm:$0xf]  ;;  %v4411_v61 = vld [vmem:[#allocation2 + $0x3b8] sm:$0xf0] }
 0x136   :  { %1984 = vmatpush.bf16.msrb.mxu1 %v4522_v11  ;;  %v4458_v11 = vor.u32 %v5619_v0, %v4457_v62  ;;  %v4011_v62 = vld [vmem:[#allocation2 + $0x98] sm:$0xf0]  ;;  %v4286_v0 = vor.u32 %v5573_v28, %v4283_v60  ;;  %v5525_v60 = vld [vmem:[#allocation2 + $0x12c] sm:$0xf] }
 0x138   :  { %1997 = vmatpush.bf16.msrb.mxu2 %v4650_v12  ;;  %2010 = vmatpush.bf16.msrb.mxu3 %v4778_v15  ;;  %v5549_v12 = vld [vmem:[#allocation2 + $0x1ec] sm:$0xf]  ;;  %v4062_v15 = vor.u32 %v5517_v1, %v4059_v2  ;;  %v4414_v1 = vor.u32 %v5605_v33, %v4411_v61  ;;  %v4091_v33 = vld [vmem:[#allocation2 + $0x138] sm:$0xf0] }
 0x139   :  { %2023 = vmatpush.bf16.msra.mxu0 %v4906_v16  ;;  %v4586_v16 = vor.u32 %v5651_v6, %v4585_v5  ;;  %v5569_v5 = vld [vmem:[#allocation2 + $0x28c] sm:$0xf] }
 0x13a   :  { %1985 = vmatpush.bf16.msrb.mxu1 %v4506_v24  ;;  %v4043_v24 = vld [vmem:[#allocation2 + $0xd8] sm:$0xf0]  ;;  %v5557_v61 = vld [vmem:[#allocation2 + $0x22c] sm:$0xf] }
 0x13b   :  { %v4046_v37 = vor.u32 %v5513_v23, %v4043_v24  ;;  %v5597_v23 = vld [vmem:[#allocation2 + $0x36c] sm:$0xf]  ;;  %v4379_v24 = vld [vmem:[#allocation2 + $0x378] sm:$0xf0] }
 0x13c   :  { %1998 = vmatpush.bf16.msrb.mxu2 %v4634_v27  ;;  %2011 = vmatpush.bf16.msrb.mxu3 %v4762_v31  ;;  %v4190_v27 = vor.u32 %v5549_v12, %v4187_v13  ;;  %v5545_v31 = vld [vmem:[#allocation2 + $0x1cc] sm:$0xf]  ;;  %v4270_v13 = vor.u32 %v5569_v5, %v4267_v7  ;;  %v4382_v35 = vor.u32 %v5597_v23, %v4379_v24  ;;  %v4699_v24 = vld [vmem:[#allocation2 + $0x5f8] sm:$0xf0] }
 0x13d   :  { %2024 = vmatpush.bf16.msra.mxu0 %v4890_v32  ;;  %v4171_v32 = vld [vmem:[#allocation2 + $0x1d8] sm:$0xf0]  ;;  %v5489_v5 = vld [vmem:[#allocation2 + $0xc] sm:$0xf]  ;;  %v4094_v7 = vor.u32 %v5525_v60, %v4091_v33 }
 0x13e   :  { %1986 = vmatpush.bf16.msrb.mxu1 %v4490_v44  ;;  %v4027_v44 = vld [vmem:[#allocation2 + $0xb8] sm:$0xf0]  ;;  %v5677_v23 = vld [vmem:[#allocation2 + $0x5ec] sm:$0xf] }
 0x13f   :  { %v4030_v58 = vor.u32 %v5509_v43, %v4027_v44  ;;  %v4235_v44 = vld [vmem:[#allocation2 + $0x258] sm:$0xf0]  ;;  %v5737_v33 = vld [vmem:[#allocation2 + $0x7cc] sm:$0xf] }
 0x140   :  { %1999 = vmatpush.bf16.msrb.mxu2 %v4618_v25  ;;  %2012 = vmatpush.bf16.msrb.mxu3 %v4746_v56  ;;  %v4174_v25 = vor.u32 %v5545_v31, %v4171_v32  ;;  %v5541_v56 = vld [vmem:[#allocation2 + $0x1ac] sm:$0xf]  ;;  %v4238_v28 = vor.u32 %v5561_v41, %v4235_v44  ;;  %v4555_v44 = vld [vmem:[#allocation2 + $0x4d8] sm:$0xf0] }
 0x141   :  { %2025 = vmatpush.bf16.msra.mxu0 %v4874_v57  ;;  %v4155_v57 = vld [vmem:[#allocation2 + $0x1b8] sm:$0xf0] }
 0x142   :  { %1987 = vmatpush.bf16.msrb.mxu1 %v4474_v34  ;;  %v5505_v34 = vld [vmem:[#allocation2 + $0x8c] sm:$0xf]  ;;  %v4811_v60 = vld [vmem:[#allocation2 + $0x6d8] sm:$0xf0] }
 0x143   :  { %v4014_v6 = vor.u32 %v5505_v34, %v4011_v62 }
 0x144   :  { %2000 = vmatpush.bf16.msrb.mxu2 %v4602_v63  ;;  %2013 = vmatpush.bf16.msrb.mxu3 %v4730_v3  ;;  %v4158_v63 = vor.u32 %v5541_v56, %v4155_v57  ;;  %v5537_v3 = vld [vmem:[#allocation2 + $0x18c] sm:$0xf]  ;;  %v3963_v56 = vld [vmem:[#allocation2 + $0x38] sm:$0xf0]  ;;  %v4110_v57 = vor.u32 %v5529_v39, %v4107_v40  ;;  %v4702_v40 = vor.u32 %v5677_v23, %v4699_v24 }
 0x145   :  { %2026 = vmatpush.bf16.msra.mxu0 %v4858_v4  ;;  %v6197_v59 = vpop.f32.mrf.mxu1  ;;  %v4139_v4 = vld [vmem:[#allocation2 + $0x198] sm:$0xf0] }
 0x146   :  { %1988 = vmatpush.bf16.msrb.mxu1 %v4458_v11  ;;  %v3995_v11 = vld [vmem:[#allocation2 + $0x78] sm:$0xf0]  ;;  %v4142_v12 = vor.u32 %v5537_v3, %v4139_v4 }
 0x147   :  { %v3998_v19 = vor.u32 %v5501_v10, %v3995_v11 }
 0x148   :  { %2001 = vmatpush.bf16.msrb.mxu2 %v4586_v16  ;;  %2014 = vmatpush.bf16.msrb.mxu3 %v4714_v21  ;;  %v6201_v2 = vpop.f32.mrf.mxu0  ;;  %v4123_v16 = vld [vmem:[#allocation2 + $0x178] sm:$0xf0] }
 0x149   :  { %2027 = vmatpush.bf16.msra.mxu0 %v4842_v22  ;;  %1989 = vmatmul.bf16.vlgmr.msrb.gmra.mxu1 %v6165_v36  ;;  %v4251_v22 = vld [vmem:[#allocation2 + $0x278] sm:$0xf0] }
 0x14a   :  { %2033 = vmatpush.bf16.msra.mxu1 %v4062_v15  ;;  %v5533_v15 = vld [vmem:[#allocation2 + $0x16c] sm:$0xf]  ;;  %v4254_v32 = vor.u32 %v5565_v17, %v4251_v22  ;;  %v4203_v17 = vld [vmem:[#allocation2 + $0x218] sm:$0xf0]  ;;  %v4574_v22 = vor.u32 %v5645_v8, %v4571_v9 }
 0x14b   :  { %2002 = vmatmul.bf16.vlgmr.msrb.gmra.mxu2 %v6169_v42  ;;  %2015 = vmatmul.bf16.vlgmr.msrb.gmra.mxu3 %v6173_v45  ;;  %v4126_v31 = vor.u32 %v5533_v15, %v4123_v16  ;;  %v5553_v15 = vld [vmem:[#allocation2 + $0x20c] sm:$0xf]  ;;  %v4795_v9 = vld [vmem:[#allocation2 + $0x6b8] sm:$0xf0] }
 0x14c   :  { %2046 = vmatpush.bf16.msra.mxu2 %v4190_v27  ;;  %2059 = vmatpush.bf16.msra.mxu3 %v4318_v29  ;;  %v5497_v29 = vld [vmem:[#allocation2 + $0x4c] sm:$0xf] }
 0x14d   :  { %2072 = vmatpush.bf16.msrb.mxu0 %v4446_v30  ;;  %v1732_v20 = vpop.f32.mrf.mxu1  ;;  %v6203_v21 = vpop.f32.mrf.mxu2  ;;  %v3979_v30 = vld [vmem:[#allocation2 + $0x58] sm:$0xf0]  ;;  %v5701_v8 = vld [vmem:[#allocation2 + $0x6ac] sm:$0xf] }
 0x14e   :  { %2034 = vmatpush.bf16.msra.mxu1 %v4046_v37  ;;  %2028 = vmatmul.bf16.vlgmr.msra.gmra.mxu0 %v6177_v50  ;;  %v6205_v27 = vpop.f32.mrf.mxu3  ;;  %v3982_v43 = vor.u32 %v5497_v29, %v3979_v30  ;;  %v4331_v20 = vld [vmem:[#allocation2 + $0x318] sm:$0xf0]  ;;  %v5709_v29 = vld [vmem:[#allocation2 + $0x6ec] sm:$0xf] }
 0x150   :  { %2047 = vmatpush.bf16.msra.mxu2 %v4174_v25  ;;  %2060 = vmatpush.bf16.msra.mxu3 %v4302_v51  ;;  %v1771_v37 = vpop.f32.mrf.mxu0  ;;  %v5593_v25 = vld [vmem:[#allocation2 + $0x34c] sm:$0xf]  ;;  %v4363_v51 = vld [vmem:[#allocation2 + $0x358] sm:$0xf0] }
 0x151   :  { %2073 = vmatpush.bf16.msrb.mxu0 %v4430_v52  ;;  %v5493_v52 = vld [vmem:[#allocation2 + $0x2c] sm:$0xf]  ;;  %v4206_v37 = vor.u32 %v5553_v15, %v4203_v17 }
 0x152   :  { %2035 = vmatpush.bf16.msra.mxu1 %v4030_v58  ;;  %v4366_v58 = vor.u32 %v5593_v25, %v4363_v51  ;;  %v3966_v34 = vor.u32 %v5493_v52, %v3963_v56 }
 0x154   :  { %2048 = vmatpush.bf16.msra.mxu2 %v4158_v63  ;;  %2061 = vmatpush.bf16.msra.mxu3 %v4286_v0  ;;  %v4219_v63 = vld [vmem:[#allocation2 + $0x238] sm:$0xf0]  ;;  %v5589_v0 = vld [vmem:[#allocation2 + $0x32c] sm:$0xf] }
 0x155   :  { %2074 = vmatpush.bf16.msrb.mxu0 %v4414_v1  ;;  %v1745_v62 = vpop.f32.mrf.mxu2  ;;  %v4347_v1 = vld [vmem:[#allocation2 + $0x338] sm:$0xf0]  ;;  %v4222_v10 = vor.u32 %v5557_v61, %v4219_v63 }
 0x156   :  { %2036 = vmatpush.bf16.msra.mxu1 %v4014_v6  ;;  %v1758_v3 = vpop.f32.mrf.mxu3  ;;  %v6207_v4 = vpop.f32.mrf.mxu1  ;;  %v3947_v6 = vld [vmem:[#allocation2 + $0x18] sm:$0xf0]  ;;  %v4350_v11 = vor.u32 %v5589_v0, %v4347_v1  ;;  %v5637_v0 = vld [vmem:[#allocation2 + $0x4ac] sm:$0xf] }
 0x157   :  { %v3950_v16 = vor.u32 %v5489_v5, %v3947_v6  ;;  %v4939_v61 = vld [vmem:[#allocation2 + $0x7d8] sm:$0xf0]  ;;  %v5669_v6 = vld [vmem:[#allocation2 + $0x5ac] sm:$0xf] }
 0x158   :  { %2049 = vmatpush.bf16.msra.mxu2 %v4142_v12  ;;  %2062 = vmatpush.bf16.msra.mxu3 %v4270_v13  ;;  %v6209_v12 = vpop.f32.mrf.mxu0  ;;  %v5521_v13 = vld [vmem:[#allocation2 + $0x10c] sm:$0xf]  ;;  %v4539_v1 = vld [vmem:[#allocation2 + $0x4b8] sm:$0xf0]  ;;  %v4942_v5 = vor.u32 %v5737_v33, %v4939_v61 }
 0x159   :  { %2075 = vmatpush.bf16.msrb.mxu0 %v4398_v14  ;;  %v4075_v14 = vld [vmem:[#allocation2 + $0x118] sm:$0xf0] }
 0x15a   :  { %2037 = vmatpush.bf16.msra.mxu1 %v3998_v19  ;;  %v5585_v19 = vld [vmem:[#allocation2 + $0x30c] sm:$0xf]  ;;  %v4078_v30 = vor.u32 %v5521_v13, %v4075_v14  ;;  %v6221_v13 = vld [vmem:[%s6895_s8] sm:$0xf]  ;;  %v4542_v14 = vor.u32 %v5637_v0, %v4539_v1  ;;  %v4763_v61 = vld [vmem:[#allocation2 + $0x678] sm:$0xf0] }
 0x15b   :  { %v4334_v39 = vor.u32 %v5585_v19, %v4331_v20  ;;  %v430_v17 = vperm.slane %v6221_v13, 1  ;;  %v5633_v19 = vld [vmem:[#allocation2 + $0x48c] sm:$0xf]  ;;  %v4523_v20 = vld [vmem:[#allocation2 + $0x498] sm:$0xf0] }
 0x15c   :  { %2050 = vmatpush.bf16.msra.mxu2 %v4126_v31  ;;  %2063 = vmatpush.bf16.msra.mxu3 %v4254_v32  ;;  %v4827_v31 = vld [vmem:[#allocation2 + $0x6f8] sm:$0xf0]  ;;  %v5741_v32 = vld [vmem:[#allocation2 + $0x7ec] sm:$0xf] }
 0x15d   :  { %2076 = vmatpush.bf16.msrb.mxu0 %v4382_v35  ;;  %v4955_v35 = vld [vmem:[#allocation2 + $0x7f8] sm:$0xf0]  ;;  %v6211_v41 = vpop.f32.mrf.mxu2  ;;  %v4830_v25 = vor.u32 %v5709_v29, %v4827_v31  ;;  %v5665_v29 = vld [vmem:[#allocation2 + $0x58c] sm:$0xf]  ;;  %v438_v33 = vmul.f32 %v430_v17, %v6135_v46 }
 0x15e   :  { %2038 = vmatpush.bf16.msra.mxu1 %v3982_v43  ;;  %v5641_v43 = vld [vmem:[#allocation2 + $0x4cc] sm:$0xf]  ;;  %v4958_v51 = vor.u32 %v5741_v32, %v4955_v35  ;;  %v1784_v52 = vpop.f32.mrf.mxu1  ;;  %v6213_v56 = vpop.f32.mrf.mxu3  ;;  %v4779_v32 = vld [vmem:[#allocation2 + $0x698] sm:$0xf0] }
 0x15f   :  { %v5697_v31 = vld [vmem:[#allocation2 + $0x68c] sm:$0xf]  ;;  %v4875_v17 = vld [vmem:[#allocation2 + $0x758] sm:$0xf0] }
 0x160   :  { %2051 = vmatpush.bf16.msra.mxu2 %v4110_v57  ;;  %2064 = vmatpush.bf16.msra.mxu3 %v4238_v28  ;;  %v5673_v57 = vld [vmem:[#allocation2 + $0x5cc] sm:$0xf]  ;;  %v4683_v28 = vld [vmem:[#allocation2 + $0x5d8] sm:$0xf0]  ;;  %v1823_v62 = vpop.f32.mrf.mxu0  ;;  %v4782_v52 = vor.u32 %v5697_v31, %v4779_v32 }
 0x161   :  { %2077 = vmatpush.bf16.msrb.mxu0 %v4366_v58  ;;  %v5705_v58 = vld [vmem:[#allocation2 + $0x6cc] sm:$0xf]  ;;  %v4686_v63 = vor.u32 %v5673_v57, %v4683_v28  ;;  %v4891_v62 = vld [vmem:[#allocation2 + $0x778] sm:$0xf0] }
 0x162   :  { %2039 = vmatpush.bf16.msra.mxu1 %v3966_v34  ;;  %v4558_v34 = vor.u32 %v5641_v43, %v4555_v44  ;;  %v4814_v3 = vor.u32 %v5705_v58, %v4811_v60  ;;  %v5729_v35 = vld [vmem:[#allocation2 + $0x78c] sm:$0xf]  ;;  %v4635_v58 = vld [vmem:[#allocation2 + $0x578] sm:$0xf0] }
 0x163   :  { %v5629_v44 = vld [vmem:[#allocation2 + $0x46c] sm:$0xf] }
 0x164   :  { %2052 = vmatpush.bf16.msra.mxu2 %v4094_v7  ;;  %2065 = vmatpush.bf16.msra.mxu3 %v4222_v10  ;;  %v4667_v7 = vld [vmem:[#allocation2 + $0x5b8] sm:$0xf0]  ;;  %v5733_v10 = vld [vmem:[#allocation2 + $0x7ac] sm:$0xf] }
 0x165   :  { %2078 = vmatpush.bf16.msrb.mxu0 %v4350_v11  ;;  %v4923_v11 = vld [vmem:[#allocation2 + $0x7b8] sm:$0xf0]  ;;  %v4670_v15 = vor.u32 %v5669_v6, %v4667_v7  ;;  %v5661_v28 = vld [vmem:[#allocation2 + $0x56c] sm:$0xf] }
 0x166   :  { %2040 = vmatpush.bf16.msra.mxu1 %v3950_v16  ;;  %v1797_v16 = vpop.f32.mrf.mxu2  ;;  %v4926_v23 = vor.u32 %v5733_v10, %v4923_v11  ;;  %v1810_v24 = vpop.f32.mrf.mxu3  ;;  %v5693_v60 = vld [vmem:[#allocation2 + $0x66c] sm:$0xf]  ;;  %v4638_v1 = vor.u32 %v5661_v28, %v4635_v58  ;;  %v4619_v10 = vld [vmem:[#allocation2 + $0x558] sm:$0xf0] }
 0x167   :  { %v4766_v6 = vor.u32 %v5693_v60, %v4763_v61  ;;  %v5689_v11 = vld [vmem:[#allocation2 + $0x64c] sm:$0xf]  ;;  %v4459_v58 = vld [vmem:[#allocation2 + $0x418] sm:$0xf0]  ;;  %v5073_v60 = vld [vmem:[#allocation4 + $0xe0] sm:$0xf] }
 0x168   :  { %2053 = vmatpush.bf16.msra.mxu2 %v4078_v30  ;;  %2066 = vmatpush.bf16.msra.mxu3 %v4206_v37  ;;  %v4651_v30 = vld [vmem:[#allocation2 + $0x598] sm:$0xf0]  ;;  %v5721_v16 = vld [vmem:[#allocation2 + $0x74c] sm:$0xf] }
 0x169   :  { %2079 = vmatpush.bf16.msrb.mxu0 %v4334_v39  ;;  %2041 = vmatmul.bf16.vlgmr.msra.gmra.mxu1 %v6145_v49  ;;  %v4907_v37 = vld [vmem:[#allocation2 + $0x798] sm:$0xf0]  ;;  %v1834_v39 = vpop.f32.mrf.mxu1  ;;  %v4654_v43 = vor.u32 %v5665_v29, %v4651_v30  ;;  %v5621_v24 = vld [vmem:[#allocation2 + $0x42c] sm:$0xf]  ;;  %v4878_v32 = vor.u32 %v5721_v16, %v4875_v17  ;;  %v5870_v16 = vld [vmem:[#allocation4 + $0x3ec] sm:$0xf0] }
 0x16a   :  { %2085 = vmatpush.bf16.msrb.mxu1 %v4574_v22  ;;  %v4798_v22 = vor.u32 %v5701_v8, %v4795_v9  ;;  %v4910_v57 = vor.u32 %v5729_v35, %v4907_v37  ;;  %v1835_v0 = vadd.f32 %v1834_v39, %v438_v33  ;;  %v5657_v9 = vld [vmem:[#allocation2 + $0x54c] sm:$0xf]  ;;  %v4475_v29 = vld [vmem:[#allocation2 + $0x438] sm:$0xf0]  ;;  %v5774_v33 = vld [vmem:[#allocation4 + $0xec] sm:$0xf0] }
 0x16b   :  { %2054 = vmatmul.bf16.vlgmr.msra.gmra.mxu2 %v6149_v53  ;;  %2067 = vmatmul.bf16.vlgmr.msra.gmra.mxu3 %v6153_v54  ;;  %v5653_v35 = vld [vmem:[#allocation2 + $0x52c] sm:$0xf]  ;;  %v4603_v37 = vld [vmem:[#allocation2 + $0x538] sm:$0xf0] }
 0x16c   :  { %2098 = vmatpush.bf16.msrb.mxu2 %v4702_v40  ;;  %2111 = vmatpush.bf16.msrb.mxu3 %v4830_v25  ;;  %v4526_v40 = vor.u32 %v5633_v19, %v4523_v20  ;;  %v4507_v25 = vld [vmem:[#allocation2 + $0x478] sm:$0xf0]  ;;  %v5685_v39 = vld [vmem:[#allocation2 + $0x62c] sm:$0xf]  ;;  %v4606_v28 = vor.u32 %v5653_v35, %v4603_v37  ;;  %v5834_v37 = vld [vmem:[#allocation4 + $0x2cc] sm:$0xf0] }
 0x16d   :  { %2124 = vmatpush.bf16.msra.mxu0 %v4958_v51  ;;  %v1873_v51 = vpop.f32.mrf.mxu0 }
 0x16e   :  { %2080 = vmatmul.bf16.vlgmr.msrb.gmra.mxu0 %v6157_v55  ;;  %2086 = vmatpush.bf16.msrb.mxu1 %v4558_v34  ;;  %v5725_v34 = vld [vmem:[#allocation2 + $0x76c] sm:$0xf]  ;;  %v1847_v8 = vpop.f32.mrf.mxu2  ;;  %v1860_v46 = vpop.f32.mrf.mxu3 }
 0x16f   :  { %v4894_v7 = vor.u32 %v5725_v34, %v4891_v62 }
 0x170   :  { %2099 = vmatpush.bf16.msrb.mxu2 %v4686_v63  ;;  %2112 = vmatpush.bf16.msrb.mxu3 %v4814_v3  ;;  %v4510_v63 = vor.u32 %v5629_v44, %v4507_v25  ;;  %v5625_v3 = vld [vmem:[#allocation2 + $0x44c] sm:$0xf]  ;;  %v4859_v44 = vld [vmem:[#allocation2 + $0x738] sm:$0xf0] }
 0x171   :  { %2125 = vmatpush.bf16.msra.mxu0 %v4942_v5  ;;  %v4491_v5 = vld [vmem:[#allocation2 + $0x458] sm:$0xf0]  ;;  %v1836_v19 = vpop.f32.mrf.mxu1 }
 0x172   :  { %2087 = vmatpush.bf16.msrb.mxu1 %v4542_v14  ;;  %v1848_v14 = vadd.f32 %v1847_v8, %v1835_v0  ;;  %v4494_v20 = vor.u32 %v5625_v3, %v4491_v5  ;;  %v4587_v0 = vld [vmem:[#allocation2 + $0x518] sm:$0xf0]  ;;  %v5201_v8 = vld [vmem:[#allocation4 + $0x1e0] sm:$0xf] }
 0x173   :  { %v4715_v5 = vld [vmem:[#allocation2 + $0x618] sm:$0xf0] }
 0x174   :  { %2100 = vmatpush.bf16.msrb.mxu2 %v4670_v15  ;;  %2113 = vmatpush.bf16.msrb.mxu3 %v4798_v22  ;;  %v4747_v15 = vld [vmem:[#allocation2 + $0x658] sm:$0xf0]  ;;  %v1861_v22 = vadd.f32 %v1860_v46, %v1848_v14  ;;  %v5838_v46 = vld [vmem:[#allocation4 + $0x2ec] sm:$0xf0] }
 0x175   :  { %2126 = vmatpush.bf16.msra.mxu0 %v4926_v23  ;;  %v4622_v23 = vor.u32 %v5657_v9, %v4619_v10  ;;  %v1875_v30 = vpop.f32.mrf.mxu0  ;;  %v4750_v31 = vor.u32 %v5689_v11, %v4747_v15  ;;  %v5806_v9 = vld [vmem:[#allocation4 + $0x1ec] sm:$0xf0]  ;;  %v5329_v10 = vld [vmem:[#allocation4 + $0x2e0] sm:$0xf]  ;;  %v5074_v11 = vor.u32 %v5774_v33, %v5073_v60 }
 0x176   :  { %2088 = vmatpush.bf16.msrb.mxu1 %v4526_v40  ;;  %v4731_v40 = vld [vmem:[#allocation2 + $0x638] sm:$0xf0]  ;;  %v6226_v25 = vadd.f32 %v1873_v51, %v1861_v22  ;;  %v1849_v62 = vpop.f32.mrf.mxu2  ;;  %v1862_v3 = vpop.f32.mrf.mxu3  ;;  %v5713_v51 = vld [vmem:[#allocation2 + $0x70c] sm:$0xf]  ;;  %v5457_v15 = vld [vmem:[#allocation4 + $0x3e0] sm:$0xf] }
 0x177   :  { %v4734_v61 = vor.u32 %v5685_v39, %v4731_v40  ;;  %v5770_v22 = vld [vmem:[#allocation4 + $0xcc] sm:$0xf0]  ;;  %v5185_v30 = vld [vmem:[#allocation4 + $0x1c0] sm:$0xf] }
 0x178   :  { %2101 = vmatpush.bf16.msrb.mxu2 %v4654_v43  ;;  %2114 = vmatpush.bf16.msrb.mxu3 %v4782_v52  ;;  %v5717_v43 = vld [vmem:[#allocation2 + $0x72c] sm:$0xf]  ;;  %v4478_v52 = vor.u32 %v5621_v24, %v4475_v29  ;;  %v5330_v24 = vor.u32 %v5838_v46, %v5329_v10  ;;  %v5458_v29 = vor.u32 %v5870_v16, %v5457_v15  ;;  %v5441_v39 = vld [vmem:[#allocation4 + $0x3c0] sm:$0xf]  ;;  %v5866_v40 = vld [vmem:[#allocation4 + $0x3cc] sm:$0xf0] }
 0x179   :  { %2127 = vmatpush.bf16.msra.mxu0 %v4910_v57  ;;  %v5617_v57 = vld [vmem:[#allocation2 + $0x40c] sm:$0xf]  ;;  %v4862_v34 = vor.u32 %v5717_v43, %v4859_v44  ;;  %v5041_v43 = vld [vmem:[#allocation4 + $0xa0] sm:$0xf]  ;;  %v5766_v44 = vld [vmem:[#allocation4 + $0xac] sm:$0xf0] }
 0x17a   :  { %2089 = vmatpush.bf16.msrb.mxu1 %v4510_v63  ;;  %v5649_v63 = vld [vmem:[#allocation2 + $0x50c] sm:$0xf]  ;;  %v5798_v60 = vld [vmem:[#allocation4 + $0x1ac] sm:$0xf0]  ;;  %v5297_v33 = vld [vmem:[#allocation4 + $0x2a0] sm:$0xf] }
 0x17b   :  { %v4590_v14 = vor.u32 %v5649_v63, %v4587_v0  ;;  %v5425_v62 = vld [vmem:[#allocation4 + $0x3a0] sm:$0xf]  ;;  %v5862_v63 = vld [vmem:[#allocation4 + $0x3ac] sm:$0xf0] }
 0x17c   :  { %2102 = vmatpush.bf16.msrb.mxu2 %v4638_v1  ;;  %2115 = vmatpush.bf16.msrb.mxu3 %v4766_v6  ;;  %v5681_v1 = vld [vmem:[#allocation2 + $0x60c] sm:$0xf]  ;;  %v4843_v6 = vld [vmem:[#allocation2 + $0x718] sm:$0xf0]  ;;  %v5025_v0 = vld [vmem:[#allocation4 + $0x80] sm:$0xf] }
 0x17d   :  { %2128 = vmatpush.bf16.msra.mxu0 %v4894_v7  ;;  %v4462_v7 = vor.u32 %v5617_v57, %v4459_v58  ;;  %v4718_v17 = vor.u32 %v5681_v1, %v4715_v5  ;;  %v4846_v19 = vor.u32 %v5713_v51, %v4843_v6  ;;  %v5169_v58 = vld [vmem:[#allocation4 + $0x1a0] sm:$0xf]  ;;  %v5426_v5 = vor.u32 %v5862_v63, %v5425_v62 }
 0x17e   :  { %2090 = vmatpush.bf16.msrb.mxu1 %v4494_v20  ;;  %v5057_v20 = vld [vmem:[#allocation4 + $0xc0] sm:$0xf]  ;;  %v5170_v1 = vor.u32 %v5798_v60, %v5169_v58 }
 0x17f   :  { %v5058_v35 = vor.u32 %v5770_v22, %v5057_v20  ;;  %v5153_v6 = vld [vmem:[#allocation4 + $0x180] sm:$0xf] }
 0x180   :  { %2103 = vmatpush.bf16.msrb.mxu2 %v4622_v23  ;;  %2116 = vmatpush.bf16.msrb.mxu3 %v4750_v31  ;;  %v5202_v23 = vor.u32 %v5806_v9, %v5201_v8  ;;  %v5802_v31 = vld [vmem:[#allocation4 + $0x1cc] sm:$0xf0]  ;;  %v5409_v10 = vld [vmem:[#allocation4 + $0x380] sm:$0xf] }
 0x181   :  { %2129 = vmatpush.bf16.msra.mxu0 %v4878_v32  ;;  %v5313_v32 = vld [vmem:[#allocation4 + $0x2c0] sm:$0xf]  ;;  %v5826_v9 = vld [vmem:[#allocation4 + $0x28c] sm:$0xf0] }
 0x182   :  { %2091 = vmatpush.bf16.msrb.mxu1 %v4478_v52  ;;  %v5186_v52 = vor.u32 %v5802_v31, %v5185_v30  ;;  %v5314_v57 = vor.u32 %v5834_v37, %v5313_v32  ;;  %v5265_v20 = vld [vmem:[#allocation4 + $0x260] sm:$0xf]  ;;  %v5754_v31 = vld [vmem:[#allocation4 + $0x4c] sm:$0xf0] }
 0x183   :  { %v4993_v30 = vld [vmem:[#allocation4 + $0x40] sm:$0xf] }
 0x184   :  { %2104 = vmatpush.bf16.msrb.mxu2 %v4606_v28  ;;  %2117 = vmatpush.bf16.msrb.mxu3 %v4734_v61  ;;  %v5442_v28 = vor.u32 %v5866_v40, %v5441_v39  ;;  %v5042_v61 = vor.u32 %v5766_v44, %v5041_v43  ;;  %v5121_v43 = vld [vmem:[#allocation4 + $0x140] sm:$0xf]  ;;  %v5786_v44 = vld [vmem:[#allocation4 + $0x14c] sm:$0xf0]  ;;  %v4994_v58 = vor.u32 %v5754_v31, %v4993_v30 }
 0x185   :  { %2130 = vmatpush.bf16.msra.mxu0 %v4862_v34  ;;  %v5830_v34 = vld [vmem:[#allocation4 + $0x2ac] sm:$0xf0]  ;;  %v4977_v62 = vld [vmem:[#allocation4 + $0x20] sm:$0xf] }
 0x186   :  { %2092 = vmatpush.bf16.msrb.mxu1 %v4462_v7  ;;  %v5298_v3 = vor.u32 %v5830_v34, %v5297_v33  ;;  %v1886_v51 = vpop.f32.mrf.mxu1  ;;  %v5281_v7 = vld [vmem:[#allocation4 + $0x280] sm:$0xf]  ;;  %v5818_v33 = vld [vmem:[#allocation4 + $0x24c] sm:$0xf0] }
 0x187   :  { %v5282_v15 = vor.u32 %v5826_v9, %v5281_v7  ;;  %v1887_v32 = vadd.f32 %v1886_v51, %v6226_v25  ;;  %v5850_v34 = vld [vmem:[#allocation4 + $0x34c] sm:$0xf0]  ;;  %v5361_v9 = vld [vmem:[#allocation4 + $0x320] sm:$0xf] }
 0x188   :  { %2105 = vmatpush.bf16.msrb.mxu2 %v4590_v14  ;;  %2118 = vmatpush.bf16.msrb.mxu3 %v4718_v17  ;;  %v5758_v14 = vld [vmem:[#allocation4 + $0x6c] sm:$0xf0]  ;;  %v5137_v17 = vld [vmem:[#allocation4 + $0x160] sm:$0xf] }
 0x189   :  { %2131 = vmatpush.bf16.msra.mxu0 %v4846_v19  ;;  %2093 = vmatmul.bf16.vlgmr.msrb.gmra.mxu1 %v6165_v36  ;;  %v5762_v36 = vld [vmem:[#allocation4 + $0x8c] sm:$0xf0] }
 0x18a   :  { %2905 = vmatpush.bf16.msra.mxu1 %v5074_v11  ;;  %v5026_v8 = vor.u32 %v5762_v36, %v5025_v0  ;;  %v5858_v11 = vld [vmem:[#allocation4 + $0x38c] sm:$0xf0]  ;;  %v5122_v0 = vor.u32 %v5786_v44, %v5121_v43  ;;  %v5331_v43 = vld [vmem:[#allocation4 + $0x2f0] sm:$0xf0]  ;;  %v5868_v44 = vld [vmem:[#allocation4 + $0x3e4] sm:$0xf] }
 0x18b   :  { %2106 = vmatmul.bf16.vlgmr.msrb.gmra.mxu2 %v6169_v42  ;;  %2119 = vmatmul.bf16.vlgmr.msrb.gmra.mxu3 %v6173_v45  ;;  %v5794_v42 = vld [vmem:[#allocation4 + $0x18c] sm:$0xf0]  ;;  %v5009_v45 = vld [vmem:[#allocation4 + $0x60] sm:$0xf]  ;;  %v5410_v16 = vor.u32 %v5858_v11, %v5409_v10 }
 0x18c   :  { %2918 = vmatpush.bf16.msra.mxu2 %v5202_v23  ;;  %2931 = vmatpush.bf16.msra.mxu3 %v5330_v24  ;;  %v5154_v46 = vor.u32 %v5794_v42, %v5153_v6  ;;  %v5790_v19 = vld [vmem:[#allocation4 + $0x16c] sm:$0xf0]  ;;  %v5010_v22 = vor.u32 %v5758_v14, %v5009_v45  ;;  %v5393_v24 = vld [vmem:[#allocation4 + $0x360] sm:$0xf] }
 0x18d   :  { %2944 = vmatpush.bf16.msrb.mxu0 %v5458_v29  ;;  %v5822_v23 = vld [vmem:[#allocation4 + $0x26c] sm:$0xf0]  ;;  %v5233_v6 = vld [vmem:[#allocation4 + $0x220] sm:$0xf] }
 0x18e   :  { %2906 = vmatpush.bf16.msra.mxu1 %v5058_v35  ;;  %2132 = vmatmul.bf16.vlgmr.msra.gmra.mxu0 %v6177_v50  ;;  %v1925_v50 = vpop.f32.mrf.mxu0  ;;  %v5854_v29 = vld [vmem:[#allocation4 + $0x36c] sm:$0xf0]  ;;  %v5138_v35 = vor.u32 %v5790_v19, %v5137_v17  ;;  %v5266_v37 = vor.u32 %v5822_v23, %v5265_v20  ;;  %v1899_v40 = vpop.f32.mrf.mxu2  ;;  %v4961_v11 = vld [vmem:[#allocation4] sm:$0xf] }
 0x18f   :  { %v5394_v39 = vor.u32 %v5854_v29, %v5393_v24  ;;  %v1912_v60 = vpop.f32.mrf.mxu3  ;;  %v5750_v25 = vld [vmem:[#allocation4 + $0x2c] sm:$0xf0]  ;;  %v5089_v19 = vld [vmem:[#allocation4 + $0x100] sm:$0xf] }
 0x190   :  { %2919 = vmatpush.bf16.msra.mxu2 %v5186_v52  ;;  %2932 = vmatpush.bf16.msra.mxu3 %v5314_v57  ;;  %v5249_v52 = vld [vmem:[#allocation4 + $0x240] sm:$0xf]  ;;  %v1888_v57 = vpop.f32.mrf.mxu1  ;;  %v5782_v51 = vld [vmem:[#allocation4 + $0x12c] sm:$0xf0]  ;;  %v4978_v7 = vor.u32 %v5750_v25, %v4977_v62  ;;  %v5800_v62 = vld [vmem:[#allocation4 + $0x1c4] sm:$0xf] }
 0x191   :  { %2945 = vmatpush.bf16.msrb.mxu0 %v5442_v28  ;;  %v1900_v28 = vadd.f32 %v1899_v40, %v1887_v32  ;;  %v5846_v10 = vld [vmem:[#allocation4 + $0x32c] sm:$0xf0]  ;;  %v5345_v29 = vld [vmem:[#allocation4 + $0x300] sm:$0xf]  ;;  %v5187_v25 = vld [vmem:[#allocation4 + $0x1d0] sm:$0xf0] }
 0x192   :  { %2907 = vmatpush.bf16.msra.mxu1 %v5042_v61  ;;  %v5377_v61 = vld [vmem:[#allocation4 + $0x340] sm:$0xf]  ;;  %v5746_v45 = vld [vmem:[#allocation4 + $0xc] sm:$0xf0]  ;;  %v5362_v17 = vor.u32 %v5846_v10, %v5361_v9  ;;  %v5796_v10 = vld [vmem:[#allocation4 + $0x1a4] sm:$0xf] }
 0x193   :  { %v1913_v63 = vadd.f32 %v1912_v60, %v1900_v28  ;;  %v5778_v20 = vld [vmem:[#allocation4 + $0x10c] sm:$0xf0]  ;;  %v5768_v60 = vld [vmem:[#allocation4 + $0xc4] sm:$0xf] }
 0x194   :  { %2920 = vmatpush.bf16.msra.mxu2 %v5170_v1  ;;  %2933 = vmatpush.bf16.msra.mxu3 %v5298_v3  ;;  %v5250_v1 = vor.u32 %v5818_v33, %v5249_v52  ;;  %v5378_v3 = vor.u32 %v5850_v34, %v5377_v61  ;;  %v5810_v24 = vld [vmem:[#allocation4 + $0x20c] sm:$0xf0]  ;;  %v5090_v40 = vor.u32 %v5778_v20, %v5089_v19  ;;  %v5459_v52 = vld [vmem:[#allocation4 + $0x3f0] sm:$0xf0]  ;;  %v5760_v19 = vld [vmem:[#allocation4 + $0x84] sm:$0xf] }
 0x195   :  { %2946 = vmatpush.bf16.msrb.mxu0 %v5426_v5  ;;  %v5105_v5 = vld [vmem:[#allocation4 + $0x120] sm:$0xf]  ;;  %v6233_v42 = vadd.f32 %v1925_v50, %v1913_v63  ;;  %v4962_v50 = vor.u32 %v5746_v45, %v4961_v11  ;;  %v5842_v30 = vld [vmem:[#allocation4 + $0x30c] sm:$0xf0]  ;;  %v5059_v33 = vld [vmem:[#allocation4 + $0xd0] sm:$0xf0]  ;;  %v5462_v34 = vor.u32 %v5868_v44, %v5459_v52 }
 0x196   :  { %2908 = vmatpush.bf16.msra.mxu1 %v5026_v8  ;;  %v1927_v36 = vpop.f32.mrf.mxu0  ;;  %v5814_v8 = vld [vmem:[#allocation4 + $0x22c] sm:$0xf0]  ;;  %v5106_v14 = vor.u32 %v5782_v51, %v5105_v5  ;;  %v1901_v23 = vpop.f32.mrf.mxu2  ;;  %v5346_v28 = vor.u32 %v5842_v30, %v5345_v29  ;;  %v5832_v63 = vld [vmem:[#allocation4 + $0x2c4] sm:$0xf]  ;;  %v5190_v5 = vor.u32 %v5800_v62, %v5187_v25  ;;  %v5171_v11 = vld [vmem:[#allocation4 + $0x1b0] sm:$0xf0] }
 0x197   :  { %v1914_v31 = vpop.f32.mrf.mxu3  ;;  %v5864_v36 = vld [vmem:[#allocation4 + $0x3c4] sm:$0xf]  ;;  %v5027_v20 = vld [vmem:[#allocation4 + $0x90] sm:$0xf0] }
 0x198   :  { %2921 = vmatpush.bf16.msra.mxu2 %v5154_v46  ;;  %2934 = vmatpush.bf16.msra.mxu3 %v5282_v15  ;;  %v5772_v46 = vld [vmem:[#allocation4 + $0xe4] sm:$0xf]  ;;  %v5075_v15 = vld [vmem:[#allocation4 + $0xf0] sm:$0xf0] }
 0x199   :  { %2947 = vmatpush.bf16.msrb.mxu0 %v5410_v16  ;;  %v5234_v16 = vor.u32 %v5814_v8, %v5233_v6  ;;  %v5078_v32 = vor.u32 %v5772_v46, %v5075_v15  ;;  %v5764_v51 = vld [vmem:[#allocation4 + $0xa4] sm:$0xf]  ;;  %v5043_v6 = vld [vmem:[#allocation4 + $0xb0] sm:$0xf0] }
 0x19a   :  { %2909 = vmatpush.bf16.msra.mxu1 %v5010_v22  ;;  %v5217_v22 = vld [vmem:[#allocation4 + $0x200] sm:$0xf]  ;;  %v5828_v45 = vld [vmem:[#allocation4 + $0x2a4] sm:$0xf]  ;;  %v5427_v15 = vld [vmem:[#allocation4 + $0x3b0] sm:$0xf0] }
 0x19b   :  { %v5218_v57 = vor.u32 %v5810_v24, %v5217_v22  ;;  %v5860_v46 = vld [vmem:[#allocation4 + $0x3a4] sm:$0xf]  ;;  %v5155_v29 = vld [vmem:[#allocation4 + $0x190] sm:$0xf0] }
 0x19c   :  { %2922 = vmatpush.bf16.msra.mxu2 %v5138_v35  ;;  %2935 = vmatpush.bf16.msra.mxu3 %v5266_v37  ;;  %v5804_v35 = vld [vmem:[#allocation4 + $0x1e4] sm:$0xf]  ;;  %v5203_v37 = vld [vmem:[#allocation4 + $0x1f0] sm:$0xf0]  ;;  %v5430_v23 = vor.u32 %v5860_v46, %v5427_v15 }
 0x19d   :  { %2948 = vmatpush.bf16.msrb.mxu0 %v5394_v39  ;;  %v5836_v39 = vld [vmem:[#allocation4 + $0x2e4] sm:$0xf]  ;;  %v5011_v44 = vld [vmem:[#allocation4 + $0x70] sm:$0xf0] }
 0x19e   :  { %2910 = vmatpush.bf16.msra.mxu1 %v4994_v58  ;;  %v5206_v58 = vor.u32 %v5804_v35, %v5203_v37  ;;  %v5334_v61 = vor.u32 %v5836_v39, %v5331_v43  ;;  %v5792_v24 = vld [vmem:[#allocation4 + $0x184] sm:$0xf]  ;;  %v5411_v37 = vld [vmem:[#allocation4 + $0x390] sm:$0xf0]  ;;  %v5030_v39 = vor.u32 %v5760_v19, %v5027_v20 }
 0x19f   :  { %v5824_v30 = vld [vmem:[#allocation4 + $0x284] sm:$0xf]  ;;  %v5158_v43 = vor.u32 %v5792_v24, %v5155_v29  ;;  %v5235_v24 = vld [vmem:[#allocation4 + $0x230] sm:$0xf0] }
 0x1a0   :  { %2923 = vmatpush.bf16.msra.mxu2 %v5122_v0  ;;  %2936 = vmatpush.bf16.msra.mxu3 %v5250_v1  ;;  %v5315_v0 = vld [vmem:[#allocation4 + $0x2d0] sm:$0xf0]  ;;  %v5856_v35 = vld [vmem:[#allocation4 + $0x384] sm:$0xf] }
 0x1a1   :  { %2949 = vmatpush.bf16.msrb.mxu0 %v5378_v3  ;;  %v5443_v1 = vld [vmem:[#allocation4 + $0x3d0] sm:$0xf0]  ;;  %v5062_v3 = vor.u32 %v5768_v60, %v5059_v33  ;;  %v5318_v8 = vor.u32 %v5832_v63, %v5315_v0  ;;  %v5820_v60 = vld [vmem:[#allocation4 + $0x264] sm:$0xf] }
 0x1a2   :  { %2911 = vmatpush.bf16.msra.mxu1 %v4978_v7  ;;  %v431_v7 = vperm.slane %v6221_v13, 2  ;;  %v5446_v9 = vor.u32 %v5864_v36, %v5443_v1  ;;  %v5174_v13 = vor.u32 %v5796_v10, %v5171_v11  ;;  %v5267_v33 = vld [vmem:[#allocation4 + $0x270] sm:$0xf0]  ;;  %v5752_v63 = vld [vmem:[#allocation4 + $0x44] sm:$0xf] }
 0x1a3   :  { %v4995_v0 = vld [vmem:[#allocation4 + $0x50] sm:$0xf0]  ;;  %v5270_v36 = vor.u32 %v5820_v60, %v5267_v33  ;;  %v5848_v11 = vld [vmem:[#allocation4 + $0x344] sm:$0xf] }
 0x1a4   :  { %2924 = vmatpush.bf16.msra.mxu2 %v5106_v14  ;;  %2937 = vmatpush.bf16.msra.mxu3 %v5234_v16  ;;  %v5299_v14 = vld [vmem:[#allocation4 + $0x2b0] sm:$0xf0]  ;;  %v5046_v16 = vor.u32 %v5764_v51, %v5043_v6  ;;  %v5784_v51 = vld [vmem:[#allocation4 + $0x144] sm:$0xf] }
 0x1a5   :  { %2950 = vmatpush.bf16.msrb.mxu0 %v5362_v17  ;;  %v439_v17 = vmul.f32 %v431_v7, %v6138_v47  ;;  %v5302_v22 = vor.u32 %v5828_v45, %v5299_v14  ;;  %v5756_v47 = vld [vmem:[#allocation4 + $0x64] sm:$0xf]  ;;  %v5123_v6 = vld [vmem:[#allocation4 + $0x150] sm:$0xf0]  ;;  %v4998_v14 = vor.u32 %v5752_v63, %v4995_v0  ;;  %v5807_v63 = vld [vmem:[#allocation4 + $0x1f4] sm:$0xf0] }
 0x1a6   :  { %2912 = vmatpush.bf16.msra.mxu1 %v4962_v50  ;;  %v1938_v50 = vpop.f32.mrf.mxu1  ;;  %v5014_v62 = vor.u32 %v5756_v47, %v5011_v44  ;;  %v5816_v7 = vld [vmem:[#allocation4 + $0x244] sm:$0xf]  ;;  %v5251_v10 = vld [vmem:[#allocation4 + $0x250] sm:$0xf0]  ;;  %v5775_v47 = vld [vmem:[#allocation4 + $0xf4] sm:$0xf0] }
 0x1a7   :  { %v1939_v31 = vadd.f32 %v1938_v50, %v439_v17  ;;  %v5379_v45 = vld [vmem:[#allocation4 + $0x350] sm:$0xf0]  ;;  %v5254_v19 = vor.u32 %v5816_v7, %v5251_v10  ;;  %v5812_v50 = vld [vmem:[#allocation4 + $0x224] sm:$0xf]  ;;  %v5337_v0 = vld [vmem:[#allocation4 + $0x2e8] sm:$0xf] }
 0x1a8   :  { %2925 = vmatpush.bf16.msra.mxu2 %v5090_v40  ;;  %2938 = vmatpush.bf16.msra.mxu3 %v5218_v57  ;;  %v5414_v57 = vor.u32 %v5856_v35, %v5411_v37  ;;  %v4979_v17 = vld [vmem:[#allocation4 + $0x30] sm:$0xf0]  ;;  %v5382_v20 = vor.u32 %v5848_v11, %v5379_v45  ;;  %v5844_v29 = vld [vmem:[#allocation4 + $0x324] sm:$0xf]  ;;  %v5238_v44 = vor.u32 %v5812_v50, %v5235_v24  ;;  %v5771_v10 = vld [vmem:[#allocation4 + $0xd4] sm:$0xf0] }
 0x1a9   :  { %2951 = vmatpush.bf16.msrb.mxu0 %v5346_v28  ;;  %2913 = vmatmul.bf16.vlgmr.msra.gmra.mxu1 %v6145_v49  ;;  %v5788_v28 = vld [vmem:[#allocation4 + $0x164] sm:$0xf] }
 0x1aa   :  { %2957 = vmatpush.bf16.msrb.mxu1 %v5078_v32  ;;  %v5283_v32 = vld [vmem:[#allocation4 + $0x290] sm:$0xf0]  ;;  %v5744_v35 = vld [vmem:[#allocation4 + $0x4] sm:$0xf] }
 0x1ab   :  { %2926 = vmatmul.bf16.vlgmr.msra.gmra.mxu2 %v6149_v53  ;;  %2939 = vmatmul.bf16.vlgmr.msra.gmra.mxu3 %v6153_v54  ;;  %v1977_v40 = vpop.f32.mrf.mxu0  ;;  %v5286_v52 = vor.u32 %v5824_v30, %v5283_v32  ;;  %v5363_v30 = vld [vmem:[#allocation4 + $0x330] sm:$0xf0]  ;;  %v5808_v60 = vld [vmem:[#allocation4 + $0x204] sm:$0xf] }
 0x1ac   :  { %2970 = vmatpush.bf16.msrb.mxu2 %v5206_v58  ;;  %2983 = vmatpush.bf16.msrb.mxu3 %v5334_v61  ;;  %v5139_v58 = vld [vmem:[#allocation4 + $0x170] sm:$0xf0]  ;;  %v5852_v61 = vld [vmem:[#allocation4 + $0x364] sm:$0xf] }
 0x1ad   :  { %2996 = vmatpush.bf16.msra.mxu0 %v5462_v34  ;;  %v5395_v34 = vld [vmem:[#allocation4 + $0x370] sm:$0xf0]  ;;  %v5142_v25 = vor.u32 %v5788_v28, %v5139_v58  ;;  %v5776_v28 = vld [vmem:[#allocation4 + $0x104] sm:$0xf] }
 0x1ae   :  { %2952 = vmatmul.bf16.vlgmr.msrb.gmra.mxu0 %v6157_v55  ;;  %2958 = vmatpush.bf16.msrb.mxu1 %v5062_v3  ;;  %v5398_v1 = vor.u32 %v5852_v61, %v5395_v34  ;;  %v1940_v3 = vpop.f32.mrf.mxu1  ;;  %v5091_v58 = vld [vmem:[#allocation4 + $0x110] sm:$0xf0] }
 0x1af   :  { %v5219_v61 = vld [vmem:[#allocation4 + $0x210] sm:$0xf0]  ;;  %v5839_v3 = vld [vmem:[#allocation4 + $0x2f4] sm:$0xf0] }
 0x1b0   :  { %2971 = vmatpush.bf16.msrb.mxu2 %v5190_v5  ;;  %2984 = vmatpush.bf16.msrb.mxu3 %v5318_v8  ;;  %v1951_v5 = vpop.f32.mrf.mxu2  ;;  %v5347_v34 = vld [vmem:[#allocation4 + $0x310] sm:$0xf0]  ;;  %v5338_v11 = vor.u32 %v5839_v3, %v5337_v0 }
 0x1b1   :  { %2997 = vmatpush.bf16.msra.mxu0 %v5446_v9  ;;  %v1952_v8 = vadd.f32 %v1951_v5, %v1939_v31  ;;  %v1964_v9 = vpop.f32.mrf.mxu3  ;;  %v5465_v5 = vld [vmem:[#allocation4 + $0x3e8] sm:$0xf] }
 0x1b2   :  { %2959 = vmatpush.bf16.msrb.mxu1 %v5046_v16  ;;  %v5126_v16 = vor.u32 %v5784_v51, %v5123_v6  ;;  %v5871_v51 = vld [vmem:[#allocation4 + $0x3f4] sm:$0xf0]  ;;  %v5222_v6 = vor.u32 %v5808_v60, %v5219_v61  ;;  %v5161_v60 = vld [vmem:[#allocation4 + $0x188] sm:$0xf] }
 0x1b3   :  { %v1965_v46 = vadd.f32 %v1964_v9, %v1952_v8  ;;  %v1979_v15 = vpop.f32.mrf.mxu0  ;;  %v5065_v9 = vld [vmem:[#allocation4 + $0xc8] sm:$0xf]  ;;  %v5466_v45 = vor.u32 %v5871_v51, %v5465_v5 }
 0x1b4   :  { %2972 = vmatpush.bf16.msrb.mxu2 %v5174_v13  ;;  %2985 = vmatpush.bf16.msrb.mxu3 %v5302_v22  ;;  %v5748_v13 = vld [vmem:[#allocation4 + $0x24] sm:$0xf]  ;;  %v5321_v15 = vld [vmem:[#allocation4 + $0x2c8] sm:$0xf] }
 0x1b5   :  { %2998 = vmatpush.bf16.msra.mxu0 %v5430_v23  ;;  %v5780_v22 = vld [vmem:[#allocation4 + $0x124] sm:$0xf]  ;;  %v5107_v23 = vld [vmem:[#allocation4 + $0x130] sm:$0xf0]  ;;  %v6241_v31 = vadd.f32 %v1977_v40, %v1965_v46  ;;  %v4982_v32 = vor.u32 %v5748_v13, %v4979_v17  ;;  %v5803_v46 = vld [vmem:[#allocation4 + $0x1d4] sm:$0xf0] }
 0x1b6   :  { %2960 = vmatpush.bf16.msrb.mxu1 %v5030_v39  ;;  %v5110_v37 = vor.u32 %v5780_v22, %v5107_v23  ;;  %v4963_v39 = vld [vmem:[#allocation4 + $0x10] sm:$0xf0]  ;;  %v5840_v40 = vld [vmem:[#allocation4 + $0x304] sm:$0xf]  ;;  %v5449_v13 = vld [vmem:[#allocation4 + $0x3c8] sm:$0xf] }
 0x1b7   :  { %v5350_v7 = vor.u32 %v5840_v40, %v5347_v34  ;;  %v5867_v17 = vld [vmem:[#allocation4 + $0x3d4] sm:$0xf0]  ;;  %v5049_v22 = vld [vmem:[#allocation4 + $0xa8] sm:$0xf] }
 0x1b8   :  { %2973 = vmatpush.bf16.msrb.mxu2 %v5158_v43  ;;  %2986 = vmatpush.bf16.msrb.mxu3 %v5286_v52  ;;  %v5081_v43 = vld [vmem:[#allocation4 + $0xe8] sm:$0xf]  ;;  %v5366_v52 = vor.u32 %v5844_v29, %v5363_v30  ;;  %v5767_v23 = vld [vmem:[#allocation4 + $0xb4] sm:$0xf0]  ;;  %v5450_v24 = vor.u32 %v5867_v17, %v5449_v13 }
 0x1b9   :  { %2999 = vmatpush.bf16.msra.mxu0 %v5414_v57  ;;  %v1953_v57 = vpop.f32.mrf.mxu2  ;;  %v1966_v33 = vpop.f32.mrf.mxu3  ;;  %v5177_v29 = vld [vmem:[#allocation4 + $0x1a8] sm:$0xf]  ;;  %v5799_v30 = vld [vmem:[#allocation4 + $0x1b4] sm:$0xf0] }
 0x1ba   :  { %2961 = vmatpush.bf16.msrb.mxu1 %v5014_v62  ;;  %v4966_v62 = vor.u32 %v5744_v35, %v4963_v39  ;;  %v5831_v35 = vld [vmem:[#allocation4 + $0x2b4] sm:$0xf0]  ;;  %v5289_v61 = vld [vmem:[#allocation4 + $0x288] sm:$0xf] }
 0x1bb   :  { %v5863_v39 = vld [vmem:[#allocation4 + $0x3b4] sm:$0xf0]  ;;  %v5129_v17 = vld [vmem:[#allocation4 + $0x148] sm:$0xf] }
 0x1bc   :  { %2974 = vmatpush.bf16.msrb.mxu2 %v5142_v25  ;;  %2987 = vmatpush.bf16.msrb.mxu3 %v5270_v36  ;;  %v5209_v25 = vld [vmem:[#allocation4 + $0x1e8] sm:$0xf]  ;;  %v5082_v36 = vor.u32 %v5775_v47, %v5081_v43  ;;  %v5050_v43 = vor.u32 %v5767_v23, %v5049_v22  ;;  %v5178_v47 = vor.u32 %v5799_v30, %v5177_v29  ;;  %v5795_v33 = vld [vmem:[#allocation4 + $0x194] sm:$0xf0] }
 0x1bd   :  { %3000 = vmatpush.bf16.msra.mxu0 %v5398_v1  ;;  %v5094_v1 = vor.u32 %v5776_v28, %v5091_v58  ;;  %v5210_v8 = vor.u32 %v5807_v63, %v5209_v25  ;;  %v5827_v34 = vld [vmem:[#allocation4 + $0x294] sm:$0xf0]  ;;  %v5162_v0 = vor.u32 %v5795_v33, %v5161_v60  ;;  %v5385_v29 = vld [vmem:[#allocation4 + $0x348] sm:$0xf] }
 0x1be   :  { %2962 = vmatpush.bf16.msrb.mxu1 %v4998_v14  ;;  %v5193_v14 = vld [vmem:[#allocation4 + $0x1c8] sm:$0xf]  ;;  %v5859_v25 = vld [vmem:[#allocation4 + $0x394] sm:$0xf0]  ;;  %v5290_v5 = vor.u32 %v5827_v34, %v5289_v61 }
 0x1bf   :  { %v5851_v30 = vld [vmem:[#allocation4 + $0x354] sm:$0xf0]  ;;  %v5369_v61 = vld [vmem:[#allocation4 + $0x328] sm:$0xf] }
 0x1c0   :  { %2975 = vmatpush.bf16.msrb.mxu2 %v5126_v16  ;;  %2988 = vmatpush.bf16.msrb.mxu3 %v5254_v19  ;;  %v5835_v16 = vld [vmem:[#allocation4 + $0x2d4] sm:$0xf0]  ;;  %v5066_v19 = vor.u32 %v5771_v10, %v5065_v9  ;;  %v5401_v10 = vld [vmem:[#allocation4 + $0x368] sm:$0xf] }
 0x1c1   :  { %3001 = vmatpush.bf16.msra.mxu0 %v5382_v20  ;;  %v5194_v20 = vor.u32 %v5803_v46, %v5193_v14  ;;  %v5322_v50 = vor.u32 %v5835_v16, %v5321_v15  ;;  %v5823_v9 = vld [vmem:[#allocation4 + $0x274] sm:$0xf0]  ;;  %v5001_v14 = vld [vmem:[#allocation4 + $0x48] sm:$0xf] }
 0x1c2   :  { %2963 = vmatpush.bf16.msrb.mxu1 %v4982_v32  ;;  %v5305_v32 = vld [vmem:[#allocation4 + $0x2a8] sm:$0xf]  ;;  %v5755_v46 = vld [vmem:[#allocation4 + $0x54] sm:$0xf0] }
 0x1c3   :  { %v5306_v57 = vor.u32 %v5831_v35, %v5305_v32  ;;  %v5002_v32 = vor.u32 %v5755_v46, %v5001_v14  ;;  %v5815_v33 = vld [vmem:[#allocation4 + $0x234] sm:$0xf0]  ;;  %v5211_v14 = vld [vmem:[#allocation4 + $0x1f8] sm:$0xf0]  ;;  %v5837_v46 = vld [vmem:[#allocation4 + $0x2ec] sm:$0xf] }
 0x1c4   :  { %2976 = vmatpush.bf16.msrb.mxu2 %v5110_v37  ;;  %2989 = vmatpush.bf16.msrb.mxu3 %v5238_v44  ;;  %v5433_v37 = vld [vmem:[#allocation4 + $0x3a8] sm:$0xf] }
 0x1c5   :  { %3002 = vmatpush.bf16.msra.mxu0 %v5366_v52  ;;  %v5033_v44 = vld [vmem:[#allocation4 + $0x88] sm:$0xf]  ;;  %v5763_v52 = vld [vmem:[#allocation4 + $0x94] sm:$0xf0]  ;;  %v5434_v28 = vor.u32 %v5863_v39, %v5433_v37 }
 0x1c6   :  { %2964 = vmatpush.bf16.msrb.mxu1 %v4966_v62  ;;  %v1990_v58 = vpop.f32.mrf.mxu1  ;;  %v5417_v62 = vld [vmem:[#allocation4 + $0x388] sm:$0xf]  ;;  %v5034_v63 = vor.u32 %v5763_v52, %v5033_v44  ;;  %v5386_v52 = vor.u32 %v5851_v30, %v5385_v29 }
 0x1c7   :  { %v1991_v40 = vadd.f32 %v1990_v58, %v6241_v31  ;;  %v5418_v51 = vor.u32 %v5859_v25, %v5417_v62  ;;  %v5855_v31 = vld [vmem:[#allocation4 + $0x374] sm:$0xf0]  ;;  %v4985_v39 = vld [vmem:[#allocation4 + $0x28] sm:$0xf] }
 0x1c8   :  { %2977 = vmatpush.bf16.msrb.mxu2 %v5094_v1  ;;  %2990 = vmatpush.bf16.msrb.mxu3 %v5222_v6  ;;  %v5759_v1 = vld [vmem:[#allocation4 + $0x74] sm:$0xf0]  ;;  %v5145_v6 = vld [vmem:[#allocation4 + $0x168] sm:$0xf]  ;;  %v5402_v16 = vor.u32 %v5855_v31, %v5401_v10 }
 0x1c9   :  { %3003 = vmatpush.bf16.msra.mxu0 %v5350_v7  ;;  %2965 = vmatmul.bf16.vlgmr.msrb.gmra.mxu1 %v6145_v49  ;;  %v5791_v7 = vld [vmem:[#allocation4 + $0x174] sm:$0xf0]  ;;  %v5241_v58 = vld [vmem:[#allocation4 + $0x228] sm:$0xf] }
 0x1ca   :  { %3009 = vmatpush.bf16.msra.mxu1 %v5082_v36  ;;  %v5017_v36 = vld [vmem:[#allocation4 + $0x68] sm:$0xf]  ;;  %v5843_v10 = vld [vmem:[#allocation4 + $0x314] sm:$0xf0] }
 0x1cb   :  { %2978 = vmatmul.bf16.vlgmr.msrb.gmra.mxu2 %v6149_v53  ;;  %2991 = vmatmul.bf16.vlgmr.msrb.gmra.mxu3 %v6153_v54  ;;  %v2029_v3 = vpop.f32.mrf.mxu0  ;;  %v4969_v62 = vld [vmem:[#allocation4 + $0x8] sm:$0xf] }
 0x1cc   :  { %3022 = vmatpush.bf16.msra.mxu2 %v5210_v8  ;;  %3035 = vmatpush.bf16.msra.mxu3 %v5338_v11  ;;  %v5273_v8 = vld [vmem:[#allocation4 + $0x268] sm:$0xf]  ;;  %v5018_v11 = vor.u32 %v5759_v1, %v5017_v36  ;;  %v5083_v36 = vld [vmem:[#allocation4 + $0xf8] sm:$0xf0]  ;;  %v5242_v1 = vor.u32 %v5815_v33, %v5241_v58 }
 0x1cd   :  { %3048 = vmatpush.bf16.msrb.mxu0 %v5466_v45  ;;  %v5146_v45 = vor.u32 %v5791_v7, %v5145_v6  ;;  %v5274_v15 = vor.u32 %v5823_v9, %v5273_v8  ;;  %v5779_v6 = vld [vmem:[#allocation4 + $0x114] sm:$0xf0]  ;;  %v5225_v7 = vld [vmem:[#allocation4 + $0x208] sm:$0xf] }
 0x1ce   :  { %3004 = vmatmul.bf16.vlgmr.msra.gmra.mxu0 %v6157_v55  ;;  %3010 = vmatpush.bf16.msra.mxu1 %v5066_v19  ;;  %v2003_v13 = vpop.f32.mrf.mxu2  ;;  %v5787_v19 = vld [vmem:[#allocation4 + $0x154] sm:$0xf0]  ;;  %v1992_v22 = vpop.f32.mrf.mxu1  ;;  %v5353_v9 = vld [vmem:[#allocation4 + $0x308] sm:$0xf] }
 0x1cf   :  { %v2004_v23 = vadd.f32 %v2003_v13, %v1991_v40  ;;  %v5130_v37 = vor.u32 %v5787_v19, %v5129_v17  ;;  %v5847_v40 = vld [vmem:[#allocation4 + $0x334] sm:$0xf0]  ;;  %v5339_v13 = vld [vmem:[#allocation4 + $0x2f8] sm:$0xf0]  ;;  %v5869_v17 = vld [vmem:[#allocation4 + $0x3ec] sm:$0xf]  ;;  %v5354_v22 = vor.u32 %v5843_v10, %v5353_v9 }
 0x1d0   :  { %3023 = vmatpush.bf16.msra.mxu2 %v5194_v20  ;;  %3036 = vmatpush.bf16.msra.mxu3 %v5322_v50  ;;  %v5257_v20 = vld [vmem:[#allocation4 + $0x248] sm:$0xf]  ;;  %v2016_v50 = vpop.f32.mrf.mxu3  ;;  %v5811_v8 = vld [vmem:[#allocation4 + $0x214] sm:$0xf0]  ;;  %v5467_v19 = vld [vmem:[#allocation4 + $0x3f8] sm:$0xf0]  ;;  %v5342_v29 = vor.u32 %v5837_v46, %v5339_v13 }
 0x1d1   :  { %3049 = vmatpush.bf16.msrb.mxu0 %v5450_v24  ;;  %v5819_v24 = vld [vmem:[#allocation4 + $0x254] sm:$0xf0]  ;;  %v2017_v35 = vadd.f32 %v2016_v50, %v2004_v23  ;;  %v5769_v50 = vld [vmem:[#allocation4 + $0xcc] sm:$0xf]  ;;  %v5470_v30 = vor.u32 %v5869_v17, %v5467_v19  ;;  %v5163_v10 = vld [vmem:[#allocation4 + $0x198] sm:$0xf0] }
 0x1d2   :  { %3011 = vmatpush.bf16.msra.mxu1 %v5050_v43  ;;  %v5751_v43 = vld [vmem:[#allocation4 + $0x34] sm:$0xf0]  ;;  %v5258_v44 = vor.u32 %v5819_v24, %v5257_v20  ;;  %v5226_v20 = vor.u32 %v5811_v8, %v5225_v7  ;;  %v5067_v24 = vld [vmem:[#allocation4 + $0xd8] sm:$0xf0]  ;;  %v5793_v9 = vld [vmem:[#allocation4 + $0x18c] sm:$0xf] }
 0x1d3   :  { %v6248_v60 = vadd.f32 %v2029_v3, %v2017_v35  ;;  %v4986_v34 = vor.u32 %v5751_v43, %v4985_v39  ;;  %v5195_v35 = vld [vmem:[#allocation4 + $0x1d8] sm:$0xf0]  ;;  %v5865_v43 = vld [vmem:[#allocation4 + $0x3cc] sm:$0xf] }
 0x1d4   :  { %3024 = vmatpush.bf16.msra.mxu2 %v5178_v47  ;;  %3037 = vmatpush.bf16.msra.mxu3 %v5306_v57  ;;  %v2031_v47 = vpop.f32.mrf.mxu0  ;;  %v5113_v57 = vld [vmem:[#allocation4 + $0x128] sm:$0xf]  ;;  %v5323_v39 = vld [vmem:[#allocation4 + $0x2d8] sm:$0xf0]  ;;  %v5757_v13 = vld [vmem:[#allocation4 + $0x6c] sm:$0xf] }
 0x1d5   :  { %3050 = vmatpush.bf16.msrb.mxu0 %v5434_v28  ;;  %v5783_v28 = vld [vmem:[#allocation4 + $0x134] sm:$0xf0]  ;;  %v5451_v47 = vld [vmem:[#allocation4 + $0x3d8] sm:$0xf0] }
 0x1d6   :  { %3012 = vmatpush.bf16.msra.mxu1 %v5034_v63  ;;  %v5114_v25 = vor.u32 %v5783_v28, %v5113_v57  ;;  %v5747_v63 = vld [vmem:[#allocation4 + $0x14] sm:$0xf0]  ;;  %v2005_v3 = vpop.f32.mrf.mxu2  ;;  %v5765_v57 = vld [vmem:[#allocation4 + $0xac] sm:$0xf]  ;;  %v5051_v28 = vld [vmem:[#allocation4 + $0xb8] sm:$0xf0]  ;;  %v5454_v33 = vor.u32 %v5865_v43, %v5451_v47 }
 0x1d7   :  { %v5019_v17 = vld [vmem:[#allocation4 + $0x78] sm:$0xf0]  ;;  %v5753_v43 = vld [vmem:[#allocation4 + $0x4c] sm:$0xf] }
 0x1d8   :  { %3025 = vmatpush.bf16.msra.mxu2 %v5162_v0  ;;  %3038 = vmatpush.bf16.msra.mxu3 %v5290_v5  ;;  %v5773_v0 = vld [vmem:[#allocation4 + $0xec] sm:$0xf]  ;;  %v5370_v5 = vor.u32 %v5847_v40, %v5369_v61  ;;  %v2018_v31 = vpop.f32.mrf.mxu3  ;;  %v5179_v40 = vld [vmem:[#allocation4 + $0x1b8] sm:$0xf0] }
 0x1d9   :  { %3051 = vmatpush.bf16.msrb.mxu0 %v5418_v51  ;;  %v5097_v51 = vld [vmem:[#allocation4 + $0x108] sm:$0xf]  ;;  %v5797_v61 = vld [vmem:[#allocation4 + $0x1ac] sm:$0xf]  ;;  %v5003_v47 = vld [vmem:[#allocation4 + $0x58] sm:$0xf0] }
 0x1da   :  { %3013 = vmatpush.bf16.msra.mxu1 %v5018_v11  ;;  %v4970_v11 = vor.u32 %v5747_v63, %v4969_v62  ;;  %v5307_v62 = vld [vmem:[#allocation4 + $0x2b8] sm:$0xf0]  ;;  %v5825_v31 = vld [vmem:[#allocation4 + $0x28c] sm:$0xf] }
 0x1db   :  { %v5435_v63 = vld [vmem:[#allocation4 + $0x3b8] sm:$0xf0] }
 0x1dc   :  { %3026 = vmatpush.bf16.msra.mxu2 %v5146_v45  ;;  %3039 = vmatpush.bf16.msra.mxu3 %v5274_v15  ;;  %v5805_v45 = vld [vmem:[#allocation4 + $0x1ec] sm:$0xf]  ;;  %v5086_v15 = vor.u32 %v5773_v0, %v5083_v36  ;;  %v5054_v0 = vor.u32 %v5765_v57, %v5051_v28  ;;  %v6257_v36 = vld [vmem:[%s6895_s8] sm:$0xf] }
 0x1dd   :  { %3052 = vmatpush.bf16.msrb.mxu0 %v5402_v16  ;;  %v5098_v16 = vor.u32 %v5779_v6, %v5097_v51  ;;  %v5214_v23 = vor.u32 %v5805_v45, %v5211_v14  ;;  %v5761_v51 = vld [vmem:[#allocation4 + $0x8c] sm:$0xf]  ;;  %v5035_v6 = vld [vmem:[#allocation4 + $0x98] sm:$0xf0] }
 0x1de   :  { %3014 = vmatpush.bf16.msra.mxu1 %v5002_v32  ;;  %v5801_v32 = vld [vmem:[#allocation4 + $0x1cc] sm:$0xf]  ;;  %v5419_v14 = vld [vmem:[#allocation4 + $0x398] sm:$0xf0]  ;;  %v5038_v46 = vor.u32 %v5761_v51, %v5035_v6 }
 0x1df   :  { %v5857_v45 = vld [vmem:[#allocation4 + $0x38c] sm:$0xf] }
 0x1e0   :  { %3027 = vmatpush.bf16.msra.mxu2 %v5130_v37  ;;  %3040 = vmatpush.bf16.msra.mxu3 %v5258_v44  ;;  %v5833_v37 = vld [vmem:[#allocation4 + $0x2cc] sm:$0xf]  ;;  %v5070_v44 = vor.u32 %v5769_v50, %v5067_v24  ;;  %v5147_v50 = vld [vmem:[#allocation4 + $0x178] sm:$0xf0] }
 0x1e1   :  { %3053 = vmatpush.bf16.msrb.mxu0 %v5386_v52  ;;  %v5198_v52 = vor.u32 %v5801_v32, %v5195_v35  ;;  %v5326_v58 = vor.u32 %v5833_v37, %v5323_v39  ;;  %v5821_v24 = vld [vmem:[#allocation4 + $0x26c] sm:$0xf]  ;;  %v5403_v32 = vld [vmem:[#allocation4 + $0x378] sm:$0xf0]  ;;  %v5022_v37 = vor.u32 %v5757_v13, %v5019_v17 }
 0x1e2   :  { %3015 = vmatpush.bf16.msra.mxu1 %v4986_v34  ;;  %v5829_v34 = vld [vmem:[#allocation4 + $0x2ac] sm:$0xf] }
 0x1e3   :  { %v5310_v7 = vor.u32 %v5829_v34, %v5307_v62  ;;  %v5849_v34 = vld [vmem:[#allocation4 + $0x34c] sm:$0xf]  ;;  %v5387_v62 = vld [vmem:[#allocation4 + $0x358] sm:$0xf0] }
 0x1e4   :  { %3028 = vmatpush.bf16.msra.mxu2 %v5114_v25  ;;  %3041 = vmatpush.bf16.msra.mxu3 %v5242_v1  ;;  %v5861_v25 = vld [vmem:[#allocation4 + $0x3ac] sm:$0xf]  ;;  %v429_v1 = vperm.slane %v6257_v36, 0  ;;  %v5390_v6 = vor.u32 %v5849_v34, %v5387_v62 }
 0x1e5   :  { %3054 = vmatpush.bf16.msrb.mxu0 %v5370_v5  ;;  %v5182_v5 = vor.u32 %v5797_v61, %v5179_v40  ;;  %v5438_v3 = vor.u32 %v5861_v25, %v5435_v63  ;;  %v5817_v61 = vld [vmem:[#allocation4 + $0x24c] sm:$0xf]  ;;  %v5006_v25 = vor.u32 %v5753_v43, %v5003_v47  ;;  %v6279_v43 = vld [vmem:[%s6899_s12 + $0x78] sm:$0xff] }
 0x1e6   :  { %3016 = vmatpush.bf16.msra.mxu1 %v4970_v11  ;;  %v6260_v8 = vpop.f32.mrf.mxu1  ;;  %v5291_v11 = vld [vmem:[#allocation4 + $0x298] sm:$0xf0]  ;;  %v437_v19 = vmul.f32 %v429_v1, %v6132_v38 }
 0x1e7   :  { %v4987_v1 = vld [vmem:[#allocation4 + $0x38] sm:$0xf0] }
 0x1e8   :  { %3029 = vmatpush.bf16.msra.mxu2 %v5098_v16  ;;  %3042 = vmatpush.bf16.msra.mxu3 %v5226_v20  ;;  %v5166_v16 = vor.u32 %v5793_v9, %v5163_v10  ;;  %v5294_v20 = vor.u32 %v5825_v31, %v5291_v11  ;;  %v1731_v35 = vadd.f32 %v6197_v59, %v437_v19  ;;  %v5259_v59 = vld [vmem:[#allocation4 + $0x258] sm:$0xf0]  ;;  %v5813_v9 = vld [vmem:[#allocation4 + $0x22c] sm:$0xf] }
 0x1e9   :  { %3055 = vmatpush.bf16.msrb.mxu0 %v5354_v22  ;;  %3017 = vmatmul.bf16.vlgmr.msra.gmra.mxu1 %v6145_v49  ;;  %v5422_v22 = vor.u32 %v5857_v45, %v5419_v14  ;;  %v5262_v51 = vor.u32 %v5817_v61, %v5259_v59  ;;  %v5243_v10 = vld [vmem:[#allocation4 + $0x238] sm:$0xf0]  ;;  %v5845_v31 = vld [vmem:[#allocation4 + $0x32c] sm:$0xf] }
 0x1ea   :  { %3061 = vmatpush.bf16.msrb.mxu1 %v5086_v15  ;;  %v1744_v38 = vadd.f32 %v6203_v21, %v1731_v35  ;;  %v5371_v11 = vld [vmem:[#allocation4 + $0x338] sm:$0xf0] }
 0x1eb   :  { %3030 = vmatmul.bf16.vlgmr.msra.gmra.mxu2 %v6149_v53  ;;  %3043 = vmatmul.bf16.vlgmr.msra.gmra.mxu3 %v6153_v54  ;;  %v6262_v15 = vpop.f32.mrf.mxu0  ;;  %v5374_v17 = vor.u32 %v5845_v31, %v5371_v11  ;;  %v6369_v59 = vld [vmem:[%s6899_s12 + $0xe0] sm:$0xff]  ;;  %v6432_v11 = vld [vmem:[%s6899_s12 + $0x150] sm:$0xff] }
 0x1ec   :  { %3074 = vmatpush.bf16.msrb.mxu2 %v5214_v23  ;;  %3087 = vmatpush.bf16.msrb.mxu3 %v5342_v29  ;;  %v5789_v23 = vld [vmem:[#allocation4 + $0x16c] sm:$0xf]  ;;  %v5275_v29 = vld [vmem:[#allocation4 + $0x278] sm:$0xf0] }
 0x1ed   :  { %3100 = vmatpush.bf16.msra.mxu0 %v5470_v30  ;;  %v5853_v30 = vld [vmem:[#allocation4 + $0x36c] sm:$0xf]  ;;  %v5150_v39 = vor.u32 %v5789_v23, %v5147_v50 }
 0x1ee   :  { %3056 = vmatmul.bf16.vlgmr.msrb.gmra.mxu0 %v6157_v55  ;;  %3062 = vmatpush.bf16.msrb.mxu1 %v5070_v44  ;;  %v5278_v44 = vor.u32 %v5821_v24, %v5275_v29  ;;  %v2044_v57 = vpop.f32.mrf.mxu1  ;;  %v6267_v28 = vpop.f32.mrf.mxu2  ;;  %v5809_v23 = vld [vmem:[#allocation4 + $0x20c] sm:$0xf]  ;;  %v5227_v24 = vld [vmem:[#allocation4 + $0x218] sm:$0xf0] }
 0x1ef   :  { %v6269_v40 = vpop.f32.mrf.mxu3  ;;  %v5841_v29 = vld [vmem:[#allocation4 + $0x30c] sm:$0xf]  ;;  %v5230_v47 = vor.u32 %v5809_v23, %v5227_v24  ;;  %v6480_v24 = vld [vmem:[%s6899_s12 + $0x140] sm:$0xff] }
 0x1f0   :  { %3075 = vmatpush.bf16.msrb.mxu2 %v5198_v52  ;;  %3088 = vmatpush.bf16.msrb.mxu3 %v5326_v58  ;;  %v5406_v52 = vor.u32 %v5853_v30, %v5403_v32  ;;  %v5785_v58 = vld [vmem:[#allocation4 + $0x14c] sm:$0xf]  ;;  %v5355_v30 = vld [vmem:[#allocation4 + $0x318] sm:$0xf0] }
 0x1f1   :  { %3101 = vmatpush.bf16.msra.mxu0 %v5454_v33  ;;  %v5131_v33 = vld [vmem:[#allocation4 + $0x158] sm:$0xf0] }
 0x1f2   :  { %3063 = vmatpush.bf16.msrb.mxu1 %v5054_v0  ;;  %v5134_v21 = vor.u32 %v5785_v58, %v5131_v33  ;;  %v5749_v0 = vld [vmem:[#allocation4 + $0x2c] sm:$0xf] }
 0x1f3   :  { %v2083_v63 = vpop.f32.mrf.mxu0  ;;  %v4990_v45 = vor.u32 %v5749_v0, %v4987_v1  ;;  %v6317_v58 = vld [vmem:[%s6899_s12 + $0xf0] sm:$0xff]  ;;  %v6396_v0 = vld [vmem:[%s6899_s12 + $0xd8] sm:$0xff] }
 0x1f4   :  { %3076 = vmatpush.bf16.msrb.mxu2 %v5182_v5  ;;  %3089 = vmatpush.bf16.msrb.mxu3 %v5310_v7  ;;  %v1757_v5 = vadd.f32 %v6205_v27, %v1744_v38  ;;  %v5781_v7 = vld [vmem:[#allocation4 + $0x12c] sm:$0xf]  ;;  %v5246_v27 = vor.u32 %v5813_v9, %v5243_v10  ;;  %v5358_v38 = vor.u32 %v5841_v29, %v5355_v30  ;;  %v6382_v63 = vld [vmem:[%s6899_s12 + $0x1e0] sm:$0xff]  ;;  %v6403_v1 = vld [vmem:[%s6899_s12 + $0x158] sm:$0xff]  ;;  %v3162_v10 = vsel %vm3119_vm0, %v6248_v60, 0.0 }
 0x1f5   :  { %3102 = vmatpush.bf16.msra.mxu0 %v5438_v3  ;;  %v5115_v3 = vld [vmem:[#allocation4 + $0x138] sm:$0xf0]  ;;  %v6330_v33 = vld [vmem:[%s6899_s12 + $0x1f0] sm:$0xff] }
 0x1f6   :  { %3064 = vmatpush.bf16.msrb.mxu1 %v5038_v46  ;;  %v5118_v14 = vor.u32 %v5781_v7, %v5115_v3  ;;  %v5745_v46 = vld [vmem:[#allocation4 + $0xc] sm:$0xf]  ;;  %v1770_v13 = vadd.f32 %v6201_v2, %v1757_v5  ;;  %v2057_v19 = vpop.f32.mrf.mxu2  ;;  %v6408_v5 = vld [vmem:[%s6899_s12 + $0x1d8] sm:$0xff]  ;;  %v6417_v7 = vld [vmem:[%s6899_s12 + $0x48] sm:$0xff] }
 0x1f7   :  { %v2070_v50 = vpop.f32.mrf.mxu3  ;;  %v6422_v3 = vld [vmem:[%s6899_s12 + $0xd0] sm:$0xff]  ;;  %v6468_v19 = vld [vmem:[%s6899_s12 + $0x38] sm:$0xff]  ;;  %v6485_v29 = vld [vmem:[%s6899_s12 + $0x1c0] sm:$0xff] }
 0x1f8   :  { %3077 = vmatpush.bf16.msrb.mxu2 %v5166_v16  ;;  %3090 = vmatpush.bf16.msrb.mxu3 %v5294_v20  ;;  %v4971_v16 = vld [vmem:[#allocation4 + $0x18] sm:$0xf0]  ;;  %v5777_v20 = vld [vmem:[#allocation4 + $0x10c] sm:$0xf]  ;;  %v1783_v32 = vadd.f32 %v6207_v4, %v1770_v13  ;;  %v6284_v4 = vld [vmem:[%s6899_s12 + $0xf8] sm:$0xff] }
 0x1f9   :  { %3103 = vmatpush.bf16.msra.mxu0 %v5422_v22  ;;  %v5099_v22 = vld [vmem:[#allocation4 + $0x118] sm:$0xf0]  ;;  %v4974_v35 = vor.u32 %v5745_v46, %v4971_v16  ;;  %v6456_v13 = vld [vmem:[%s6899_s12 + $0x148] sm:$0xff] }
 0x1fa   :  { %3065 = vmatpush.bf16.msrb.mxu1 %v5022_v37  ;;  %v432_v37 = vperm.slane %v6257_v36, 3  ;;  %v5102_v2 = vor.u32 %v5777_v20, %v5099_v22  ;;  %v6473_v20 = vld [vmem:[%s6899_s12 + $0xc0] sm:$0xff] }
 0x1fc   :  { %3078 = vmatpush.bf16.msrb.mxu2 %v5150_v39  ;;  %3091 = vmatpush.bf16.msrb.mxu3 %v5278_v44  ;;  %v1796_v39 = vadd.f32 %v6211_v41, %v1783_v32  ;;  %v440_v36 = vmul.f32 %v432_v37, %v6141_v48  ;;  %v6291_v41 = vld [vmem:[%s6899_s12 + $0x70] sm:$0xff]  ;;  %v6296_v44 = vld [vmem:[%s6899_s12 + $0x178] sm:$0xff] }
 0x1fd   :  { %3104 = vmatpush.bf16.msra.mxu0 %v5406_v52  ;;  %v6302_v48 = vld [vmem:[%s6899_s12 + $0x1f8] sm:$0xff] }
 0x1fe   :  { %3066 = vmatpush.bf16.msrb.mxu1 %v5006_v25  ;;  %v1809_v52 = vadd.f32 %v6213_v56, %v1796_v39  ;;  %v2043_v57 = vadd.f32 %v6260_v8, %v440_v36  ;;  %v6312_v56 = vld [vmem:[%s6899_s12 + $0x68] sm:$0xff]  ;;  %v6377_v25 = vld [vmem:[%s6899_s12 + $0x160] sm:$0xff]  ;;  %v6497_v37 = vld [vmem:[%s6899_s12 + $0xb8] sm:$0xff] }
 0x1ff   :  { %v6504_v39 = vld [vmem:[%s6899_s12 + $0x138] sm:$0xff] }
 0x200   :  { %3079 = vmatpush.bf16.msrb.mxu2 %v5134_v21  ;;  %3092 = vmatpush.bf16.msrb.mxu3 %v5262_v51  ;;  %v2056_v8 = vadd.f32 %v6267_v28, %v2043_v57  ;;  %v6333_v61 = vadd.f32 %v6209_v12, %v1809_v52  ;;  %v6345_v28 = vld [vmem:[%s6899_s12 + $0xe8] sm:$0xff]  ;;  %v6364_v12 = vld [vmem:[%s6899_s12 + $0x58] sm:$0xff] }
 0x201   :  { %3105 = vmatpush.bf16.msra.mxu0 %v5390_v6  ;;  %v3155_v6 = vsel %vm3119_vm0, %v6233_v42, 0.0  ;;  %v6516_v57 = vld [vmem:[%s6899_s12 + $0x28] sm:$0xff] }
 0x202   :  { %3067 = vmatpush.bf16.msrb.mxu1 %v4990_v45  ;;  %v2069_v62 = vadd.f32 %v6269_v40, %v2056_v8  ;;  %v3148_v21 = vsel %vm3119_vm0, %v6333_v61, 0.0  ;;  %v6391_v40 = vld [vmem:[%s6899_s12 + $0x50] sm:$0xff]  ;;  %v3156_v46 = vrot.slane %v3155_v6, 4 }
 0x203   :  { %v3149_v9 = vrot.slane %v3148_v21, 4  ;;  %v6437_v45 = vld [vmem:[%s6899_s12 + $0x1d0] sm:$0xff] }
 0x204   :  { %3080 = vmatpush.bf16.msrb.mxu2 %v5118_v14  ;;  %3093 = vmatpush.bf16.msrb.mxu3 %v5246_v27  ;;  %v2082_v31 = vadd.f32 %v6262_v15, %v2069_v62  ;;  %v6444_v14 = vld [vmem:[%s6899_s12 + $0x40] sm:$0xff]  ;;  %v6449_v15 = vld [vmem:[%s6899_s12 + $0xc8] sm:$0xff]  ;;  %v6521_v8 = vld [vmem:[%s6899_s12 + $0xb0] sm:$0xff] }
 0x205   :  { %3106 = vmatpush.bf16.msra.mxu0 %v5374_v17  ;;  %v6461_v27 = vld [vmem:[%s6899_s12 + $0x1c8] sm:$0xff]  ;;  %v3163_v17 = vrot.slane %v3162_v10, 4  ;;  %v3150_v50 = vadd.f32 %v3149_v9, %v3148_v21  ;;  %v6528_v62 = vld [vmem:[%s6899_s12 + $0x130] sm:$0xff]  ;;  %v6542_v9 = vld [vmem:[%s6899_s12 + $0x20] sm:$0xff] }
 0x206   :  { %3068 = vmatpush.bf16.msrb.mxu1 %v4974_v35  ;;  %v2094_v34 = vpop.f32.mrf.mxu1  ;;  %v6492_v35 = vld [vmem:[%s6899_s12 + $0x30] sm:$0xff] }
 0x207   :  { %v2095_v16 = vadd.f32 %v2094_v34, %v2082_v31  ;;  %v3164_v52 = vadd.f32 %v3163_v17, %v3162_v10  ;;  %v3151_v34 = vrot.slane %v3150_v50, 2  ;;  %v6533_v21 = vld [vmem:[%s6899_s12 + $0x1b0] sm:$0xff]  ;;  %v6547_v10 = vld [vmem:[%s6899_s12 + $0xa8] sm:$0xff] }
 0x208   :  { %3081 = vmatpush.bf16.msrb.mxu2 %v5102_v2  ;;  %3094 = vmatpush.bf16.msrb.mxu3 %v5230_v47  ;;  %v3157_v2 = vadd.f32 %v3156_v46, %v3155_v6  ;;  %v6509_v47 = vld [vmem:[%s6899_s12 + $0x1b8] sm:$0xff]  ;;  %6934 = vst [vmem:[#allocation10_spill] sm:$0xff] %v6547_v10  ;;  %v6559_v46 = vld [vmem:[%s6899_s12 + $0x1a8] sm:$0xff] }
 0x209   :  { %3107 = vmatpush.bf16.msra.mxu0 %v5358_v38  ;;  %3069 = vmatmul.bf16.vlgmr.msrb.gmra.mxu1 %v6145_v49  ;;  %v6325_v49 = vld [vmem:[%s6899_s12 + $0x170] sm:$0xff]  ;;  %6936 = vst [vmem:[#allocation12_spill] sm:$0xff] %v6559_v46  ;;  %v3165_v17 = vrot.slane %v3164_v52, 2 }
 0x20a   :  { %3272 = vmatpush.msra.mxu1 %v6279_v43  ;;  %v3158_v31 = vrot.slane %v3157_v2, 2 }
 0x20b   :  { %3082 = vmatmul.bf16.vlgmr.msrb.gmra.mxu2 %v6149_v53  ;;  %3095 = vmatmul.bf16.vlgmr.msrb.gmra.mxu3 %v6153_v54  ;;  %v6340_v53 = vld [vmem:[%s6899_s12 + $0x60] sm:$0xff]  ;;  %v6352_v54 = vld [vmem:[%s6899_s12 + $0x168] sm:$0xff]  ;;  %v2133_v51 = vpop.f32.mrf.mxu0 }
 0x20c   :  { %3292 = vmatpush.msra.mxu2 %v6284_v4  ;;  %3273 = vmatpush.msra.mxu1 %v6291_v41 }
 0x20d   :  { %3312 = vmatpush.msra.mxu3 %v6296_v44  ;;  %3332 = vmatpush.msrb.mxu0 %v6302_v48 }
 0x20e   :  { %3108 = vmatmul.bf16.vlgmr.msra.gmra.mxu0 %v6157_v55  ;;  %3274 = vmatpush.msra.mxu1 %v6312_v56  ;;  %v6357_v55 = vld [vmem:[%s6899_s12 + $0x1e8] sm:$0xff]  ;;  %v2107_v22 = vpop.f32.mrf.mxu2  ;;  %v2096_v23 = vpop.f32.mrf.mxu1 }
 0x20f   :  { %3293 = vmatpush.msra.mxu2 %v6317_v58  ;;  %3313 = vmatpush.msra.mxu3 %v6325_v49  ;;  %v2108_v30 = vadd.f32 %v2107_v22, %v2095_v16  ;;  %v2120_v32 = vpop.f32.mrf.mxu3  ;;  %v6568_v23 = vld [vmem:[%s6899_s12 + $0x18] sm:$0xff] }
 0x210   :  { %3333 = vmatpush.msrb.mxu0 %v6330_v33  ;;  %3275 = vmatpush.msra.mxu1 %v6340_v53  ;;  %6937 = vst [vmem:[#allocation13_spill] sm:$0xff] %v6568_v23 }
 0x211   :  { %3294 = vmatpush.msra.mxu2 %v6345_v28  ;;  %3314 = vmatpush.msra.mxu3 %v6352_v54  ;;  %v2121_v38 = vadd.f32 %v2120_v32, %v2108_v30  ;;  %v6573_v30 = vld [vmem:[%s6899_s12 + $0xa0] sm:$0xff] }
 0x212   :  { %3334 = vmatpush.msrb.mxu0 %v6357_v55  ;;  %3276 = vmatpush.msra.mxu1 %v6364_v12  ;;  %6938 = vst [vmem:[#allocation14_spill] sm:$0xff] %v6573_v30 }
 0x213   :  { %3295 = vmatpush.msra.mxu2 %v6369_v59  ;;  %3315 = vmatpush.msra.mxu3 %v6377_v25  ;;  %v2135_v36 = vpop.f32.mrf.mxu0  ;;  %v6535_v6 = vadd.f32 %v2133_v51, %v2121_v38  ;;  %v6554_v51 = vld [vmem:[%s6899_s12 + $0x128] sm:$0xff]  ;;  %v3152_v38 = vadd.f32 %v3151_v34, %v3150_v50  ;;  %v6592_v34 = vld [vmem:[%s6899_s12 + $0x10] sm:$0xff] }
 0x214   :  { %3335 = vmatpush.msrb.mxu0 %v6382_v63  ;;  %3277 = vmatpush.msra.mxu1 %v6391_v40  ;;  %6935 = vst [vmem:[#allocation11_spill] sm:$0xff] %v6554_v51  ;;  %v6580_v36 = vld [vmem:[%s6899_s12 + $0x120] sm:$0xff] }
 0x215   :  { %3296 = vmatpush.msra.mxu2 %v6396_v0  ;;  %3316 = vmatpush.msra.mxu3 %v6403_v1  ;;  %v3169_v16 = vsel %vm3119_vm0, %v6535_v6, 0.0  ;;  %6939 = vst [vmem:[#allocation15_spill] sm:$0xff] %v6580_v36 }
 0x216   :  { %3336 = vmatpush.msrb.mxu0 %v6408_v5  ;;  %3278 = vmatpush.msra.mxu1 %v6417_v7  ;;  %v3170_v22 = vrot.slane %v3169_v16, 4  ;;  %v2109_v32 = vpop.f32.mrf.mxu2  ;;  %6941 = vst [vmem:[#allocation17_spill] sm:$0xff] %v6592_v34 }
 0x217   :  { %3297 = vmatpush.msra.mxu2 %v6422_v3  ;;  %3317 = vmatpush.msra.mxu3 %v6432_v11  ;;  %v2122_v18 = vpop.f32.mrf.mxu3  ;;  %v6597_v32 = vld [vmem:[%s6899_s12 + $0x98] sm:$0xff] }
 0x218   :  { %3337 = vmatpush.msrb.mxu0 %v6437_v45  ;;  %3279 = vmatpush.msra.mxu1 %v6444_v14  ;;  %v3171_v50 = vadd.f32 %v3170_v22, %v3169_v16  ;;  %6942 = vst [vmem:[#allocation18_spill] sm:$0xff] %v6597_v32  ;;  %v6604_v18 = vld [vmem:[%s6899_s12 + $0x118] sm:$0xff]  ;;  %v3166_v22 = vadd.f32 %v3165_v17, %v3164_v52  ;;  %v6628_v52 = vld [vmem:[%s6899_s12 + $0x110] sm:$0xff] }
 0x219   :  { %3298 = vmatpush.msra.mxu2 %v6449_v15  ;;  %3318 = vmatpush.msra.mxu3 %v6456_v13  ;;  %6943 = vst [vmem:[#allocation19_spill] sm:$0xff] %v6604_v18  ;;  %v6609_v16 = vld [vmem:[%s6899_s12 + $0x198] sm:$0xff]  ;;  %v6633_v17 = vld [vmem:[%s6899_s12 + $0x190] sm:$0xff] }
 0x21a   :  { %3338 = vmatpush.msrb.mxu0 %v6461_v27  ;;  %3280 = vmatpush.msra.mxu1 %v6468_v19  ;;  %6944 = vst [vmem:[#allocation20_spill] sm:$0xff] %v6609_v16 }
 0x21b   :  { %3299 = vmatpush.msra.mxu2 %v6473_v20  ;;  %3319 = vmatpush.msra.mxu3 %v6480_v24  ;;  %6947 = vst [vmem:[#allocation23_spill] sm:$0xff] %v6633_v17 }
 0x21c   :  { %3339 = vmatpush.msrb.mxu0 %v6485_v29  ;;  %3281 = vmatpush.msra.mxu1 %v6492_v35 }
 0x21d   :  { %3300 = vmatpush.msra.mxu2 %v6497_v37  ;;  %3320 = vmatpush.msra.mxu3 %v6504_v39 }
 0x21e   :  { %3340 = vmatpush.msrb.mxu0 %v6509_v47  ;;  %3282 = vmatpush.msra.mxu1 %v6516_v57 }
 0x21f   :  { %3301 = vmatpush.msra.mxu2 %v6521_v8  ;;  %3321 = vmatpush.msra.mxu3 %v6528_v62 }
 0x220   :  { %3341 = vmatpush.msrb.mxu0 %v6533_v21  ;;  %3283 = vmatpush.msra.mxu1 %v6542_v9 }
 0x221   :  { %3302 = vmatpush.msra.mxu2 %v6547_v10  ;;  %3322 = vmatpush.msra.mxu3 %v6554_v51  ;;  %v3159_v10 = vadd.f32 %v3158_v31, %v3157_v2  ;;  %v6616_v2 = vld [vmem:[%s6899_s12 + $0x8] sm:$0xff]  ;;  %v6621_v31 = vld [vmem:[%s6899_s12 + $0x90] sm:$0xff]  ;;  %v6671_v51 = vld [vmem:[%s6899_s12 + $0x100] sm:$0xff] }
 0x222   :  { %3342 = vmatpush.msrb.mxu0 %v6559_v46  ;;  %3284 = vmatpush.msra.mxu1 %v6568_v23  ;;  %6945 = vst [vmem:[#allocation21_spill] sm:$0xff] %v6616_v2  ;;  %v3172_v23 = vrot.slane %v3171_v50, 2 }
 0x223   :  { %3303 = vmatpush.msra.mxu2 %v6573_v30  ;;  %3323 = vmatpush.msra.mxu3 %v6580_v36  ;;  %6946 = vst [vmem:[#allocation22_spill] sm:$0xff] %v6621_v31  ;;  %v3153_v30 = vrot.slane %v3152_v38, 1  ;;  %v3167_v36 = vrot.slane %v3166_v22, 1 }
 0x224   :  { %3343 = vmatpush.msrb.mxu0 %v6585_v26  ;;  %3285 = vmatpush.msra.mxu1 %v6592_v34  ;;  %v6640_v34 = vld [vmem:[%s6899_s12] sm:$0xff]  ;;  %v3160_v26 = vrot.slane %v3159_v10, 1 }
 0x225   :  { %3304 = vmatpush.msra.mxu2 %v6597_v32  ;;  %3324 = vmatpush.msra.mxu3 %v6604_v18  ;;  %v6645_v32 = vld [vmem:[%s6899_s12 + $0x88] sm:$0xff]  ;;  %v3154_v46 = vadd.f32 %v3153_v30, %v3152_v38 }
 0x226   :  { %3344 = vmatpush.msrb.mxu0 %v6609_v16  ;;  %3286 = vmatpush.msra.mxu1 %v6616_v2  ;;  %v6652_v18 = vld [vmem:[%s6899_s12 + $0x108] sm:$0xff]  ;;  %v6664_v2 = vld [vmem:[%s6899_s12 + $0x80] sm:$0xff]  ;;  %v6685_v38 = vpop.f32.mrf.mxu1 }
 0x227   :  { %3305 = vmatpush.msra.mxu2 %v6621_v31  ;;  %v6657_v16 = vld [vmem:[%s6899_s12 + $0x188] sm:$0xff]  ;;  %3325 = vmatpush.msra.mxu3 %v6628_v52  ;;  %v3173_v31 = vadd.f32 %v3172_v23, %v3171_v50  ;;  %v3161_v23 = vadd.f32 %v3160_v26, %v3159_v10  ;;  %v3168_v50 = vadd.f32 %v3167_v36, %v3166_v22  ;;  %v3114_v36 = vld [vmem:[%s6898_s11] sm:$0x3] }
 0x228   :  { %3345 = vmatpush.msrb.mxu0 %v6633_v17  ;;  %3287 = vmatpush.msra.mxu1 %v6640_v34  ;;  %v6678_v17 = vld [vmem:[%s6899_s12 + $0x180] sm:$0xff]  ;;  %v3176_v26 = vmul.f32 %v6333_v61, %v6333_v61  ;;  %s6964_s12 = sld [smem:[#allocation26_spill]] }
 0x229   :  { %3306 = vmatpush.msra.mxu2 %v6645_v32  ;;  %3326 = vmatpush.msra.mxu3 %v6652_v18  ;;  %v3174_v30 = vrot.slane %v3173_v31, 1 }
 0x22a   :  { %3346 = vmatpush.msrb.mxu0 %v6657_v16  ;;  %3288 = vmatmul.f32.vlgmr.msra.gmra.mxu1 %v3154_v46  ;;  %v3113_v46 = vld [vmem:[%s6897_s10] sm:$0x3] }
 0x22b   :  { %3307 = vmatpush.msra.mxu2 %v6664_v2  ;;  %3353 = vmatpush.msrb.mxu1 %v6279_v43  ;;  %v3175_v43 = vadd.f32 %v3174_v30, %v3173_v31  ;;  %v6695_v10 = vpop.f32.mrf.mxu0 }
 0x22c   :  { %3327 = vmatpush.msra.mxu3 %v6671_v51  ;;  %3347 = vmatpush.msrb.mxu0 %v6678_v17 }
 0x22d   :  { %3308 = vmatmul.f32.vlgmr.msra.gmra.mxu2 %v3161_v23  ;;  %3328 = vmatmul.f32.vlgmr.msra.gmra.mxu3 %v3168_v50  ;;  %v6959_v23 = vld [vmem:[#allocation21_spill] sm:$0xff]  ;;  %v6960_v50 = vld [vmem:[#allocation22_spill] sm:$0xff] }
 0x22e   :  { %3354 = vmatpush.msrb.mxu1 %v6291_v41  ;;  %3373 = vmatpush.msrb.mxu2 %v6284_v4  ;;  %v3177_v41 = vmul.f32 %v6233_v42, %v6233_v42  ;;  %v3178_v4 = vmul.f32 %v6248_v60, %v6248_v60 }
 0x22f   :  { %3393 = vmatpush.msrb.mxu3 %v6296_v44  ;;  %3413 = vmatpush.msra.mxu0 %v6302_v48  ;;  %v3179_v44 = vmul.f32 %v6535_v6, %v6535_v6  ;;  %v3180_v48 = vsel %vm3119_vm0, %v3176_v26, 0.0  ;;  %v6961_v26 = vld [vmem:[#allocation23_spill] sm:$0xff] }
 0x230   :  { %3355 = vmatpush.msrb.mxu1 %v6312_v56  ;;  %3374 = vmatpush.msrb.mxu2 %v6317_v58  ;;  %v3187_v56 = vsel %vm3119_vm0, %v3177_v41, 0.0  ;;  %v3194_v58 = vsel %vm3119_vm0, %v3178_v4, 0.0  ;;  %v3117_v41 = vperm.slane %v3113_v46, 1  ;;  %v3125_v4 = vperm.slane %v3114_v36, 1 }
 0x231   :  { %3394 = vmatpush.msrb.mxu3 %v6325_v49  ;;  %3414 = vmatpush.msra.mxu0 %v6330_v33  ;;  %v2916_v49 = vpop.f32.mrf.mxu1  ;;  %v6715_v33 = vpop.f32.mrf.mxu2 }
 0x232   :  { %3356 = vmatpush.msrb.mxu1 %v6340_v53  ;;  %3375 = vmatpush.msrb.mxu2 %v6345_v28  ;;  %v3181_v53 = vrot.slane %v3180_v48, 4  ;;  %v3201_v28 = vsel %vm3119_vm0, %v3179_v44, 0.0  ;;  %v3124_v49 = vperm.slane %v3114_v36, 0 }
 0x233   :  { %3395 = vmatpush.msrb.mxu3 %v6352_v54  ;;  %3415 = vmatpush.msra.mxu0 %v6357_v55  ;;  %v6720_v54 = vpop.f32.mrf.mxu3  ;;  %v3188_v55 = vrot.slane %v3187_v56, 4 }
 0x234   :  { %3357 = vmatpush.msrb.mxu1 %v6364_v12  ;;  %3348 = vmatmul.f32.vlgmr.msrb.gmra.mxu0 %v3175_v43  ;;  %v3195_v12 = vrot.slane %v3194_v58, 4 }
 0x235   :  { %3376 = vmatpush.msrb.mxu2 %v6369_v59  ;;  %3396 = vmatpush.msrb.mxu3 %v6377_v25  ;;  %v2955_v59 = vpop.f32.mrf.mxu0  ;;  %v3202_v25 = vrot.slane %v3201_v28, 4 }
 0x236   :  { %3416 = vmatpush.msra.mxu0 %v6382_v63  ;;  %3358 = vmatpush.msrb.mxu1 %v6391_v40  ;;  %v3182_v63 = vadd.f32 %v3181_v53, %v3180_v48  ;;  %v3189_v40 = vadd.f32 %v3188_v55, %v3187_v56 }
 0x237   :  { %3377 = vmatpush.msrb.mxu2 %v6396_v0  ;;  %3397 = vmatpush.msrb.mxu3 %v6403_v1  ;;  %v3196_v0 = vadd.f32 %v3195_v12, %v3194_v58  ;;  %v3203_v1 = vadd.f32 %v3202_v25, %v3201_v28  ;;  %v3118_v58 = vrot.slane %v3117_v41, 6  ;;  %v6962_v12 = vld [vmem:[#allocation8_spill] sm:$0xff]  ;;  %v6963_v25 = vld [vmem:[#allocation9_spill] sm:$0xff] }
 0x238   :  { %3417 = vmatpush.msra.mxu0 %v6408_v5  ;;  %3359 = vmatpush.msrb.mxu1 %v6417_v7  ;;  %v3183_v7 = vrot.slane %v3182_v63, 2 }
 0x239   :  { %3378 = vmatpush.msrb.mxu2 %v6422_v3  ;;  %3398 = vmatpush.msrb.mxu3 %v6432_v11  ;;  %v2929_v5 = vpop.f32.mrf.mxu2  ;;  %v3190_v11 = vrot.slane %v3189_v40, 2 }
 0x23a   :  { %3418 = vmatpush.msra.mxu0 %v6437_v45  ;;  %3360 = vmatpush.msrb.mxu1 %v6444_v14  ;;  %v3197_v45 = vrot.slane %v3196_v0, 2  ;;  %v3204_v14 = vrot.slane %v3203_v1, 2 }
 0x23b   :  { %3379 = vmatpush.msrb.mxu2 %v6449_v15  ;;  %3399 = vmatpush.msrb.mxu3 %v6456_v13  ;;  %v2942_v3 = vpop.f32.mrf.mxu3  ;;  %v3184_v15 = vadd.f32 %v3183_v7, %v3182_v63  ;;  %v6948_v13 = vld [vmem:[#allocation10_spill] sm:$0xff] }
 0x23c   :  { %3419 = vmatpush.msra.mxu0 %v6461_v27  ;;  %3361 = vmatpush.msrb.mxu1 %v6468_v19  ;;  %v6949_v27 = vld [vmem:[#allocation11_spill] sm:$0xff]  ;;  %v6950_v19 = vld [vmem:[#allocation12_spill] sm:$0xff] }
 0x23d   :  { %3380 = vmatpush.msrb.mxu2 %v6473_v20  ;;  %3400 = vmatpush.msrb.mxu3 %v6480_v24  ;;  %v3191_v20 = vadd.f32 %v3190_v11, %v3189_v40  ;;  %v3198_v24 = vadd.f32 %v3197_v45, %v3196_v0 }
 0x23e   :  { %3420 = vmatpush.msra.mxu0 %v6485_v29  ;;  %3362 = vmatpush.msrb.mxu1 %v6492_v35  ;;  %v6951_v29 = vld [vmem:[#allocation13_spill] sm:$0xff]  ;;  %v6952_v35 = vld [vmem:[#allocation14_spill] sm:$0xff] }
 0x23f   :  { %3381 = vmatpush.msrb.mxu2 %v6497_v37  ;;  %3401 = vmatpush.msrb.mxu3 %v6504_v39  ;;  %v3205_v37 = vadd.f32 %v3204_v14, %v3203_v1  ;;  %v6953_v39 = vld [vmem:[#allocation15_spill] sm:$0xff]  ;;  %v3192_v22 = vrot.slane %v3191_v20, 1  ;;  %v3199_v31 = vrot.slane %v3198_v24, 1 }
 0x240   :  { %3421 = vmatpush.msra.mxu0 %v6509_v47  ;;  %3363 = vmatpush.msrb.mxu1 %v6516_v57  ;;  %v6954_v47 = vld [vmem:[#allocation16_spill] sm:$0xff]  ;;  %v6955_v57 = vld [vmem:[#allocation17_spill] sm:$0xff] }
 0x241   :  { %3382 = vmatpush.msrb.mxu2 %v6521_v8  ;;  %3402 = vmatpush.msrb.mxu3 %v6528_v62  ;;  %v6956_v8 = vld [vmem:[#allocation18_spill] sm:$0xff]  ;;  %v3185_v62 = vrot.slane %v3184_v15, 1  ;;  %v3206_v30 = vrot.slane %v3205_v37, 1  ;;  %v3193_v48 = vadd.f32 %v3192_v22, %v3191_v20  ;;  %v3200_v56 = vadd.f32 %v3199_v31, %v3198_v24 }
 0x242   :  { %3422 = vmatpush.msra.mxu0 %v6533_v21  ;;  %3364 = vmatpush.msrb.mxu1 %v6542_v9  ;;  %v6957_v21 = vld [vmem:[#allocation19_spill] sm:$0xff]  ;;  %v6958_v9 = vld [vmem:[#allocation20_spill] sm:$0xff] }
 0x243   :  { %3383 = vmatpush.msrb.mxu2 %v6948_v13  ;;  %3403 = vmatpush.msrb.mxu3 %v6949_v27  ;;  %v3186_v43 = vadd.f32 %v3185_v62, %v3184_v15 }
 0x244   :  { %3423 = vmatpush.msra.mxu0 %v6950_v19  ;;  %3365 = vmatpush.msrb.mxu1 %v6951_v29 }
 0x245   :  { %3384 = vmatpush.msrb.mxu2 %v6952_v35  ;;  %3404 = vmatpush.msrb.mxu3 %v6953_v39 }
 0x246   :  { %3424 = vmatpush.msra.mxu0 %v6954_v47  ;;  %3366 = vmatpush.msrb.mxu1 %v6955_v57  ;;  %v2966_v44 = vpop.f32.mrf.mxu1 }
 0x247   :  { %3385 = vmatpush.msrb.mxu2 %v6956_v8  ;;  %3405 = vmatpush.msrb.mxu3 %v6957_v21 }
 0x248   :  { %3425 = vmatpush.msra.mxu0 %v6958_v9  ;;  %3367 = vmatpush.msrb.mxu1 %v6959_v23 }
 0x249   :  { %3386 = vmatpush.msrb.mxu2 %v6960_v50  ;;  %3406 = vmatpush.msrb.mxu3 %v6628_v52  ;;  %v3116_v52 = vperm.slane %v3113_v46, 0 }
 0x24a   :  { %3426 = vmatpush.msra.mxu0 %v6961_v26  ;;  %3368 = vmatpush.msrb.mxu1 %v6640_v34  ;;  %v3207_v34 = vadd.f32 %v3206_v30, %v3205_v37  ;;  %v6790_v30 = vld [vmem:[%s6900_s13 + $0x20] sm:$0xff]  ;;  %v6795_v26 = vld [vmem:[%s6900_s13 + $0x28] sm:$0xff] }
 0x24b   :  { %3387 = vmatpush.msrb.mxu2 %v6645_v32  ;;  %3407 = vmatpush.msrb.mxu3 %v6652_v18  ;;  %v3005_v32 = vpop.f32.mrf.mxu0  ;;  %v3126_v18 = vrot.slane %v3125_v4, 6  ;;  %v6807_v4 = vld [vmem:[%s6900_s13] sm:$0xff] }
 0x24c   :  { %3427 = vmatpush.msra.mxu0 %v6657_v16  ;;  %3369 = vmatmul.f32.vlgmr.msrb.gmra.mxu1 %v3186_v43  ;;  %v2928_v16 = vadd.f32 %v6715_v33, %v6685_v38  ;;  %v6800_v43 = vld [vmem:[%s6900_s13 + $0x30] sm:$0xff] }
 0x24d   :  { %3388 = vmatpush.msrb.mxu2 %v6664_v2  ;;  %3408 = vmatpush.msrb.mxu3 %v6671_v51  ;;  %v3120_v2 = vsel %vm3119_vm0, %v3116_v52, %v3118_v58  ;;  %v3127_v53 = vsel %vm3119_vm0, %v3124_v49, %v3126_v18  ;;  %v3443_v52 = vld [vmem:[%s6900_s13 + $0x38] sm:$0xff] }
 0x24e   :  { %3428 = vmatpush.msra.mxu0 %v6678_v17  ;;  %3389 = vmatmul.f32.vlgmr.msrb.gmra.mxu2 %v3193_v48  ;;  %v2968_v28 = vpop.f32.mrf.mxu1  ;;  %v2979_v51 = vpop.f32.mrf.mxu2  ;;  %v3122_v59 = vmul.f32 %v3120_v2, %v6962_v12  ;;  %v3129_v63 = vmul.f32 %v3127_v53, %v6963_v25  ;;  %v2941_v40 = vadd.f32 %v6720_v54, %v2928_v16  ;;  %v6817_v48 = vld [vmem:[%s6900_s13 + $0x10] sm:$0xff]  ;;  %v3439_v58 = vld [vmem:[%s6900_s13 + $0x18] sm:$0xff] }
 0x24f   :  { %3409 = vmatmul.f32.vlgmr.msrb.gmra.mxu3 %v3200_v56  ;;  %3429 = vmatmul.f32.vlgmr.msra.gmra.mxu0 %v3207_v34  ;;  %v2980_v55 = vadd.f32 %v2979_v51, %v2966_v44  ;;  %v2992_v17 = vpop.f32.mrf.mxu3  ;;  %v3138_v62 = vmul.f32 %v3127_v53, %v6962_v12  ;;  %v3139_v21 = vmul.f32 %v3120_v2, %v6963_v25  ;;  %v6812_v44 = vld [vmem:[%s6900_s13 + $0x8] sm:$0xff] }
 0x250   :  { %v3130_v7 = vsub.f32 %v3122_v59, %v3129_v63  ;;  %v2954_v38 = vadd.f32 %v6695_v10, %v2941_v40  ;;  %3462 = vmatpush.msra.mxu1 %v6790_v30  ;;  %3482 = vmatpush.msra.mxu2 %v6795_v26  ;;  %v3639_v59 = vld [vmem:[%s6901_s14] sm:$0xff] }
 0x251   :  { %v2993_v0 = vadd.f32 %v2992_v17, %v2980_v55  ;;  %v3140_v31 = vadd.f32 %v3139_v21, %v3138_v62  ;;  %3502 = vmatpush.msra.mxu3 %v6800_v43  ;;  %3745 = vmatpush.msrb.mxu0 %v3443_v52 }
 0x252   :  { %3463 = vmatpush.msra.mxu1 %v6807_v4  ;;  %3483 = vmatpush.msra.mxu2 %v6812_v44 }
 0x253   :  { %v3007_v1 = vpop.f32.mrf.mxu0  ;;  %v3006_v5 = vadd.f32 %v3005_v32, %v2993_v0  ;;  %3503 = vmatpush.msra.mxu3 %v6817_v48  ;;  %3746 = vmatpush.msrb.mxu0 %v3439_v58 }
 0x254   :  { %3522 = vmatpush.msrb.mxu1 %v3443_v52  ;;  %3556 = vmatpush.msrb.mxu2 %v6790_v30 }
 0x255   :  { %v3133_v33 = vrot.slane %v3006_v5, 6  ;;  %3576 = vmatpush.msrb.mxu3 %v6795_v26  ;;  %3829 = vmatpush.msra.mxu0 %v3443_v52 }
 0x256   :  { %v2981_v3 = vpop.f32.mrf.mxu2  ;;  %3523 = vmatpush.msrb.mxu1 %v3439_v58  ;;  %3557 = vmatpush.msrb.mxu2 %v6807_v4 }
 0x257   :  { %v3134_v11 = vsel %vm3119_vm0, %v2954_v38, %v3133_v33  ;;  %v2994_v45 = vpop.f32.mrf.mxu3  ;;  %3577 = vmatpush.msrb.mxu3 %v6812_v44  ;;  %3830 = vmatpush.msra.mxu0 %v3439_v58 }
 0x258   :  { %v3136_v14 = vadd.f32 %v3134_v11, %v3130_v7 }
 0x25a   :  { %3137 = vst [vmem:[%s6905_s18] sm:$0xf] %v3136_v14 }
 0x266   :  { %v3018_v15 = vpop.f32.mrf.mxu1 }
 0x26b   :  { %v3057_v13 = vpop.f32.mrf.mxu0 }
 0x26e   :  { %v3020_v27 = vpop.f32.mrf.mxu1  ;;  %v3031_v54 = vpop.f32.mrf.mxu2 }
 0x26f   :  { %v3044_v19 = vpop.f32.mrf.mxu3  ;;  %v3032_v37 = vadd.f32 %v3031_v54, %v3018_v15  ;;  %v3638_v54 = vld [vmem:[%s6964_s12] sm:$0x3] }
 0x271   :  { %v3045_v9 = vadd.f32 %v3044_v19, %v3032_v37 }
 0x273   :  { %v3059_v20 = vpop.f32.mrf.mxu0  ;;  %v3058_v23 = vadd.f32 %v3057_v13, %v3045_v9 }
 0x276   :  { %v3033_v24 = vpop.f32.mrf.mxu2 }
 0x277   :  { %v3046_v29 = vpop.f32.mrf.mxu3  ;;  %v5878_v24 = vld [vmem:[%s6902_s15] ss:$0 sm:$0xff] }
 0x286   :  { %v3070_v35 = vpop.f32.mrf.mxu1 }
 0x28b   :  { %v3109_v10 = vpop.f32.mrf.mxu0 }
 0x28e   :  { %v3072_v39 = vpop.f32.mrf.mxu1  ;;  %v3083_v47 = vpop.f32.mrf.mxu2 }
 0x28f   :  { %v3084_v57 = vadd.f32 %v3083_v47, %v3070_v35  ;;  %v3096_v8 = vpop.f32.mrf.mxu3 }
 0x291   :  { %v3097_v46 = vadd.f32 %v3096_v8, %v3084_v57 }
 0x293   :  { %v3111_v36 = vpop.f32.mrf.mxu0  ;;  %v3110_v22 = vadd.f32 %v3109_v10, %v3097_v46 }
 0x295   :  { %v3143_v50 = vrot.slane %v3110_v22, 6 }
 0x296   :  { %v3085_v41 = vpop.f32.mrf.mxu2 }
 0x297   :  { %v3144_v56 = vsel %vm3119_vm0, %v3058_v23, %v3143_v50  ;;  %v3098_v34 = vpop.f32.mrf.mxu3 }
 0x298   :  { %v3146_v32 = vadd.f32 %v3144_v56, %v3140_v31 }
 0x29a   :  { %3147 = vst [vmem:[%s6906_s19] sm:$0xf] %v3146_v32 }
 0x2a7   :  { %v3289_v49 = vpop.f32.mrf.mxu1 }
 0x2b0   :  { %v3309_v18 = vpop.f32.mrf.mxu2  ;;  %v3329_v2 = vpop.f32.mrf.mxu3 }
 0x2b1   :  { %v3310_v16 = vadd.f32 %v3309_v18, %v3289_v49  ;;  %v3349_v28 = vpop.f32.mrf.mxu0 }
 0x2b3   :  { %v3330_v53 = vadd.f32 %v3329_v2, %v3310_v16 }
 0x2b5   :  { %v3350_v51 = vadd.f32 %v3349_v28, %v3330_v53 }
 0x2b7   :  { %v3352_v55 = vmul.f32 0.015625, %v3350_v51 }
 0x2b9   :  { %5471 = vmatmul.msk.f32.vlgmr.msra.gmra.mxu1 %vm3444_vm1, %v3352_v55  ;;  %5472 = vmatmul.msk.f32.vlgmr.msra.gmra.mxu2 %vm3444_vm1, %v3352_v55  ;;  %v3434_v7 = vmul.f32 %v3352_v55, %v3352_v55 }
 0x2ba   :  { %5473 = vmatmul.msk.f32.vlgmr.msra.gmra.mxu3 %vm3444_vm1, %v3352_v55  ;;  %3596 = vmatpush.msra.mxu1 %v6800_v43 }
 0x2bb   :  { %3616 = vmatpush.msra.mxu2 %v3443_v52  ;;  %3663 = vmatpush.msra.mxu3 %v3639_v59 }
 0x2bc   :  { %3597 = vmatpush.msra.mxu1 %v6817_v48 }
 0x2bd   :  { %3617 = vmatpush.msra.mxu2 %v3439_v58 }
 0x2c1   :  { %5474 = vmatmul.msk.f32.vlgmr.msrb.gmra.mxu1 %vm3444_vm1, %v3352_v55 }
 0x2c2   :  { %3685 = vmatpush.msrb.mxu1 %v6790_v30 }
 0x2c4   :  { %3686 = vmatpush.msrb.mxu1 %v6807_v4 }
 0x2c9   :  { %v3370_v17 = vpop.f32.mrf.mxu1 }
 0x2cc   :  { %v3430_v0 = vpop.f32.mrf.mxu0 }
 0x2d1   :  { %v3390_v12 = vpop.f32.mrf.mxu2 }
 0x2d2   :  { %v3391_v25 = vadd.f32 %v3390_v12, %v3370_v17  ;;  %v3410_v63 = vpop.f32.mrf.mxu3 }
 0x2d4   :  { %v3411_v40 = vadd.f32 %v3410_v63, %v3391_v25 }
 0x2d6   :  { %v3431_v1 = vadd.f32 %v3430_v0, %v3411_v40 }
 0x2d8   :  { %v3433_v5 = vmul.f32 0.015625, %v3431_v1 }
 0x2da   :  { %v3435_v38 = vsub.f32 %v3433_v5, %v3434_v7 }
 0x2dc   :  { %v3528_v33 = vadd.f32 1e-05, %v3435_v38 }
 0x2de   :  { %5881 = vrsqrt.f32 %v3528_v33  ;;  %vm3535_vm3 = vweird.f32 %v3528_v33 }
 0x2e4   :  { %v5882_v3 = vpop.eup %5881 }
 0x2e5   :  { %v3530_v11 = vmul.f32 %v5882_v3, %v3528_v33  ;;  %vm3536_vm2 = vweird.f32 %v5882_v3 }
 0x2e6   :  { %vm3537_vm4 = vmor %vm3535_vm3, %vm3536_vm2 }
 0x2e7   :  { %v3531_v45 = vmul.f32 %v5882_v3, %v3530_v11 }
 0x2e9   :  { %v3532_v14 = vmul.f32 0.5, %v3531_v45 }
 0x2eb   :  { %v3533_v15 = vsub.f32 1.5, %v3532_v14 }
 0x2ed   :  { %v3534_v13 = vmul.f32 %v5882_v3, %v3533_v15 }
 0x2ef   :  { %v3538_v27 = vsel %vm3537_vm4, %v5882_v3, %v3534_v13 }
 0x2f0   :  { %5475 = vmatmul.msk.f32.vlgmr.msrb.gmra.mxu2 %vm3444_vm1, %v3538_v27  ;;  %5476 = vmatmul.msk.f32.vlgmr.msrb.gmra.mxu3 %vm3444_vm1, %v3538_v27 }
 0x2f1   :  { %5477 = vmatmul.msk.f32.vlgmr.msra.gmra.mxu1 %vm3444_vm1, %v3538_v27  ;;  %3705 = vmatpush.msrb.mxu2 %v6795_v26 }
 0x2f2   :  { %3725 = vmatpush.msrb.mxu3 %v6800_v43  ;;  %3769 = vmatpush.msra.mxu1 %v6790_v30 }
 0x2f3   :  { %3706 = vmatpush.msrb.mxu2 %v6812_v44 }
 0x2f4   :  { %3726 = vmatpush.msrb.mxu3 %v6817_v48  ;;  %3770 = vmatpush.msra.mxu1 %v6807_v4 }
 0x2f8   :  { %5478 = vmatmul.msk.f32.vlgmr.msra.gmra.mxu2 %vm3444_vm1, %v3538_v27  ;;  %5479 = vmatmul.msk.f32.vlgmr.msra.gmra.mxu3 %vm3644_vm5, %v3638_v54 }
 0x2f9   :  { %3789 = vmatpush.msra.mxu2 %v6795_v26  ;;  %3809 = vmatpush.msra.mxu3 %v6800_v43 }
 0x2fb   :  { %3790 = vmatpush.msra.mxu2 %v6812_v44  ;;  %3810 = vmatpush.msra.mxu3 %v6817_v48 }
 0x336   :  { %v3465_v37 = vpop.f32.mrf.mxu1 }
 0x337   :  { %v3622_v21 = vperm.slane %v3465_v37, 0 }
 0x339   :  { %v3626_v23 = vsub.f32 %v6333_v61, %v3622_v21 }
 0x33c   :  { %v3485_v39 = vpop.f32.mrf.mxu2 }
 0x33d   :  { %v3505_v19 = vpop.f32.mrf.mxu3  ;;  %v3623_v30 = vperm.slane %v3485_v39, 0  ;;  %v3894_v39 = vld.sshfl [vmem:[#allocation1 + $0x18] sm:$0xff pattern:$0x73625140] }
 0x33e   :  { %v3525_v47 = vpop.f32.mrf.mxu1  ;;  %v3624_v43 = vperm.slane %v3505_v19, 0 }
 0x33f   :  { %v3625_v9 = vperm.slane %v3525_v47, 0  ;;  %v3627_v58 = vsub.f32 %v6233_v42, %v3623_v30 }
 0x340   :  { %v3628_v16 = vsub.f32 %v6248_v60, %v3624_v43 }
 0x341   :  { %v3629_v50 = vsub.f32 %v6535_v6, %v3625_v9 }
 0x36e   :  { %v3599_v8 = vpop.f32.mrf.mxu1 }
 0x36f   :  { %v3632_v34 = vperm.slane %v3599_v8, 0  ;;  %v3892_v8 = vld.sshfl [vmem:[#allocation1 + $0x8] sm:$0xff pattern:$0x73625140] }
 0x371   :  { %v3636_v53 = vmul.f32 %v3632_v34, %v3628_v16 }
 0x373   :  { %v3579_v20 = vpop.f32.mrf.mxu3  ;;  %v3559_v57 = vpop.f32.mrf.mxu2 }
 0x374   :  { %v3630_v36 = vperm.slane %v3559_v57, 0  ;;  %v3631_v44 = vperm.slane %v3579_v20, 0 }
 0x376   :  { %v3634_v26 = vmul.f32 %v3630_v36, %v3626_v23  ;;  %v3635_v2 = vmul.f32 %v3631_v44, %v3627_v58 }
 0x37b   :  { %v3665_v29 = vpop.f32.mrf.mxu3  ;;  %v3619_v62 = vpop.f32.mrf.mxu2 }
 0x37c   :  { %v3666_v35 = vadd.f32 %v5878_v24, %v3665_v29  ;;  %v3633_v31 = vperm.slane %v3619_v62, 0  ;;  %v3879_v24 = vld [vmem:[%s6903_s16] sm:$0xf] }
 0x37d   :  { %v3884_v37 = vperm.slane %v3879_v24, 3  ;;  %v3882_v47 = vperm.slane %v3879_v24, 1  ;;  %v3883_v62 = vperm.slane %v3879_v24, 2 }
 0x37e   :  { %5480 = vmatmul.msk.f32.vlgmr.msrb.gmra.mxu1 %vm3444_vm1, %v3666_v35  ;;  %5481 = vmatmul.msk.f32.vlgmr.msrb.gmra.mxu2 %vm3444_vm1, %v3666_v35  ;;  %v3637_v41 = vmul.f32 %v3633_v31, %v3629_v50  ;;  %v3891_v31 = vld.sshfl [vmem:[#allocation1] sm:$0xff pattern:$0x73625140] }
 0x37f   :  { %5482 = vmatmul.msk.f32.vlgmr.msrb.gmra.mxu3 %vm3444_vm1, %v3666_v35  ;;  %5483 = vmatmul.msk.f32.vlgmr.msrb.gmra.mxu0 %vm3444_vm1, %v3666_v35  ;;  %v3902_v50 = vmul.f32 %v3894_v39, %v3884_v37  ;;  %v3900_v43 = vmul.f32 %v3892_v8, %v3882_v47 }
 0x380   :  { %3751 = vrot.lane.b32.xlu0 %v3666_v35, %s5948_s3 }
 0x3f2   :  { %v3752_v10 = vpop.permute.xlu0 %3751 }
 0x3f3   :  { %5484 = vmatmul.msk.f32.vlgmr.msra.gmra.mxu1 %vm3444_vm1, %v3752_v10  ;;  %5485 = vmatmul.msk.f32.vlgmr.msra.gmra.mxu2 %vm3444_vm1, %v3752_v10 }
 0x3f4   :  { %5486 = vmatmul.msk.f32.vlgmr.msra.gmra.mxu3 %vm3444_vm1, %v3752_v10  ;;  %5487 = vmatmul.msk.f32.vlgmr.msra.gmra.mxu0 %vm3444_vm1, %v3752_v10 }
 0x3fb   :  { %v3688_v46 = vpop.f32.mrf.mxu1 }
 0x3fc   :  { %v3748_v22 = vpop.f32.mrf.mxu0  ;;  %v3835_v48 = vmul.f32 %v3688_v46, %v3634_v26  ;;  %v3881_v46 = vperm.slane %v3879_v24, 0 }
 0x3fd   :  { %v3838_v32 = vmul.f32 %v3748_v22, %v3637_v41  ;;  %v3893_v22 = vld.sshfl [vmem:[#allocation1 + $0x10] sm:$0xff pattern:$0x73625140] }
 0x401   :  { %v3708_v4 = vpop.f32.mrf.mxu2 }
 0x402   :  { %v3728_v56 = vpop.f32.mrf.mxu3  ;;  %v3836_v51 = vmul.f32 %v3708_v4, %v3635_v2  ;;  %v3901_v4 = vmul.f32 %v3893_v22, %v3883_v62 }
 0x403   :  { %v3837_v17 = vmul.f32 %v3728_v56, %v3636_v53 }
 0x470   :  { %v3772_v52 = vpop.f32.mrf.mxu1 }
 0x471   :  { %v3839_v49 = vadd.f32 %v3835_v48, %v3772_v52  ;;  %v3832_v18 = vpop.f32.mrf.mxu0  ;;  %v3899_v48 = vmul.f32 %v3891_v31, %v3881_v46 }
 0x472   :  { %v3842_v61 = vadd.f32 %v3838_v32, %v3832_v18 }
 0x473   :  { %v3843_v6 = vmul.f32 %v3839_v49, %v3839_v49 }
 0x474   :  { %v3846_v28 = vmul.f32 %v3842_v61, %v3842_v61 }
 0x475   :  { %v3847_v55 = vmul.f32 %v3843_v6, %v3839_v49 }
 0x476   :  { %v3850_v12 = vmul.f32 %v3846_v28, %v3842_v61  ;;  %v3792_v59 = vpop.f32.mrf.mxu2 }
 0x477   :  { %v3851_v25 = vmul.f32 0.044715, %v3847_v55  ;;  %v3840_v63 = vadd.f32 %v3836_v51, %v3792_v59  ;;  %v3812_v40 = vpop.f32.mrf.mxu3 }
 0x478   :  { %v3854_v0 = vmul.f32 0.044715, %v3850_v12  ;;  %v3841_v1 = vadd.f32 %v3837_v17, %v3812_v40 }
 0x479   :  { %v3855_v42 = vadd.f32 %v3851_v25, %v3839_v49  ;;  %v3844_v5 = vmul.f32 %v3840_v63, %v3840_v63 }
 0x47a   :  { %v3858_v7 = vadd.f32 %v3854_v0, %v3842_v61  ;;  %v3845_v38 = vmul.f32 %v3841_v1, %v3841_v1 }
 0x47b   :  { %v3859_v60 = vmul.f32 0.7978846, %v3855_v42  ;;  %v3848_v33 = vmul.f32 %v3844_v5, %v3840_v63 }
 0x47c   :  { %v3862_v3 = vmul.f32 0.7978846, %v3858_v7  ;;  %v3849_v11 = vmul.f32 %v3845_v38, %v3841_v1 }
 0x47d   :  { %5883 = vtanh.f32 %v3859_v60  ;;  %v3852_v45 = vmul.f32 0.044715, %v3848_v33 }
 0x47e   :  { %5885 = vtanh.f32 %v3862_v3  ;;  %v3853_v14 = vmul.f32 0.044715, %v3849_v11 }
 0x47f   :  { %v3856_v15 = vadd.f32 %v3852_v45, %v3840_v63 }
 0x480   :  { %v3857_v13 = vadd.f32 %v3853_v14, %v3841_v1 }
 0x481   :  { %v3860_v27 = vmul.f32 0.7978846, %v3856_v15 }
 0x482   :  { %v3861_v54 = vmul.f32 0.7978846, %v3857_v13 }
 0x483   :  { %v5884_v19 = vpop.eup %5883  ;;  %5887 = vtanh.f32 %v3860_v27 }
 0x484   :  { %v5886_v20 = vpop.eup %5885  ;;  %5889 = vtanh.f32 %v3861_v54  ;;  %v3867_v35 = vadd.f32 1.0, %v5884_v19 }
 0x485   :  { %v3870_v29 = vadd.f32 1.0, %v5886_v20 }
 0x486   :  { %v3871_v9 = vmul.f32 0.5, %v3867_v35 }
 0x487   :  { %v3874_v10 = vmul.f32 0.5, %v3870_v29 }
 0x488   :  { %v3875_v44 = vmul.f32 %v3871_v9, %v3839_v49 }
 0x489   :  { %v5888_v57 = vpop.eup %5887  ;;  %v3878_v23 = vmul.f32 %v3874_v10, %v3842_v61 }
 0x48a   :  { %v5890_v21 = vpop.eup %5889  ;;  %v3868_v36 = vadd.f32 1.0, %v5888_v57  ;;  %v3903_v18 = vadd.f32 %v3899_v48, %v3875_v44 }
 0x48b   :  { %v3869_v30 = vadd.f32 1.0, %v5890_v21  ;;  %v3906_v34 = vadd.f32 %v3902_v50, %v3878_v23 }
 0x48c   :  { %v3872_v26 = vmul.f32 0.5, %v3868_v36 }
 0x48d   :  { %v3873_v41 = vmul.f32 0.5, %v3869_v30  ;;  %v3913_v2 = vrot.slane %v3906_v34, 2 }
 0x48e   :  { %v3876_v56 = vmul.f32 %v3872_v26, %v3840_v63 }
 0x48f   :  { %v3877_v32 = vmul.f32 %v3873_v41, %v3841_v1 }
 0x490   :  { %v3904_v52 = vadd.f32 %v3900_v43, %v3876_v56 }
 0x491   :  { %v3905_v58 = vadd.f32 %v3901_v4, %v3877_v32 }
 0x492   :  { %v3911_v16 = vrot.slane %v3904_v52, 6 }
 0x493   :  { %v3912_v6 = vrot.slane %v3905_v58, 4 }
 0x494   :  { %v3914_v61 = vsel %vm3119_vm0, %v3903_v18, %v3911_v16 }
 0x495   :  { %v3916_v53 = vsel %vm3915_vm6, %v3912_v6, %v3913_v2 }
 0x496   :  { %v3918_v28 = vsel %vm3917_vm7, %v3914_v61, %v3916_v53 }
 0x497   :  { %3920 = vst [vmem:[%s6904_s17] sm:$0xff] %v3918_v28 }
 0x498   :  { %3933 = vsyncpa [#allocation3], 1 }
 0x499   :  { %3934 = vsyncpa [#allocation5], 1 }

</bundles_post_ra>
